<compile_context>
chip_gen: v7x
topology: tpu7x:2x2x1
jax: 0.10.0
libtpu: 0.0.40
codegen_flags: <defaults>
</compile_context>

<pallas_src>
import functools
import math

import jax
import jax.numpy as jnp
from jax.experimental import pallas as pl
from jax.experimental.pallas import tpu as pltpu


# --------------------------- Fused decoder-layer kernel ---------------------------

def _make_decoder_layer_kernel(num_heads, scale, eps, return_attn, apply_final_ln):
    def kernel(*refs):
        (x_ref, mem_ref, tmask_ref, smask_ref,
         ln1_g, ln1_b, wqkv, bqkv, wo1, bo1,
         ln2_g, ln2_b, wq2, bq2, wkv2, bkv2, wo2, bo2,
         ln3_g, ln3_b, w1, b1, w2, b2) = refs[:24]
        idx = 24
        if apply_final_ln:
            fin_g, fin_b = refs[idx:idx + 2]
            idx += 2
        o_ref = refs[idx]
        idx += 1
        attn_ref = refs[idx] if return_attn else None

        def ln(t, g, b):
            # nn.LayerNorm semantics: biased variance, eps inside rsqrt (f32 math)
            mean = jnp.mean(t, axis=-1, keepdims=True)
            var = jnp.mean(jnp.square(t - mean), axis=-1, keepdims=True)
            return (t - mean) * jax.lax.rsqrt(var + eps) * g + b

        def split_heads(t):
            # (L, D) f32 -> (H, L, dk) bf16 via static lane slices stacked on a leading axis
            dk = t.shape[-1] // num_heads
            tb = t.astype(jnp.bfloat16)
            return jnp.stack(
                [tb[:, h * dk:(h + 1) * dk] for h in range(num_heads)], axis=0)

        def mha(q, k, v, mask, exact_softmax):
            qh = split_heads(q)                       # (H, T, dk) bf16
            kh = split_heads(k)                       # (H, S, dk) bf16
            vh = split_heads(v)                       # (H, S, dk) bf16
            # batched score matmul (bf16 in, f32 accumulate), masked_fill(mask==0, -1e9)
            s = jnp.einsum("htd,hsd->hts", qh, kh,
                           preferred_element_type=jnp.float32) * scale
            s = jnp.where(mask[None] > 0, s, jnp.float32(-1e9))
            m = jnp.max(s, axis=-1, keepdims=True)
            e = jnp.exp(s - m)
            denom = jnp.sum(e, axis=-1, keepdims=True)
            if exact_softmax:
                p = e / denom                          # exact for the returned attn probs
            else:
                p = e * pl.reciprocal(denom, approx=True)
            ctx_h = jnp.einsum("hts,hsd->htd", p.astype(jnp.bfloat16), vh,
                               preferred_element_type=jnp.float32)   # (H, T, dk)
            ctx = jnp.concatenate([ctx_h[h] for h in range(num_heads)], axis=-1)  # (T, D)
            return ctx, p

        x = x_ref[0].astype(jnp.float32)              # (T, D)
        mem = mem_ref[0]                              # (S, D)
        tmask = tmask_ref[0]                          # (Mt, T), Mt in {1, T}
        smask = smask_ref[0]                          # (Ms, S), Ms in {1, T}
        D = x.shape[-1]

        # ---- sublayer 1: x + SelfAttn(LN(x)), fused (D, 3D) QKV projection ----
        xn = ln(x, ln1_g[...], ln1_b[...])
        qkv = jnp.dot(xn.astype(jnp.bfloat16), wqkv[...],
                      preferred_element_type=jnp.float32) + bqkv[...]
        ctx, _ = mha(qkv[:, :D], qkv[:, D:2 * D], qkv[:, 2 * D:], tmask,
                     exact_softmax=False)
        x = x + jnp.dot(ctx.astype(jnp.bfloat16), wo1[...],
                        preferred_element_type=jnp.float32) + bo1[...]

        # ---- sublayer 2: x + CrossAttn(LN(x), memory), fused (D, 2D) KV projection ----
        xn = ln(x, ln2_g[...], ln2_b[...])
        q = jnp.dot(xn.astype(jnp.bfloat16), wq2[...],
                    preferred_element_type=jnp.float32) + bq2[...]
        kv = jnp.dot(mem.astype(jnp.bfloat16), wkv2[...],
                     preferred_element_type=jnp.float32) + bkv2[...]
        ctx, p = mha(q, kv[:, :D], kv[:, D:], smask, exact_softmax=return_attn)
        if return_attn:
            attn_ref[0] = p.astype(attn_ref.dtype)
        x = x + jnp.dot(ctx.astype(jnp.bfloat16), wo2[...],
                        preferred_element_type=jnp.float32) + bo2[...]

        # ---- sublayer 3: x + FFN(LN(x)) ----
        xn = ln(x, ln3_g[...], ln3_b[...])
        hdn = jnp.maximum(
            jnp.dot(xn.astype(jnp.bfloat16), w1[...],
                    preferred_element_type=jnp.float32) + b1[...], 0.0)
        x = x + jnp.dot(hdn.astype(jnp.bfloat16), w2[...],
                        preferred_element_type=jnp.float32) + b2[...]

        # ---- final nn.LayerNorm folded into the last layer ----
        if apply_final_ln:
            x = ln(x, fin_g[...], fin_b[...])
        o_ref[0] = x.astype(o_ref.dtype)

    return kernel


def decoder_layer_forward(x, memory, src_mask, tgt_mask, lp, final_ln, *,
                          num_heads, return_attn, eps=1e-5):
    """x: (B,T,D); memory: (B,S,D); src_mask: (B,Ms,S); tgt_mask: (B,Mt,T)."""
    B, T, D = x.shape
    S = memory.shape[1]
    Mt = tgt_mask.shape[1]
    Ms = src_mask.shape[1]
    scale = 1.0 / math.sqrt(D // num_heads)

    sa, ca = lp["self_attn"], lp["src_attn"]
    weights = [sa["ln_g"], sa["ln_b"], sa["wqkv"], sa["bqkv"], sa["wo"], sa["bo"],
               ca["ln_g"], ca["ln_b"], ca["wq"], ca["bq"], ca["wkv"], ca["bkv"],
               ca["wo"], ca["bo"],
               lp["ln3_g"], lp["ln3_b"], lp["ffn_w1"], lp["ffn_b1"],
               lp["ffn_w2"], lp["ffn_b2"]]
    if final_ln is not None:
        weights += list(final_ln)

    args = [x, memory, tgt_mask, src_mask] + weights

    in_specs = [pl.BlockSpec((1, T, D), lambda b: (b, 0, 0)),
                pl.BlockSpec((1, S, D), lambda b: (b, 0, 0)),
                pl.BlockSpec((1, Mt, T), lambda b: (b, 0, 0)),
                pl.BlockSpec((1, Ms, S), lambda b: (b, 0, 0))]
    # all weight / bias / LN params are 2D, same block for every grid step
    in_specs += [pl.BlockSpec(w.shape, lambda b: (0, 0)) for w in weights]

    out_shapes = [jax.ShapeDtypeStruct((B, T, D), x.dtype)]
    out_specs = [pl.BlockSpec((1, T, D), lambda b: (b, 0, 0))]
    if return_attn:
        out_shapes.append(jax.ShapeDtypeStruct((B, num_heads, T, S), jnp.float32))
        out_specs.append(pl.BlockSpec((1, num_heads, T, S), lambda b: (b, 0, 0, 0)))

    def _bytes(shape, dtype):
        return int(math.prod(shape)) * jnp.dtype(dtype).itemsize

    block_bytes = (_bytes((T, D), x.dtype) + _bytes((S, D), memory.dtype)
                   + _bytes((Mt, T), tgt_mask.dtype) + _bytes((Ms, S), src_mask.dtype)
                   + sum(_bytes(w.shape, w.dtype) for w in weights)
                   + _bytes((T, D), x.dtype))
    if return_attn:
        block_bytes += _bytes((num_heads, T, S), jnp.float32)
    # 2x double-buffering + 2x headroom for in-kernel temporaries, clamped for v7x
    vmem_limit = int(max(16 << 20, min(4 * block_bytes, 64 << 20)))

    kernel = _make_decoder_layer_kernel(num_heads, scale, eps, return_attn,
                                        final_ln is not None)
    res = pl.pallas_call(
        kernel,
        out_shape=tuple(out_shapes) if return_attn else out_shapes[0],
        grid=(B,),
        in_specs=in_specs,
        out_specs=tuple(out_specs) if return_attn else out_specs[0],
        compiler_params=pltpu.CompilerParams(
            dimension_semantics=("parallel",),
            vmem_limit_bytes=vmem_limit),
    )(*args)

    if return_attn:
        return res[0], res[1]
    return res, None


# ------------------------------ Decoder forward --------------------------------

def decoder_forward(params, x, memory, src_mask, tgt_mask, *, h):
    layers = params["layers"]
    n = len(layers)
    attn = None
    for i, lp in enumerate(layers):
        last = (i == n - 1)
        x, a = decoder_layer_forward(
            x, memory, src_mask, tgt_mask, lp,
            final_ln=(params["norm_g"], params["norm_b"]) if last else None,
            num_heads=h, return_attn=last)
        if a is not None:
            attn = a
    return x, attn


# ------------------------------ Parameter init ---------------------------------

def init_params(key, d_model, d_ff, h, n_layers, w_dtype=jnp.bfloat16):
    def dense(k, fan_in, fan_out):
        # stored pre-transposed (in, out) so kernels do x @ w directly
        return jax.random.normal(k, (fan_in, fan_out), jnp.float32) / math.sqrt(fan_in)

    def ones_row(n):
        return jnp.ones((1, n), jnp.float32)

    def zeros_row(n):
        return jnp.zeros((1, n), jnp.float32)

    layers = []
    for _ in range(n_layers):
        key, *ks = jax.random.split(key, 11)
        ks = iter(ks)
        self_attn = {
            "ln_g": ones_row(d_model), "ln_b": zeros_row(d_model),
            # fused Q/K/V projection -> one (D, 3D) bf16 matmul
            "wqkv": jnp.concatenate([dense(next(ks), d_model, d_model)
                                     for _ in range(3)], axis=1).astype(w_dtype),
            "bqkv": zeros_row(3 * d_model),
            "wo": dense(next(ks), d_model, d_model).astype(w_dtype),
            "bo": zeros_row(d_model),
        }
        src_attn = {
            "ln_g": ones_row(d_model), "ln_b": zeros_row(d_model),
            "wq": dense(next(ks), d_model, d_model).astype(w_dtype),
            "bq": zeros_row(d_model),
            # fused K/V projection -> one (D, 2D) bf16 matmul
            "wkv": jnp.concatenate([dense(next(ks), d_model, d_model)
                                    for _ in range(2)], axis=1).astype(w_dtype),
            "bkv": zeros_row(2 * d_model),
            "wo": dense(next(ks), d_model, d_model).astype(w_dtype),
            "bo": zeros_row(d_model),
        }
        layers.append({
            "self_attn": self_attn,
            "src_attn": src_attn,
            "ln3_g": ones_row(d_model), "ln3_b": zeros_row(d_model),
            "ffn_w1": dense(next(ks), d_model, d_ff).astype(w_dtype),
            "ffn_b1": zeros_row(d_ff),
            "ffn_w2": dense(next(ks), d_ff, d_model).astype(w_dtype),
            "ffn_b2": zeros_row(d_model),
        })
    return {
        "layers": layers,
        "norm_g": ones_row(d_model),   # nn.LayerNorm default init
        "norm_b": zeros_row(d_model),
    }


# ----------------------------------- Main ---------------------------------------

if __name__ == "__main__":
    # lane-dense demo config: D = 128 (one full lane group), dk = 32
    B, T, S, D, H, D_FF, N_LAYERS = 2, 8, 16, 128, 4, 256, 2

    key = jax.random.PRNGKey(0)
    k_x, k_m, k_p = jax.random.split(key, 3)

    x = jax.random.normal(k_x, (B, T, D), jnp.float32)        # decoder input
    memory = jax.random.normal(k_m, (B, S, D), jnp.float32)   # encoder memory
    tgt_mask = jnp.broadcast_to(jnp.tril(jnp.ones((T, T), jnp.float32)), (B, T, T))
    src_mask = jnp.ones((B, 1, S), jnp.float32)               # broadcast in-kernel

    params = init_params(k_p, D, D_FF, H, N_LAYERS)

    fwd = jax.jit(functools.partial(decoder_forward, h=H))
    out, attn = fwd(params, x, memory, src_mask, tgt_mask)
    jax.block_until_ready((out, attn))

    assert out.shape == (B, T, D), out.shape
    assert attn.shape == (B, H, T, S), attn.shape
    assert bool(jnp.all(jnp.isfinite(out))) and bool(jnp.all(jnp.isfinite(attn)))
    row_sums = jnp.sum(attn, axis=-1)
    assert bool(jnp.all(jnp.abs(row_sums - 1.0) < 1e-3)), "attn probs must sum to 1"
    # TODO(synk): exact DecoderLayer internals are not given in the reference file;
    # standard Annotated-Transformer pre-LN decoder-layer semantics are assumed, and the
    # returned `attn` is taken to be the last layer's cross-attention probabilities.
    print("KERNEL_OK")
</pallas_src>

<mosaic_0001>
module attributes {stable_mosaic.version = 11 : i64} {
  func.func @kernel(%arg0: i32, %arg1: memref<1x8x128xf32, #tpu.memory_space<vmem>>, %arg2: memref<1x16x128xf32, #tpu.memory_space<vmem>>, %arg3: memref<1x8x8xf32, #tpu.memory_space<vmem>>, %arg4: memref<1x1x16xf32, #tpu.memory_space<vmem>>, %arg5: memref<1x128xf32, #tpu.memory_space<vmem>>, %arg6: memref<1x128xf32, #tpu.memory_space<vmem>>, %arg7: memref<128x384xbf16, #tpu.memory_space<vmem>>, %arg8: memref<1x384xf32, #tpu.memory_space<vmem>>, %arg9: memref<128x128xbf16, #tpu.memory_space<vmem>>, %arg10: memref<1x128xf32, #tpu.memory_space<vmem>>, %arg11: memref<1x128xf32, #tpu.memory_space<vmem>>, %arg12: memref<1x128xf32, #tpu.memory_space<vmem>>, %arg13: memref<128x128xbf16, #tpu.memory_space<vmem>>, %arg14: memref<1x128xf32, #tpu.memory_space<vmem>>, %arg15: memref<128x256xbf16, #tpu.memory_space<vmem>>, %arg16: memref<1x256xf32, #tpu.memory_space<vmem>>, %arg17: memref<128x128xbf16, #tpu.memory_space<vmem>>, %arg18: memref<1x128xf32, #tpu.memory_space<vmem>>, %arg19: memref<1x128xf32, #tpu.memory_space<vmem>>, %arg20: memref<1x128xf32, #tpu.memory_space<vmem>>, %arg21: memref<128x256xbf16, #tpu.memory_space<vmem>>, %arg22: memref<1x256xf32, #tpu.memory_space<vmem>>, %arg23: memref<256x128xbf16, #tpu.memory_space<vmem>>, %arg24: memref<1x128xf32, #tpu.memory_space<vmem>>, %arg25: memref<1x8x128xf32, #tpu.memory_space<vmem>>) attributes {dimension_semantics = [#tpu.dimension_semantics<parallel>], iteration_bounds = array<i64: 2>, scalar_prefetch = 0 : i64, scratch_operands = 0 : i64, tpu.core_type = #tpu.core_type<tc>, window_params = [{transform_indices = @transform_0, window_bounds = array<i64: 1, 8, 128>}, {transform_indices = @transform_1, window_bounds = array<i64: 1, 16, 128>}, {transform_indices = @transform_2, window_bounds = array<i64: 1, 8, 8>}, {transform_indices = @transform_3, window_bounds = array<i64: 1, 1, 16>}, {pipeline_mode = #tpu.pipeline_mode<synchronous>, transform_indices = @transform_4, window_bounds = array<i64: 1, 128>}, {pipeline_mode = #tpu.pipeline_mode<synchronous>, transform_indices = @transform_5, window_bounds = array<i64: 1, 128>}, {pipeline_mode = #tpu.pipeline_mode<synchronous>, transform_indices = @transform_6, window_bounds = array<i64: 128, 384>}, {pipeline_mode = #tpu.pipeline_mode<synchronous>, transform_indices = @transform_7, window_bounds = array<i64: 1, 384>}, {pipeline_mode = #tpu.pipeline_mode<synchronous>, transform_indices = @transform_8, window_bounds = array<i64: 128, 128>}, {pipeline_mode = #tpu.pipeline_mode<synchronous>, transform_indices = @transform_9, window_bounds = array<i64: 1, 128>}, {pipeline_mode = #tpu.pipeline_mode<synchronous>, transform_indices = @transform_10, window_bounds = array<i64: 1, 128>}, {pipeline_mode = #tpu.pipeline_mode<synchronous>, transform_indices = @transform_11, window_bounds = array<i64: 1, 128>}, {pipeline_mode = #tpu.pipeline_mode<synchronous>, transform_indices = @transform_12, window_bounds = array<i64: 128, 128>}, {pipeline_mode = #tpu.pipeline_mode<synchronous>, transform_indices = @transform_13, window_bounds = array<i64: 1, 128>}, {pipeline_mode = #tpu.pipeline_mode<synchronous>, transform_indices = @transform_14, window_bounds = array<i64: 128, 256>}, {pipeline_mode = #tpu.pipeline_mode<synchronous>, transform_indices = @transform_15, window_bounds = array<i64: 1, 256>}, {pipeline_mode = #tpu.pipeline_mode<synchronous>, transform_indices = @transform_16, window_bounds = array<i64: 128, 128>}, {pipeline_mode = #tpu.pipeline_mode<synchronous>, transform_indices = @transform_17, window_bounds = array<i64: 1, 128>}, {pipeline_mode = #tpu.pipeline_mode<synchronous>, transform_indices = @transform_18, window_bounds = array<i64: 1, 128>}, {pipeline_mode = #tpu.pipeline_mode<synchronous>, transform_indices = @transform_19, window_bounds = array<i64: 1, 128>}, {pipeline_mode = #tpu.pipeline_mode<synchronous>, transform_indices = @transform_20, window_bounds = array<i64: 128, 256>}, {pipeline_mode = #tpu.pipeline_mode<synchronous>, transform_indices = @transform_21, window_bounds = array<i64: 1, 256>}, {pipeline_mode = #tpu.pipeline_mode<synchronous>, transform_indices = @transform_22, window_bounds = array<i64: 256, 128>}, {pipeline_mode = #tpu.pipeline_mode<synchronous>, transform_indices = @transform_23, window_bounds = array<i64: 1, 128>}, {transform_indices = @transform_24, window_bounds = array<i64: 1, 8, 128>}]} {
    %c0 = arith.constant 0 : index
    %c0_0 = arith.constant 0 : index
    %c0_1 = arith.constant 0 : index
    %0 = vector.load %arg1[%c0, %c0_0, %c0_1] : memref<1x8x128xf32, #tpu.memory_space<vmem>>, vector<1x8x128xf32>
    %1 = vector.shape_cast %0 : vector<1x8x128xf32> to vector<8x128xf32>
    %c0_2 = arith.constant 0 : index
    %c0_3 = arith.constant 0 : index
    %c0_4 = arith.constant 0 : index
    %2 = vector.load %arg2[%c0_2, %c0_3, %c0_4] : memref<1x16x128xf32, #tpu.memory_space<vmem>>, vector<1x16x128xf32>
    %3 = vector.shape_cast %2 : vector<1x16x128xf32> to vector<16x128xf32>
    %c0_5 = arith.constant 0 : index
    %c0_6 = arith.constant 0 : index
    %c0_7 = arith.constant 0 : index
    %4 = vector.load %arg3[%c0_5, %c0_6, %c0_7] : memref<1x8x8xf32, #tpu.memory_space<vmem>>, vector<1x8x8xf32>
    %5 = vector.shape_cast %4 : vector<1x8x8xf32> to vector<8x8xf32>
    %c0_8 = arith.constant 0 : index
    %c0_9 = arith.constant 0 : index
    %c0_10 = arith.constant 0 : index
    %6 = vector.load %arg4[%c0_8, %c0_9, %c0_10] : memref<1x1x16xf32, #tpu.memory_space<vmem>>, vector<1x1x16xf32>
    %7 = vector.shape_cast %6 : vector<1x1x16xf32> to vector<1x16xf32>
    %c0_11 = arith.constant 0 : index
    %c0_12 = arith.constant 0 : index
    %8 = vector.load %arg5[%c0_11, %c0_12] : memref<1x128xf32, #tpu.memory_space<vmem>>, vector<1x128xf32>
    %c0_13 = arith.constant 0 : index
    %c0_14 = arith.constant 0 : index
    %9 = vector.load %arg6[%c0_13, %c0_14] : memref<1x128xf32, #tpu.memory_space<vmem>>, vector<1x128xf32>
    %cst = arith.constant dense<0.000000e+00> : vector<8xf32>
    %10 = vector.multi_reduction <add>, %1, %cst [1] : vector<8x128xf32> to vector<8xf32>
    %11 = vector.shape_cast %10 : vector<8xf32> to vector<8x1xf32>
    %cst_15 = arith.constant 1.280000e+02 : f32
    %12 = vector.broadcast %cst_15 : f32 to vector<8x1xf32>
    %13 = arith.divf %11, %12 : vector<8x1xf32>
    %14 = vector.broadcast %13 : vector<8x1xf32> to vector<8x128xf32>
    %15 = arith.subf %1, %14 : vector<8x128xf32>
    %16 = arith.mulf %15, %15 : vector<8x128xf32>
    %cst_16 = arith.constant dense<0.000000e+00> : vector<8xf32>
    %17 = vector.multi_reduction <add>, %16, %cst_16 [1] : vector<8x128xf32> to vector<8xf32>
    %18 = vector.shape_cast %17 : vector<8xf32> to vector<8x1xf32>
    %cst_17 = arith.constant 1.280000e+02 : f32
    %19 = vector.broadcast %cst_17 : f32 to vector<8x1xf32>
    %20 = arith.divf %18, %19 : vector<8x1xf32>
    %21 = vector.broadcast %13 : vector<8x1xf32> to vector<8x128xf32>
    %22 = arith.subf %1, %21 : vector<8x128xf32>
    %cst_18 = arith.constant 9.99999974E-6 : f32
    %23 = vector.broadcast %cst_18 : f32 to vector<8x1xf32>
    %24 = arith.addf %20, %23 : vector<8x1xf32>
    %25 = math.rsqrt %24 : vector<8x1xf32>
    %26 = vector.broadcast %25 : vector<8x1xf32> to vector<8x128xf32>
    %27 = arith.mulf %22, %26 : vector<8x128xf32>
    %28 = vector.broadcast %8 : vector<1x128xf32> to vector<8x128xf32>
    %29 = arith.mulf %27, %28 : vector<8x128xf32>
    %30 = vector.broadcast %9 : vector<1x128xf32> to vector<8x128xf32>
    %31 = arith.addf %29, %30 : vector<8x128xf32>
    %32 = arith.truncf %31 : vector<8x128xf32> to vector<8x128xbf16>
    %c0_19 = arith.constant 0 : index
    %c0_20 = arith.constant 0 : index
    %33 = vector.load %arg7[%c0_19, %c0_20] : memref<128x384xbf16, #tpu.memory_space<vmem>>, vector<128x384xbf16>
    %cst_21 = arith.constant dense<0.000000e+00> : vector<8x384xf32>
    %34 = tpu.matmul %32, %33, %cst_21 {dimension_numbers = #tpu.dot_dimension_numbers<[1], [0], [0], [1], [0, 0, 1, 1], [], []>} : vector<8x128xbf16>, vector<128x384xbf16>, vector<8x384xf32> -> vector<8x384xf32>
    %c0_22 = arith.constant 0 : index
    %c0_23 = arith.constant 0 : index
    %35 = vector.load %arg8[%c0_22, %c0_23] : memref<1x384xf32, #tpu.memory_space<vmem>>, vector<1x384xf32>
    %36 = vector.broadcast %35 : vector<1x384xf32> to vector<8x384xf32>
    %37 = arith.addf %34, %36 : vector<8x384xf32>
    %38 = vector.extract_strided_slice %37 {offsets = [0, 0], sizes = [8, 128], strides = [1, 1]} : vector<8x384xf32> to vector<8x128xf32>
    %39 = vector.extract_strided_slice %37 {offsets = [0, 128], sizes = [8, 128], strides = [1, 1]} : vector<8x384xf32> to vector<8x128xf32>
    %40 = vector.extract_strided_slice %37 {offsets = [0, 256], sizes = [8, 128], strides = [1, 1]} : vector<8x384xf32> to vector<8x128xf32>
    %41 = arith.truncf %38 : vector<8x128xf32> to vector<8x128xbf16>
    %42 = vector.extract_strided_slice %41 {offsets = [0, 0], sizes = [8, 32], strides = [1, 1]} : vector<8x128xbf16> to vector<8x32xbf16>
    %43 = vector.extract_strided_slice %41 {offsets = [0, 32], sizes = [8, 32], strides = [1, 1]} : vector<8x128xbf16> to vector<8x32xbf16>
    %44 = vector.extract_strided_slice %41 {offsets = [0, 64], sizes = [8, 32], strides = [1, 1]} : vector<8x128xbf16> to vector<8x32xbf16>
    %45 = vector.extract_strided_slice %41 {offsets = [0, 96], sizes = [8, 32], strides = [1, 1]} : vector<8x128xbf16> to vector<8x32xbf16>
    %46 = vector.shape_cast %42 : vector<8x32xbf16> to vector<1x8x32xbf16>
    %47 = vector.shape_cast %43 : vector<8x32xbf16> to vector<1x8x32xbf16>
    %48 = vector.shape_cast %44 : vector<8x32xbf16> to vector<1x8x32xbf16>
    %49 = vector.shape_cast %45 : vector<8x32xbf16> to vector<1x8x32xbf16>
    %50 = tpu.concatenate %46, %47, %48, %49 in 0 : vector<1x8x32xbf16>, vector<1x8x32xbf16>, vector<1x8x32xbf16>, vector<1x8x32xbf16> -> vector<4x8x32xbf16>
    %51 = arith.truncf %39 : vector<8x128xf32> to vector<8x128xbf16>
    %52 = vector.extract_strided_slice %51 {offsets = [0, 0], sizes = [8, 32], strides = [1, 1]} : vector<8x128xbf16> to vector<8x32xbf16>
    %53 = vector.extract_strided_slice %51 {offsets = [0, 32], sizes = [8, 32], strides = [1, 1]} : vector<8x128xbf16> to vector<8x32xbf16>
    %54 = vector.extract_strided_slice %51 {offsets = [0, 64], sizes = [8, 32], strides = [1, 1]} : vector<8x128xbf16> to vector<8x32xbf16>
    %55 = vector.extract_strided_slice %51 {offsets = [0, 96], sizes = [8, 32], strides = [1, 1]} : vector<8x128xbf16> to vector<8x32xbf16>
    %56 = vector.shape_cast %52 : vector<8x32xbf16> to vector<1x8x32xbf16>
    %57 = vector.shape_cast %53 : vector<8x32xbf16> to vector<1x8x32xbf16>
    %58 = vector.shape_cast %54 : vector<8x32xbf16> to vector<1x8x32xbf16>
    %59 = vector.shape_cast %55 : vector<8x32xbf16> to vector<1x8x32xbf16>
    %60 = tpu.concatenate %56, %57, %58, %59 in 0 : vector<1x8x32xbf16>, vector<1x8x32xbf16>, vector<1x8x32xbf16>, vector<1x8x32xbf16> -> vector<4x8x32xbf16>
    %61 = arith.truncf %40 : vector<8x128xf32> to vector<8x128xbf16>
    %62 = vector.extract_strided_slice %61 {offsets = [0, 0], sizes = [8, 32], strides = [1, 1]} : vector<8x128xbf16> to vector<8x32xbf16>
    %63 = vector.extract_strided_slice %61 {offsets = [0, 32], sizes = [8, 32], strides = [1, 1]} : vector<8x128xbf16> to vector<8x32xbf16>
    %64 = vector.extract_strided_slice %61 {offsets = [0, 64], sizes = [8, 32], strides = [1, 1]} : vector<8x128xbf16> to vector<8x32xbf16>
    %65 = vector.extract_strided_slice %61 {offsets = [0, 96], sizes = [8, 32], strides = [1, 1]} : vector<8x128xbf16> to vector<8x32xbf16>
    %66 = vector.shape_cast %62 : vector<8x32xbf16> to vector<1x8x32xbf16>
    %67 = vector.shape_cast %63 : vector<8x32xbf16> to vector<1x8x32xbf16>
    %68 = vector.shape_cast %64 : vector<8x32xbf16> to vector<1x8x32xbf16>
    %69 = vector.shape_cast %65 : vector<8x32xbf16> to vector<1x8x32xbf16>
    %70 = tpu.concatenate %66, %67, %68, %69 in 0 : vector<1x8x32xbf16>, vector<1x8x32xbf16>, vector<1x8x32xbf16>, vector<1x8x32xbf16> -> vector<4x8x32xbf16>
    "tpu.trace_start"() <{level = 10 : i32, message = "htd,hsd->hts"}> : () -> ()
    %cst_24 = arith.constant dense<0.000000e+00> : vector<4x8x8xf32>
    %71 = tpu.matmul %50, %60, %cst_24 {dimension_numbers = #tpu.dot_dimension_numbers<[2], [2], [1], [1], [0, 0, 0, 1, 1, 1], [0], [0]>} : vector<4x8x32xbf16>, vector<4x8x32xbf16>, vector<4x8x8xf32> -> vector<4x8x8xf32>
    "tpu.trace_stop"() : () -> ()
    %cst_25 = arith.constant 0.176776692 : f32
    %72 = vector.broadcast %cst_25 : f32 to vector<4x8x8xf32>
    %73 = arith.mulf %71, %72 : vector<4x8x8xf32>
    %74 = vector.shape_cast %5 : vector<8x8xf32> to vector<1x8x8xf32>
    %cst_26 = arith.constant 0.000000e+00 : f32
    %75 = vector.broadcast %cst_26 : f32 to vector<1x8x8xf32>
    %76 = arith.cmpf ogt, %74, %75 : vector<1x8x8xf32>
    %cst_27 = arith.constant -1.000000e+09 : f32
    %77 = vector.shape_cast %76 : vector<1x8x8xi1> to vector<1x8x8xi1>
    %78 = vector.broadcast %77 : vector<1x8x8xi1> to vector<4x8x8xi1>
    %79 = vector.broadcast %cst_27 : f32 to vector<4x8x8xf32>
    %80 = arith.select %78, %73, %79 : vector<4x8x8xi1>, vector<4x8x8xf32>
    %cst_28 = arith.constant dense<0xFF800000> : vector<4x8xf32>
    %81 = vector.multi_reduction <maximumf>, %80, %cst_28 [2] : vector<4x8x8xf32> to vector<4x8xf32>
    %82 = vector.shape_cast %81 : vector<4x8xf32> to vector<4x8x1xf32>
    %83 = vector.broadcast %82 : vector<4x8x1xf32> to vector<4x8x8xf32>
    %84 = arith.subf %80, %83 : vector<4x8x8xf32>
    %85 = math.exp %84 : vector<4x8x8xf32>
    %cst_29 = arith.constant dense<0.000000e+00> : vector<4x8xf32>
    %86 = vector.multi_reduction <add>, %85, %cst_29 [2] : vector<4x8x8xf32> to vector<4x8xf32>
    %87 = vector.shape_cast %86 : vector<4x8xf32> to vector<4x8x1xf32>
    %88 = tpu.reciprocal %87 {approx = true} : vector<4x8x1xf32> -> vector<4x8x1xf32>
    %89 = vector.broadcast %88 : vector<4x8x1xf32> to vector<4x8x8xf32>
    %90 = arith.mulf %85, %89 : vector<4x8x8xf32>
    %91 = arith.truncf %90 : vector<4x8x8xf32> to vector<4x8x8xbf16>
    "tpu.trace_start"() <{level = 10 : i32, message = "hts,hsd->htd"}> : () -> ()
    %cst_30 = arith.constant dense<0.000000e+00> : vector<4x8x32xf32>
    %92 = tpu.matmul %91, %70, %cst_30 {dimension_numbers = #tpu.dot_dimension_numbers<[2], [1], [1], [2], [0, 0, 0, 1, 1, 2], [0], [0]>} : vector<4x8x8xbf16>, vector<4x8x32xbf16>, vector<4x8x32xf32> -> vector<4x8x32xf32>
    "tpu.trace_stop"() : () -> ()
    %93 = vector.extract_strided_slice %92 {offsets = [0, 0, 0], sizes = [1, 8, 32], strides = [1, 1, 1]} : vector<4x8x32xf32> to vector<1x8x32xf32>
    %94 = vector.shape_cast %93 : vector<1x8x32xf32> to vector<8x32xf32>
    %95 = vector.extract_strided_slice %92 {offsets = [1, 0, 0], sizes = [1, 8, 32], strides = [1, 1, 1]} : vector<4x8x32xf32> to vector<1x8x32xf32>
    %96 = vector.shape_cast %95 : vector<1x8x32xf32> to vector<8x32xf32>
    %97 = vector.extract_strided_slice %92 {offsets = [2, 0, 0], sizes = [1, 8, 32], strides = [1, 1, 1]} : vector<4x8x32xf32> to vector<1x8x32xf32>
    %98 = vector.shape_cast %97 : vector<1x8x32xf32> to vector<8x32xf32>
    %99 = vector.extract_strided_slice %92 {offsets = [3, 0, 0], sizes = [1, 8, 32], strides = [1, 1, 1]} : vector<4x8x32xf32> to vector<1x8x32xf32>
    %100 = vector.shape_cast %99 : vector<1x8x32xf32> to vector<8x32xf32>
    %101 = tpu.concatenate %94, %96, %98, %100 in 1 : vector<8x32xf32>, vector<8x32xf32>, vector<8x32xf32>, vector<8x32xf32> -> vector<8x128xf32>
    %102 = arith.truncf %101 : vector<8x128xf32> to vector<8x128xbf16>
    %c0_31 = arith.constant 0 : index
    %c0_32 = arith.constant 0 : index
    %103 = vector.load %arg9[%c0_31, %c0_32] : memref<128x128xbf16, #tpu.memory_space<vmem>>, vector<128x128xbf16>
    %cst_33 = arith.constant dense<0.000000e+00> : vector<8x128xf32>
    %104 = tpu.matmul %102, %103, %cst_33 {dimension_numbers = #tpu.dot_dimension_numbers<[1], [0], [0], [1], [0, 0, 1, 1], [], []>} : vector<8x128xbf16>, vector<128x128xbf16>, vector<8x128xf32> -> vector<8x128xf32>
    %105 = arith.addf %1, %104 : vector<8x128xf32>
    %c0_34 = arith.constant 0 : index
    %c0_35 = arith.constant 0 : index
    %106 = vector.load %arg10[%c0_34, %c0_35] : memref<1x128xf32, #tpu.memory_space<vmem>>, vector<1x128xf32>
    %107 = vector.broadcast %106 : vector<1x128xf32> to vector<8x128xf32>
    %108 = arith.addf %105, %107 : vector<8x128xf32>
    %c0_36 = arith.constant 0 : index
    %c0_37 = arith.constant 0 : index
    %109 = vector.load %arg11[%c0_36, %c0_37] : memref<1x128xf32, #tpu.memory_space<vmem>>, vector<1x128xf32>
    %c0_38 = arith.constant 0 : index
    %c0_39 = arith.constant 0 : index
    %110 = vector.load %arg12[%c0_38, %c0_39] : memref<1x128xf32, #tpu.memory_space<vmem>>, vector<1x128xf32>
    %cst_40 = arith.constant dense<0.000000e+00> : vector<8xf32>
    %111 = vector.multi_reduction <add>, %108, %cst_40 [1] : vector<8x128xf32> to vector<8xf32>
    %112 = vector.shape_cast %111 : vector<8xf32> to vector<8x1xf32>
    %cst_41 = arith.constant 1.280000e+02 : f32
    %113 = vector.broadcast %cst_41 : f32 to vector<8x1xf32>
    %114 = arith.divf %112, %113 : vector<8x1xf32>
    %115 = vector.broadcast %114 : vector<8x1xf32> to vector<8x128xf32>
    %116 = arith.subf %108, %115 : vector<8x128xf32>
    %117 = arith.mulf %116, %116 : vector<8x128xf32>
    %cst_42 = arith.constant dense<0.000000e+00> : vector<8xf32>
    %118 = vector.multi_reduction <add>, %117, %cst_42 [1] : vector<8x128xf32> to vector<8xf32>
    %119 = vector.shape_cast %118 : vector<8xf32> to vector<8x1xf32>
    %cst_43 = arith.constant 1.280000e+02 : f32
    %120 = vector.broadcast %cst_43 : f32 to vector<8x1xf32>
    %121 = arith.divf %119, %120 : vector<8x1xf32>
    %122 = vector.broadcast %114 : vector<8x1xf32> to vector<8x128xf32>
    %123 = arith.subf %108, %122 : vector<8x128xf32>
    %cst_44 = arith.constant 9.99999974E-6 : f32
    %124 = vector.broadcast %cst_44 : f32 to vector<8x1xf32>
    %125 = arith.addf %121, %124 : vector<8x1xf32>
    %126 = math.rsqrt %125 : vector<8x1xf32>
    %127 = vector.broadcast %126 : vector<8x1xf32> to vector<8x128xf32>
    %128 = arith.mulf %123, %127 : vector<8x128xf32>
    %129 = vector.broadcast %109 : vector<1x128xf32> to vector<8x128xf32>
    %130 = arith.mulf %128, %129 : vector<8x128xf32>
    %131 = vector.broadcast %110 : vector<1x128xf32> to vector<8x128xf32>
    %132 = arith.addf %130, %131 : vector<8x128xf32>
    %133 = arith.truncf %132 : vector<8x128xf32> to vector<8x128xbf16>
    %c0_45 = arith.constant 0 : index
    %c0_46 = arith.constant 0 : index
    %134 = vector.load %arg13[%c0_45, %c0_46] : memref<128x128xbf16, #tpu.memory_space<vmem>>, vector<128x128xbf16>
    %cst_47 = arith.constant dense<0.000000e+00> : vector<8x128xf32>
    %135 = tpu.matmul %133, %134, %cst_47 {dimension_numbers = #tpu.dot_dimension_numbers<[1], [0], [0], [1], [0, 0, 1, 1], [], []>} : vector<8x128xbf16>, vector<128x128xbf16>, vector<8x128xf32> -> vector<8x128xf32>
    %c0_48 = arith.constant 0 : index
    %c0_49 = arith.constant 0 : index
    %136 = vector.load %arg14[%c0_48, %c0_49] : memref<1x128xf32, #tpu.memory_space<vmem>>, vector<1x128xf32>
    %137 = vector.broadcast %136 : vector<1x128xf32> to vector<8x128xf32>
    %138 = arith.addf %135, %137 : vector<8x128xf32>
    %139 = arith.truncf %3 : vector<16x128xf32> to vector<16x128xbf16>
    %c0_50 = arith.constant 0 : index
    %c0_51 = arith.constant 0 : index
    %140 = vector.load %arg15[%c0_50, %c0_51] : memref<128x256xbf16, #tpu.memory_space<vmem>>, vector<128x256xbf16>
    %cst_52 = arith.constant dense<0.000000e+00> : vector<16x256xf32>
    %141 = tpu.matmul %139, %140, %cst_52 {dimension_numbers = #tpu.dot_dimension_numbers<[1], [0], [0], [1], [0, 0, 1, 1], [], []>} : vector<16x128xbf16>, vector<128x256xbf16>, vector<16x256xf32> -> vector<16x256xf32>
    %c0_53 = arith.constant 0 : index
    %c0_54 = arith.constant 0 : index
    %142 = vector.load %arg16[%c0_53, %c0_54] : memref<1x256xf32, #tpu.memory_space<vmem>>, vector<1x256xf32>
    %143 = vector.broadcast %142 : vector<1x256xf32> to vector<16x256xf32>
    %144 = arith.addf %141, %143 : vector<16x256xf32>
    %145 = vector.extract_strided_slice %144 {offsets = [0, 0], sizes = [16, 128], strides = [1, 1]} : vector<16x256xf32> to vector<16x128xf32>
    %146 = vector.extract_strided_slice %144 {offsets = [0, 128], sizes = [16, 128], strides = [1, 1]} : vector<16x256xf32> to vector<16x128xf32>
    %147 = arith.truncf %138 : vector<8x128xf32> to vector<8x128xbf16>
    %148 = vector.extract_strided_slice %147 {offsets = [0, 0], sizes = [8, 32], strides = [1, 1]} : vector<8x128xbf16> to vector<8x32xbf16>
    %149 = vector.extract_strided_slice %147 {offsets = [0, 32], sizes = [8, 32], strides = [1, 1]} : vector<8x128xbf16> to vector<8x32xbf16>
    %150 = vector.extract_strided_slice %147 {offsets = [0, 64], sizes = [8, 32], strides = [1, 1]} : vector<8x128xbf16> to vector<8x32xbf16>
    %151 = vector.extract_strided_slice %147 {offsets = [0, 96], sizes = [8, 32], strides = [1, 1]} : vector<8x128xbf16> to vector<8x32xbf16>
    %152 = vector.shape_cast %148 : vector<8x32xbf16> to vector<1x8x32xbf16>
    %153 = vector.shape_cast %149 : vector<8x32xbf16> to vector<1x8x32xbf16>
    %154 = vector.shape_cast %150 : vector<8x32xbf16> to vector<1x8x32xbf16>
    %155 = vector.shape_cast %151 : vector<8x32xbf16> to vector<1x8x32xbf16>
    %156 = tpu.concatenate %152, %153, %154, %155 in 0 : vector<1x8x32xbf16>, vector<1x8x32xbf16>, vector<1x8x32xbf16>, vector<1x8x32xbf16> -> vector<4x8x32xbf16>
    %157 = arith.truncf %145 : vector<16x128xf32> to vector<16x128xbf16>
    %158 = vector.extract_strided_slice %157 {offsets = [0, 0], sizes = [16, 32], strides = [1, 1]} : vector<16x128xbf16> to vector<16x32xbf16>
    %159 = vector.extract_strided_slice %157 {offsets = [0, 32], sizes = [16, 32], strides = [1, 1]} : vector<16x128xbf16> to vector<16x32xbf16>
    %160 = vector.extract_strided_slice %157 {offsets = [0, 64], sizes = [16, 32], strides = [1, 1]} : vector<16x128xbf16> to vector<16x32xbf16>
    %161 = vector.extract_strided_slice %157 {offsets = [0, 96], sizes = [16, 32], strides = [1, 1]} : vector<16x128xbf16> to vector<16x32xbf16>
    %162 = vector.shape_cast %158 : vector<16x32xbf16> to vector<1x16x32xbf16>
    %163 = vector.shape_cast %159 : vector<16x32xbf16> to vector<1x16x32xbf16>
    %164 = vector.shape_cast %160 : vector<16x32xbf16> to vector<1x16x32xbf16>
    %165 = vector.shape_cast %161 : vector<16x32xbf16> to vector<1x16x32xbf16>
    %166 = tpu.concatenate %162, %163, %164, %165 in 0 : vector<1x16x32xbf16>, vector<1x16x32xbf16>, vector<1x16x32xbf16>, vector<1x16x32xbf16> -> vector<4x16x32xbf16>
    %167 = arith.truncf %146 : vector<16x128xf32> to vector<16x128xbf16>
    %168 = vector.extract_strided_slice %167 {offsets = [0, 0], sizes = [16, 32], strides = [1, 1]} : vector<16x128xbf16> to vector<16x32xbf16>
    %169 = vector.extract_strided_slice %167 {offsets = [0, 32], sizes = [16, 32], strides = [1, 1]} : vector<16x128xbf16> to vector<16x32xbf16>
    %170 = vector.extract_strided_slice %167 {offsets = [0, 64], sizes = [16, 32], strides = [1, 1]} : vector<16x128xbf16> to vector<16x32xbf16>
    %171 = vector.extract_strided_slice %167 {offsets = [0, 96], sizes = [16, 32], strides = [1, 1]} : vector<16x128xbf16> to vector<16x32xbf16>
    %172 = vector.shape_cast %168 : vector<16x32xbf16> to vector<1x16x32xbf16>
    %173 = vector.shape_cast %169 : vector<16x32xbf16> to vector<1x16x32xbf16>
    %174 = vector.shape_cast %170 : vector<16x32xbf16> to vector<1x16x32xbf16>
    %175 = vector.shape_cast %171 : vector<16x32xbf16> to vector<1x16x32xbf16>
    %176 = tpu.concatenate %172, %173, %174, %175 in 0 : vector<1x16x32xbf16>, vector<1x16x32xbf16>, vector<1x16x32xbf16>, vector<1x16x32xbf16> -> vector<4x16x32xbf16>
    "tpu.trace_start"() <{level = 10 : i32, message = "htd,hsd->hts"}> : () -> ()
    %cst_55 = arith.constant dense<0.000000e+00> : vector<4x8x16xf32>
    %177 = tpu.matmul %156, %166, %cst_55 {dimension_numbers = #tpu.dot_dimension_numbers<[2], [2], [1], [1], [0, 0, 0, 1, 1, 1], [0], [0]>} : vector<4x8x32xbf16>, vector<4x16x32xbf16>, vector<4x8x16xf32> -> vector<4x8x16xf32>
    "tpu.trace_stop"() : () -> ()
    %cst_56 = arith.constant 0.176776692 : f32
    %178 = vector.broadcast %cst_56 : f32 to vector<4x8x16xf32>
    %179 = arith.mulf %177, %178 : vector<4x8x16xf32>
    %180 = vector.shape_cast %7 : vector<1x16xf32> to vector<1x1x16xf32>
    %cst_57 = arith.constant 0.000000e+00 : f32
    %181 = vector.broadcast %cst_57 : f32 to vector<1x1x16xf32>
    %182 = arith.cmpf ogt, %180, %181 : vector<1x1x16xf32>
    %cst_58 = arith.constant -1.000000e+09 : f32
    %183 = vector.shape_cast %182 : vector<1x1x16xi1> to vector<1x1x16xi1>
    %184 = vector.broadcast %183 : vector<1x1x16xi1> to vector<4x8x16xi1>
    %185 = vector.broadcast %cst_58 : f32 to vector<4x8x16xf32>
    %186 = arith.select %184, %179, %185 : vector<4x8x16xi1>, vector<4x8x16xf32>
    %cst_59 = arith.constant dense<0xFF800000> : vector<4x8xf32>
    %187 = vector.multi_reduction <maximumf>, %186, %cst_59 [2] : vector<4x8x16xf32> to vector<4x8xf32>
    %188 = vector.shape_cast %187 : vector<4x8xf32> to vector<4x8x1xf32>
    %189 = vector.broadcast %188 : vector<4x8x1xf32> to vector<4x8x16xf32>
    %190 = arith.subf %186, %189 : vector<4x8x16xf32>
    %191 = math.exp %190 : vector<4x8x16xf32>
    %cst_60 = arith.constant dense<0.000000e+00> : vector<4x8xf32>
    %192 = vector.multi_reduction <add>, %191, %cst_60 [2] : vector<4x8x16xf32> to vector<4x8xf32>
    %193 = vector.shape_cast %192 : vector<4x8xf32> to vector<4x8x1xf32>
    %194 = tpu.reciprocal %193 {approx = true} : vector<4x8x1xf32> -> vector<4x8x1xf32>
    %195 = vector.broadcast %194 : vector<4x8x1xf32> to vector<4x8x16xf32>
    %196 = arith.mulf %191, %195 : vector<4x8x16xf32>
    %197 = arith.truncf %196 : vector<4x8x16xf32> to vector<4x8x16xbf16>
    "tpu.trace_start"() <{level = 10 : i32, message = "hts,hsd->htd"}> : () -> ()
    %cst_61 = arith.constant dense<0.000000e+00> : vector<4x8x32xf32>
    %198 = tpu.matmul %197, %176, %cst_61 {dimension_numbers = #tpu.dot_dimension_numbers<[2], [1], [1], [2], [0, 0, 0, 1, 1, 2], [0], [0]>} : vector<4x8x16xbf16>, vector<4x16x32xbf16>, vector<4x8x32xf32> -> vector<4x8x32xf32>
    "tpu.trace_stop"() : () -> ()
    %199 = vector.extract_strided_slice %198 {offsets = [0, 0, 0], sizes = [1, 8, 32], strides = [1, 1, 1]} : vector<4x8x32xf32> to vector<1x8x32xf32>
    %200 = vector.shape_cast %199 : vector<1x8x32xf32> to vector<8x32xf32>
    %201 = vector.extract_strided_slice %198 {offsets = [1, 0, 0], sizes = [1, 8, 32], strides = [1, 1, 1]} : vector<4x8x32xf32> to vector<1x8x32xf32>
    %202 = vector.shape_cast %201 : vector<1x8x32xf32> to vector<8x32xf32>
    %203 = vector.extract_strided_slice %198 {offsets = [2, 0, 0], sizes = [1, 8, 32], strides = [1, 1, 1]} : vector<4x8x32xf32> to vector<1x8x32xf32>
    %204 = vector.shape_cast %203 : vector<1x8x32xf32> to vector<8x32xf32>
    %205 = vector.extract_strided_slice %198 {offsets = [3, 0, 0], sizes = [1, 8, 32], strides = [1, 1, 1]} : vector<4x8x32xf32> to vector<1x8x32xf32>
    %206 = vector.shape_cast %205 : vector<1x8x32xf32> to vector<8x32xf32>
    %207 = tpu.concatenate %200, %202, %204, %206 in 1 : vector<8x32xf32>, vector<8x32xf32>, vector<8x32xf32>, vector<8x32xf32> -> vector<8x128xf32>
    %208 = arith.truncf %207 : vector<8x128xf32> to vector<8x128xbf16>
    %c0_62 = arith.constant 0 : index
    %c0_63 = arith.constant 0 : index
    %209 = vector.load %arg17[%c0_62, %c0_63] : memref<128x128xbf16, #tpu.memory_space<vmem>>, vector<128x128xbf16>
    %cst_64 = arith.constant dense<0.000000e+00> : vector<8x128xf32>
    %210 = tpu.matmul %208, %209, %cst_64 {dimension_numbers = #tpu.dot_dimension_numbers<[1], [0], [0], [1], [0, 0, 1, 1], [], []>} : vector<8x128xbf16>, vector<128x128xbf16>, vector<8x128xf32> -> vector<8x128xf32>
    %211 = arith.addf %108, %210 : vector<8x128xf32>
    %c0_65 = arith.constant 0 : index
    %c0_66 = arith.constant 0 : index
    %212 = vector.load %arg18[%c0_65, %c0_66] : memref<1x128xf32, #tpu.memory_space<vmem>>, vector<1x128xf32>
    %213 = vector.broadcast %212 : vector<1x128xf32> to vector<8x128xf32>
    %214 = arith.addf %211, %213 : vector<8x128xf32>
    %c0_67 = arith.constant 0 : index
    %c0_68 = arith.constant 0 : index
    %215 = vector.load %arg19[%c0_67, %c0_68] : memref<1x128xf32, #tpu.memory_space<vmem>>, vector<1x128xf32>
    %c0_69 = arith.constant 0 : index
    %c0_70 = arith.constant 0 : index
    %216 = vector.load %arg20[%c0_69, %c0_70] : memref<1x128xf32, #tpu.memory_space<vmem>>, vector<1x128xf32>
    %cst_71 = arith.constant dense<0.000000e+00> : vector<8xf32>
    %217 = vector.multi_reduction <add>, %214, %cst_71 [1] : vector<8x128xf32> to vector<8xf32>
    %218 = vector.shape_cast %217 : vector<8xf32> to vector<8x1xf32>
    %cst_72 = arith.constant 1.280000e+02 : f32
    %219 = vector.broadcast %cst_72 : f32 to vector<8x1xf32>
    %220 = arith.divf %218, %219 : vector<8x1xf32>
    %221 = vector.broadcast %220 : vector<8x1xf32> to vector<8x128xf32>
    %222 = arith.subf %214, %221 : vector<8x128xf32>
    %223 = arith.mulf %222, %222 : vector<8x128xf32>
    %cst_73 = arith.constant dense<0.000000e+00> : vector<8xf32>
    %224 = vector.multi_reduction <add>, %223, %cst_73 [1] : vector<8x128xf32> to vector<8xf32>
    %225 = vector.shape_cast %224 : vector<8xf32> to vector<8x1xf32>
    %cst_74 = arith.constant 1.280000e+02 : f32
    %226 = vector.broadcast %cst_74 : f32 to vector<8x1xf32>
    %227 = arith.divf %225, %226 : vector<8x1xf32>
    %228 = vector.broadcast %220 : vector<8x1xf32> to vector<8x128xf32>
    %229 = arith.subf %214, %228 : vector<8x128xf32>
    %cst_75 = arith.constant 9.99999974E-6 : f32
    %230 = vector.broadcast %cst_75 : f32 to vector<8x1xf32>
    %231 = arith.addf %227, %230 : vector<8x1xf32>
    %232 = math.rsqrt %231 : vector<8x1xf32>
    %233 = vector.broadcast %232 : vector<8x1xf32> to vector<8x128xf32>
    %234 = arith.mulf %229, %233 : vector<8x128xf32>
    %235 = vector.broadcast %215 : vector<1x128xf32> to vector<8x128xf32>
    %236 = arith.mulf %234, %235 : vector<8x128xf32>
    %237 = vector.broadcast %216 : vector<1x128xf32> to vector<8x128xf32>
    %238 = arith.addf %236, %237 : vector<8x128xf32>
    %239 = arith.truncf %238 : vector<8x128xf32> to vector<8x128xbf16>
    %c0_76 = arith.constant 0 : index
    %c0_77 = arith.constant 0 : index
    %240 = vector.load %arg21[%c0_76, %c0_77] : memref<128x256xbf16, #tpu.memory_space<vmem>>, vector<128x256xbf16>
    %cst_78 = arith.constant dense<0.000000e+00> : vector<8x256xf32>
    %241 = tpu.matmul %239, %240, %cst_78 {dimension_numbers = #tpu.dot_dimension_numbers<[1], [0], [0], [1], [0, 0, 1, 1], [], []>} : vector<8x128xbf16>, vector<128x256xbf16>, vector<8x256xf32> -> vector<8x256xf32>
    %c0_79 = arith.constant 0 : index
    %c0_80 = arith.constant 0 : index
    %242 = vector.load %arg22[%c0_79, %c0_80] : memref<1x256xf32, #tpu.memory_space<vmem>>, vector<1x256xf32>
    %243 = vector.broadcast %242 : vector<1x256xf32> to vector<8x256xf32>
    %244 = arith.addf %241, %243 : vector<8x256xf32>
    %cst_81 = arith.constant 0.000000e+00 : f32
    %245 = vector.broadcast %cst_81 : f32 to vector<8x256xf32>
    %246 = arith.maximumf %244, %245 : vector<8x256xf32>
    %247 = arith.truncf %246 : vector<8x256xf32> to vector<8x256xbf16>
    %c0_82 = arith.constant 0 : index
    %c0_83 = arith.constant 0 : index
    %248 = vector.load %arg23[%c0_82, %c0_83] : memref<256x128xbf16, #tpu.memory_space<vmem>>, vector<256x128xbf16>
    %cst_84 = arith.constant dense<0.000000e+00> : vector<8x128xf32>
    %249 = tpu.matmul %247, %248, %cst_84 {dimension_numbers = #tpu.dot_dimension_numbers<[1], [0], [0], [1], [0, 0, 1, 1], [], []>} : vector<8x256xbf16>, vector<256x128xbf16>, vector<8x128xf32> -> vector<8x128xf32>
    %250 = arith.addf %214, %249 : vector<8x128xf32>
    %c0_85 = arith.constant 0 : index
    %c0_86 = arith.constant 0 : index
    %251 = vector.load %arg24[%c0_85, %c0_86] : memref<1x128xf32, #tpu.memory_space<vmem>>, vector<1x128xf32>
    %252 = vector.broadcast %251 : vector<1x128xf32> to vector<8x128xf32>
    %253 = arith.addf %250, %252 : vector<8x128xf32>
    %c0_87 = arith.constant 0 : index
    %c0_88 = arith.constant 0 : index
    %c0_89 = arith.constant 0 : index
    %254 = vector.load %arg25[%c0_87, %c0_88, %c0_89] : memref<1x8x128xf32, #tpu.memory_space<vmem>>, vector<1x8x128xf32>
    %255 = vector.shape_cast %254 : vector<1x8x128xf32> to vector<8x128xf32>
    %256 = vector.shape_cast %253 : vector<8x128xf32> to vector<1x8x128xf32>
    tpu.vector_store %arg25[%c0_87, %c0_88, %c0_89], %256 {strides = array<i32>} : memref<1x8x128xf32, #tpu.memory_space<vmem>>, vector<1x8x128xf32>,
    return
  }
  func.func @transform_0(%arg0: i32) -> (i32, i32, i32) {
    %c0_i32 = arith.constant 0 : i32
    %c0_i32_0 = arith.constant 0 : i32
    %c0_i32_1 = arith.constant 0 : i32
    return %arg0, %c0_i32, %c0_i32_0 : i32, i32, i32
  }
  func.func @transform_1(%arg0: i32) -> (i32, i32, i32) {
    %c0_i32 = arith.constant 0 : i32
    %c0_i32_0 = arith.constant 0 : i32
    %c0_i32_1 = arith.constant 0 : i32
    return %arg0, %c0_i32, %c0_i32_0 : i32, i32, i32
  }
  func.func @transform_2(%arg0: i32) -> (i32, i32, i32) {
    %c0_i32 = arith.constant 0 : i32
    %c0_i32_0 = arith.constant 0 : i32
    %c0_i32_1 = arith.constant 0 : i32
    return %arg0, %c0_i32, %c0_i32_0 : i32, i32, i32
  }
  func.func @transform_3(%arg0: i32) -> (i32, i32, i32) {
    %c0_i32 = arith.constant 0 : i32
    %c0_i32_0 = arith.constant 0 : i32
    %c0_i32_1 = arith.constant 0 : i32
    return %arg0, %c0_i32, %c0_i32_0 : i32, i32, i32
  }
  func.func @transform_4(%arg0: i32) -> (i32, i32) {
    %c0_i32 = arith.constant 0 : i32
    %c0_i32_0 = arith.constant 0 : i32
    %c0_i32_1 = arith.constant 0 : i32
    return %c0_i32, %c0_i32_0 : i32, i32
  }
  func.func @transform_5(%arg0: i32) -> (i32, i32) {
    %c0_i32 = arith.constant 0 : i32
    %c0_i32_0 = arith.constant 0 : i32
    %c0_i32_1 = arith.constant 0 : i32
    return %c0_i32, %c0_i32_0 : i32, i32
  }
  func.func @transform_6(%arg0: i32) -> (i32, i32) {
    %c0_i32 = arith.constant 0 : i32
    %c0_i32_0 = arith.constant 0 : i32
    %c0_i32_1 = arith.constant 0 : i32
    return %c0_i32, %c0_i32_0 : i32, i32
  }
  func.func @transform_7(%arg0: i32) -> (i32, i32) {
    %c0_i32 = arith.constant 0 : i32
    %c0_i32_0 = arith.constant 0 : i32
    %c0_i32_1 = arith.constant 0 : i32
    return %c0_i32, %c0_i32_0 : i32, i32
  }
  func.func @transform_8(%arg0: i32) -> (i32, i32) {
    %c0_i32 = arith.constant 0 : i32
    %c0_i32_0 = arith.constant 0 : i32
    %c0_i32_1 = arith.constant 0 : i32
    return %c0_i32, %c0_i32_0 : i32, i32
  }
  func.func @transform_9(%arg0: i32) -> (i32, i32) {
    %c0_i32 = arith.constant 0 : i32
    %c0_i32_0 = arith.constant 0 : i32
    %c0_i32_1 = arith.constant 0 : i32
    return %c0_i32, %c0_i32_0 : i32, i32
  }
  func.func @transform_10(%arg0: i32) -> (i32, i32) {
    %c0_i32 = arith.constant 0 : i32
    %c0_i32_0 = arith.constant 0 : i32
    %c0_i32_1 = arith.constant 0 : i32
    return %c0_i32, %c0_i32_0 : i32, i32
  }
  func.func @transform_11(%arg0: i32) -> (i32, i32) {
    %c0_i32 = arith.constant 0 : i32
    %c0_i32_0 = arith.constant 0 : i32
    %c0_i32_1 = arith.constant 0 : i32
    return %c0_i32, %c0_i32_0 : i32, i32
  }
  func.func @transform_12(%arg0: i32) -> (i32, i32) {
    %c0_i32 = arith.constant 0 : i32
    %c0_i32_0 = arith.constant 0 : i32
    %c0_i32_1 = arith.constant 0 : i32
    return %c0_i32, %c0_i32_0 : i32, i32
  }
  func.func @transform_13(%arg0: i32) -> (i32, i32) {
    %c0_i32 = arith.constant 0 : i32
    %c0_i32_0 = arith.constant 0 : i32
    %c0_i32_1 = arith.constant 0 : i32
    return %c0_i32, %c0_i32_0 : i32, i32
  }
  func.func @transform_14(%arg0: i32) -> (i32, i32) {
    %c0_i32 = arith.constant 0 : i32
    %c0_i32_0 = arith.constant 0 : i32
    %c0_i32_1 = arith.constant 0 : i32
    return %c0_i32, %c0_i32_0 : i32, i32
  }
  func.func @transform_15(%arg0: i32) -> (i32, i32) {
    %c0_i32 = arith.constant 0 : i32
    %c0_i32_0 = arith.constant 0 : i32
    %c0_i32_1 = arith.constant 0 : i32
    return %c0_i32, %c0_i32_0 : i32, i32
  }
  func.func @transform_16(%arg0: i32) -> (i32, i32) {
    %c0_i32 = arith.constant 0 : i32
    %c0_i32_0 = arith.constant 0 : i32
    %c0_i32_1 = arith.constant 0 : i32
    return %c0_i32, %c0_i32_0 : i32, i32
  }
  func.func @transform_17(%arg0: i32) -> (i32, i32) {
    %c0_i32 = arith.constant 0 : i32
    %c0_i32_0 = arith.constant 0 : i32
    %c0_i32_1 = arith.constant 0 : i32
    return %c0_i32, %c0_i32_0 : i32, i32
  }
  func.func @transform_18(%arg0: i32) -> (i32, i32) {
    %c0_i32 = arith.constant 0 : i32
    %c0_i32_0 = arith.constant 0 : i32
    %c0_i32_1 = arith.constant 0 : i32
    return %c0_i32, %c0_i32_0 : i32, i32
  }
  func.func @transform_19(%arg0: i32) -> (i32, i32) {
    %c0_i32 = arith.constant 0 : i32
    %c0_i32_0 = arith.constant 0 : i32
    %c0_i32_1 = arith.constant 0 : i32
    return %c0_i32, %c0_i32_0 : i32, i32
  }
  func.func @transform_20(%arg0: i32) -> (i32, i32) {
    %c0_i32 = arith.constant 0 : i32
    %c0_i32_0 = arith.constant 0 : i32
    %c0_i32_1 = arith.constant 0 : i32
    return %c0_i32, %c0_i32_0 : i32, i32
  }
  func.func @transform_21(%arg0: i32) -> (i32, i32) {
    %c0_i32 = arith.constant 0 : i32
    %c0_i32_0 = arith.constant 0 : i32
    %c0_i32_1 = arith.constant 0 : i32
    return %c0_i32, %c0_i32_0 : i32, i32
  }
  func.func @transform_22(%arg0: i32) -> (i32, i32) {
    %c0_i32 = arith.constant 0 : i32
    %c0_i32_0 = arith.constant 0 : i32
    %c0_i32_1 = arith.constant 0 : i32
    return %c0_i32, %c0_i32_0 : i32, i32
  }
  func.func @transform_23(%arg0: i32) -> (i32, i32) {
    %c0_i32 = arith.constant 0 : i32
    %c0_i32_0 = arith.constant 0 : i32
    %c0_i32_1 = arith.constant 0 : i32
    return %c0_i32, %c0_i32_0 : i32, i32
  }
  func.func @transform_24(%arg0: i32) -> (i32, i32, i32) {
    %c0_i32 = arith.constant 0 : i32
    %c0_i32_0 = arith.constant 0 : i32
    %c0_i32_1 = arith.constant 0 : i32
    return %arg0, %c0_i32, %c0_i32_0 : i32, i32, i32
  }
}

module attributes {stable_mosaic.version = 11 : i64} {
  func.func @kernel(%arg0: i32, %arg1: memref<1x8x128xf32, #tpu.memory_space<vmem>>, %arg2: memref<1x16x128xf32, #tpu.memory_space<vmem>>, %arg3: memref<1x8x8xf32, #tpu.memory_space<vmem>>, %arg4: memref<1x1x16xf32, #tpu.memory_space<vmem>>, %arg5: memref<1x128xf32, #tpu.memory_space<vmem>>, %arg6: memref<1x128xf32, #tpu.memory_space<vmem>>, %arg7: memref<128x384xbf16, #tpu.memory_space<vmem>>, %arg8: memref<1x384xf32, #tpu.memory_space<vmem>>, %arg9: memref<128x128xbf16, #tpu.memory_space<vmem>>, %arg10: memref<1x128xf32, #tpu.memory_space<vmem>>, %arg11: memref<1x128xf32, #tpu.memory_space<vmem>>, %arg12: memref<1x128xf32, #tpu.memory_space<vmem>>, %arg13: memref<128x128xbf16, #tpu.memory_space<vmem>>, %arg14: memref<1x128xf32, #tpu.memory_space<vmem>>, %arg15: memref<128x256xbf16, #tpu.memory_space<vmem>>, %arg16: memref<1x256xf32, #tpu.memory_space<vmem>>, %arg17: memref<128x128xbf16, #tpu.memory_space<vmem>>, %arg18: memref<1x128xf32, #tpu.memory_space<vmem>>, %arg19: memref<1x128xf32, #tpu.memory_space<vmem>>, %arg20: memref<1x128xf32, #tpu.memory_space<vmem>>, %arg21: memref<128x256xbf16, #tpu.memory_space<vmem>>, %arg22: memref<1x256xf32, #tpu.memory_space<vmem>>, %arg23: memref<256x128xbf16, #tpu.memory_space<vmem>>, %arg24: memref<1x128xf32, #tpu.memory_space<vmem>>, %arg25: memref<1x128xf32, #tpu.memory_space<vmem>>, %arg26: memref<1x128xf32, #tpu.memory_space<vmem>>, %arg27: memref<1x8x128xf32, #tpu.memory_space<vmem>>, %arg28: memref<1x4x8x16xf32, #tpu.memory_space<vmem>>) attributes {dimension_semantics = [#tpu.dimension_semantics<parallel>], iteration_bounds = array<i64: 2>, scalar_prefetch = 0 : i64, scratch_operands = 0 : i64, tpu.core_type = #tpu.core_type<tc>, window_params = [{transform_indices = @transform_0, window_bounds = array<i64: 1, 8, 128>}, {transform_indices = @transform_1, window_bounds = array<i64: 1, 16, 128>}, {transform_indices = @transform_2, window_bounds = array<i64: 1, 8, 8>}, {transform_indices = @transform_3, window_bounds = array<i64: 1, 1, 16>}, {pipeline_mode = #tpu.pipeline_mode<synchronous>, transform_indices = @transform_4, window_bounds = array<i64: 1, 128>}, {pipeline_mode = #tpu.pipeline_mode<synchronous>, transform_indices = @transform_5, window_bounds = array<i64: 1, 128>}, {pipeline_mode = #tpu.pipeline_mode<synchronous>, transform_indices = @transform_6, window_bounds = array<i64: 128, 384>}, {pipeline_mode = #tpu.pipeline_mode<synchronous>, transform_indices = @transform_7, window_bounds = array<i64: 1, 384>}, {pipeline_mode = #tpu.pipeline_mode<synchronous>, transform_indices = @transform_8, window_bounds = array<i64: 128, 128>}, {pipeline_mode = #tpu.pipeline_mode<synchronous>, transform_indices = @transform_9, window_bounds = array<i64: 1, 128>}, {pipeline_mode = #tpu.pipeline_mode<synchronous>, transform_indices = @transform_10, window_bounds = array<i64: 1, 128>}, {pipeline_mode = #tpu.pipeline_mode<synchronous>, transform_indices = @transform_11, window_bounds = array<i64: 1, 128>}, {pipeline_mode = #tpu.pipeline_mode<synchronous>, transform_indices = @transform_12, window_bounds = array<i64: 128, 128>}, {pipeline_mode = #tpu.pipeline_mode<synchronous>, transform_indices = @transform_13, window_bounds = array<i64: 1, 128>}, {pipeline_mode = #tpu.pipeline_mode<synchronous>, transform_indices = @transform_14, window_bounds = array<i64: 128, 256>}, {pipeline_mode = #tpu.pipeline_mode<synchronous>, transform_indices = @transform_15, window_bounds = array<i64: 1, 256>}, {pipeline_mode = #tpu.pipeline_mode<synchronous>, transform_indices = @transform_16, window_bounds = array<i64: 128, 128>}, {pipeline_mode = #tpu.pipeline_mode<synchronous>, transform_indices = @transform_17, window_bounds = array<i64: 1, 128>}, {pipeline_mode = #tpu.pipeline_mode<synchronous>, transform_indices = @transform_18, window_bounds = array<i64: 1, 128>}, {pipeline_mode = #tpu.pipeline_mode<synchronous>, transform_indices = @transform_19, window_bounds = array<i64: 1, 128>}, {pipeline_mode = #tpu.pipeline_mode<synchronous>, transform_indices = @transform_20, window_bounds = array<i64: 128, 256>}, {pipeline_mode = #tpu.pipeline_mode<synchronous>, transform_indices = @transform_21, window_bounds = array<i64: 1, 256>}, {pipeline_mode = #tpu.pipeline_mode<synchronous>, transform_indices = @transform_22, window_bounds = array<i64: 256, 128>}, {pipeline_mode = #tpu.pipeline_mode<synchronous>, transform_indices = @transform_23, window_bounds = array<i64: 1, 128>}, {pipeline_mode = #tpu.pipeline_mode<synchronous>, transform_indices = @transform_24, window_bounds = array<i64: 1, 128>}, {pipeline_mode = #tpu.pipeline_mode<synchronous>, transform_indices = @transform_25, window_bounds = array<i64: 1, 128>}, {transform_indices = @transform_26, window_bounds = array<i64: 1, 8, 128>}, {transform_indices = @transform_27, window_bounds = array<i64: 1, 4, 8, 16>}]} {
    %c0 = arith.constant 0 : index
    %c0_0 = arith.constant 0 : index
    %c0_1 = arith.constant 0 : index
    %0 = vector.load %arg1[%c0, %c0_0, %c0_1] : memref<1x8x128xf32, #tpu.memory_space<vmem>>, vector<1x8x128xf32>
    %1 = vector.shape_cast %0 : vector<1x8x128xf32> to vector<8x128xf32>
    %c0_2 = arith.constant 0 : index
    %c0_3 = arith.constant 0 : index
    %c0_4 = arith.constant 0 : index
    %2 = vector.load %arg2[%c0_2, %c0_3, %c0_4] : memref<1x16x128xf32, #tpu.memory_space<vmem>>, vector<1x16x128xf32>
    %3 = vector.shape_cast %2 : vector<1x16x128xf32> to vector<16x128xf32>
    %c0_5 = arith.constant 0 : index
    %c0_6 = arith.constant 0 : index
    %c0_7 = arith.constant 0 : index
    %4 = vector.load %arg3[%c0_5, %c0_6, %c0_7] : memref<1x8x8xf32, #tpu.memory_space<vmem>>, vector<1x8x8xf32>
    %5 = vector.shape_cast %4 : vector<1x8x8xf32> to vector<8x8xf32>
    %c0_8 = arith.constant 0 : index
    %c0_9 = arith.constant 0 : index
    %c0_10 = arith.constant 0 : index
    %6 = vector.load %arg4[%c0_8, %c0_9, %c0_10] : memref<1x1x16xf32, #tpu.memory_space<vmem>>, vector<1x1x16xf32>
    %7 = vector.shape_cast %6 : vector<1x1x16xf32> to vector<1x16xf32>
    %c0_11 = arith.constant 0 : index
    %c0_12 = arith.constant 0 : index
    %8 = vector.load %arg5[%c0_11, %c0_12] : memref<1x128xf32, #tpu.memory_space<vmem>>, vector<1x128xf32>
    %c0_13 = arith.constant 0 : index
    %c0_14 = arith.constant 0 : index
    %9 = vector.load %arg6[%c0_13, %c0_14] : memref<1x128xf32, #tpu.memory_space<vmem>>, vector<1x128xf32>
    %cst = arith.constant dense<0.000000e+00> : vector<8xf32>
    %10 = vector.multi_reduction <add>, %1, %cst [1] : vector<8x128xf32> to vector<8xf32>
    %11 = vector.shape_cast %10 : vector<8xf32> to vector<8x1xf32>
    %cst_15 = arith.constant 1.280000e+02 : f32
    %12 = vector.broadcast %cst_15 : f32 to vector<8x1xf32>
    %13 = arith.divf %11, %12 : vector<8x1xf32>
    %14 = vector.broadcast %13 : vector<8x1xf32> to vector<8x128xf32>
    %15 = arith.subf %1, %14 : vector<8x128xf32>
    %16 = arith.mulf %15, %15 : vector<8x128xf32>
    %cst_16 = arith.constant dense<0.000000e+00> : vector<8xf32>
    %17 = vector.multi_reduction <add>, %16, %cst_16 [1] : vector<8x128xf32> to vector<8xf32>
    %18 = vector.shape_cast %17 : vector<8xf32> to vector<8x1xf32>
    %cst_17 = arith.constant 1.280000e+02 : f32
    %19 = vector.broadcast %cst_17 : f32 to vector<8x1xf32>
    %20 = arith.divf %18, %19 : vector<8x1xf32>
    %21 = vector.broadcast %13 : vector<8x1xf32> to vector<8x128xf32>
    %22 = arith.subf %1, %21 : vector<8x128xf32>
    %cst_18 = arith.constant 9.99999974E-6 : f32
    %23 = vector.broadcast %cst_18 : f32 to vector<8x1xf32>
    %24 = arith.addf %20, %23 : vector<8x1xf32>
    %25 = math.rsqrt %24 : vector<8x1xf32>
    %26 = vector.broadcast %25 : vector<8x1xf32> to vector<8x128xf32>
    %27 = arith.mulf %22, %26 : vector<8x128xf32>
    %28 = vector.broadcast %8 : vector<1x128xf32> to vector<8x128xf32>
    %29 = arith.mulf %27, %28 : vector<8x128xf32>
    %30 = vector.broadcast %9 : vector<1x128xf32> to vector<8x128xf32>
    %31 = arith.addf %29, %30 : vector<8x128xf32>
    %32 = arith.truncf %31 : vector<8x128xf32> to vector<8x128xbf16>
    %c0_19 = arith.constant 0 : index
    %c0_20 = arith.constant 0 : index
    %33 = vector.load %arg7[%c0_19, %c0_20] : memref<128x384xbf16, #tpu.memory_space<vmem>>, vector<128x384xbf16>
    %cst_21 = arith.constant dense<0.000000e+00> : vector<8x384xf32>
    %34 = tpu.matmul %32, %33, %cst_21 {dimension_numbers = #tpu.dot_dimension_numbers<[1], [0], [0], [1], [0, 0, 1, 1], [], []>} : vector<8x128xbf16>, vector<128x384xbf16>, vector<8x384xf32> -> vector<8x384xf32>
    %c0_22 = arith.constant 0 : index
    %c0_23 = arith.constant 0 : index
    %35 = vector.load %arg8[%c0_22, %c0_23] : memref<1x384xf32, #tpu.memory_space<vmem>>, vector<1x384xf32>
    %36 = vector.broadcast %35 : vector<1x384xf32> to vector<8x384xf32>
    %37 = arith.addf %34, %36 : vector<8x384xf32>
    %38 = vector.extract_strided_slice %37 {offsets = [0, 0], sizes = [8, 128], strides = [1, 1]} : vector<8x384xf32> to vector<8x128xf32>
    %39 = vector.extract_strided_slice %37 {offsets = [0, 128], sizes = [8, 128], strides = [1, 1]} : vector<8x384xf32> to vector<8x128xf32>
    %40 = vector.extract_strided_slice %37 {offsets = [0, 256], sizes = [8, 128], strides = [1, 1]} : vector<8x384xf32> to vector<8x128xf32>
    %41 = arith.truncf %38 : vector<8x128xf32> to vector<8x128xbf16>
    %42 = vector.extract_strided_slice %41 {offsets = [0, 0], sizes = [8, 32], strides = [1, 1]} : vector<8x128xbf16> to vector<8x32xbf16>
    %43 = vector.extract_strided_slice %41 {offsets = [0, 32], sizes = [8, 32], strides = [1, 1]} : vector<8x128xbf16> to vector<8x32xbf16>
    %44 = vector.extract_strided_slice %41 {offsets = [0, 64], sizes = [8, 32], strides = [1, 1]} : vector<8x128xbf16> to vector<8x32xbf16>
    %45 = vector.extract_strided_slice %41 {offsets = [0, 96], sizes = [8, 32], strides = [1, 1]} : vector<8x128xbf16> to vector<8x32xbf16>
    %46 = vector.shape_cast %42 : vector<8x32xbf16> to vector<1x8x32xbf16>
    %47 = vector.shape_cast %43 : vector<8x32xbf16> to vector<1x8x32xbf16>
    %48 = vector.shape_cast %44 : vector<8x32xbf16> to vector<1x8x32xbf16>
    %49 = vector.shape_cast %45 : vector<8x32xbf16> to vector<1x8x32xbf16>
    %50 = tpu.concatenate %46, %47, %48, %49 in 0 : vector<1x8x32xbf16>, vector<1x8x32xbf16>, vector<1x8x32xbf16>, vector<1x8x32xbf16> -> vector<4x8x32xbf16>
    %51 = arith.truncf %39 : vector<8x128xf32> to vector<8x128xbf16>
    %52 = vector.extract_strided_slice %51 {offsets = [0, 0], sizes = [8, 32], strides = [1, 1]} : vector<8x128xbf16> to vector<8x32xbf16>
    %53 = vector.extract_strided_slice %51 {offsets = [0, 32], sizes = [8, 32], strides = [1, 1]} : vector<8x128xbf16> to vector<8x32xbf16>
    %54 = vector.extract_strided_slice %51 {offsets = [0, 64], sizes = [8, 32], strides = [1, 1]} : vector<8x128xbf16> to vector<8x32xbf16>
    %55 = vector.extract_strided_slice %51 {offsets = [0, 96], sizes = [8, 32], strides = [1, 1]} : vector<8x128xbf16> to vector<8x32xbf16>
    %56 = vector.shape_cast %52 : vector<8x32xbf16> to vector<1x8x32xbf16>
    %57 = vector.shape_cast %53 : vector<8x32xbf16> to vector<1x8x32xbf16>
    %58 = vector.shape_cast %54 : vector<8x32xbf16> to vector<1x8x32xbf16>
    %59 = vector.shape_cast %55 : vector<8x32xbf16> to vector<1x8x32xbf16>
    %60 = tpu.concatenate %56, %57, %58, %59 in 0 : vector<1x8x32xbf16>, vector<1x8x32xbf16>, vector<1x8x32xbf16>, vector<1x8x32xbf16> -> vector<4x8x32xbf16>
    %61 = arith.truncf %40 : vector<8x128xf32> to vector<8x128xbf16>
    %62 = vector.extract_strided_slice %61 {offsets = [0, 0], sizes = [8, 32], strides = [1, 1]} : vector<8x128xbf16> to vector<8x32xbf16>
    %63 = vector.extract_strided_slice %61 {offsets = [0, 32], sizes = [8, 32], strides = [1, 1]} : vector<8x128xbf16> to vector<8x32xbf16>
    %64 = vector.extract_strided_slice %61 {offsets = [0, 64], sizes = [8, 32], strides = [1, 1]} : vector<8x128xbf16> to vector<8x32xbf16>
    %65 = vector.extract_strided_slice %61 {offsets = [0, 96], sizes = [8, 32], strides = [1, 1]} : vector<8x128xbf16> to vector<8x32xbf16>
    %66 = vector.shape_cast %62 : vector<8x32xbf16> to vector<1x8x32xbf16>
    %67 = vector.shape_cast %63 : vector<8x32xbf16> to vector<1x8x32xbf16>
    %68 = vector.shape_cast %64 : vector<8x32xbf16> to vector<1x8x32xbf16>
    %69 = vector.shape_cast %65 : vector<8x32xbf16> to vector<1x8x32xbf16>
    %70 = tpu.concatenate %66, %67, %68, %69 in 0 : vector<1x8x32xbf16>, vector<1x8x32xbf16>, vector<1x8x32xbf16>, vector<1x8x32xbf16> -> vector<4x8x32xbf16>
    "tpu.trace_start"() <{level = 10 : i32, message = "htd,hsd->hts"}> : () -> ()
    %cst_24 = arith.constant dense<0.000000e+00> : vector<4x8x8xf32>
    %71 = tpu.matmul %50, %60, %cst_24 {dimension_numbers = #tpu.dot_dimension_numbers<[2], [2], [1], [1], [0, 0, 0, 1, 1, 1], [0], [0]>} : vector<4x8x32xbf16>, vector<4x8x32xbf16>, vector<4x8x8xf32> -> vector<4x8x8xf32>
    "tpu.trace_stop"() : () -> ()
    %cst_25 = arith.constant 0.176776692 : f32
    %72 = vector.broadcast %cst_25 : f32 to vector<4x8x8xf32>
    %73 = arith.mulf %71, %72 : vector<4x8x8xf32>
    %74 = vector.shape_cast %5 : vector<8x8xf32> to vector<1x8x8xf32>
    %cst_26 = arith.constant 0.000000e+00 : f32
    %75 = vector.broadcast %cst_26 : f32 to vector<1x8x8xf32>
    %76 = arith.cmpf ogt, %74, %75 : vector<1x8x8xf32>
    %cst_27 = arith.constant -1.000000e+09 : f32
    %77 = vector.shape_cast %76 : vector<1x8x8xi1> to vector<1x8x8xi1>
    %78 = vector.broadcast %77 : vector<1x8x8xi1> to vector<4x8x8xi1>
    %79 = vector.broadcast %cst_27 : f32 to vector<4x8x8xf32>
    %80 = arith.select %78, %73, %79 : vector<4x8x8xi1>, vector<4x8x8xf32>
    %cst_28 = arith.constant dense<0xFF800000> : vector<4x8xf32>
    %81 = vector.multi_reduction <maximumf>, %80, %cst_28 [2] : vector<4x8x8xf32> to vector<4x8xf32>
    %82 = vector.shape_cast %81 : vector<4x8xf32> to vector<4x8x1xf32>
    %83 = vector.broadcast %82 : vector<4x8x1xf32> to vector<4x8x8xf32>
    %84 = arith.subf %80, %83 : vector<4x8x8xf32>
    %85 = math.exp %84 : vector<4x8x8xf32>
    %cst_29 = arith.constant dense<0.000000e+00> : vector<4x8xf32>
    %86 = vector.multi_reduction <add>, %85, %cst_29 [2] : vector<4x8x8xf32> to vector<4x8xf32>
    %87 = vector.shape_cast %86 : vector<4x8xf32> to vector<4x8x1xf32>
    %88 = tpu.reciprocal %87 {approx = true} : vector<4x8x1xf32> -> vector<4x8x1xf32>
    %89 = vector.broadcast %88 : vector<4x8x1xf32> to vector<4x8x8xf32>
    %90 = arith.mulf %85, %89 : vector<4x8x8xf32>
    %91 = arith.truncf %90 : vector<4x8x8xf32> to vector<4x8x8xbf16>
    "tpu.trace_start"() <{level = 10 : i32, message = "hts,hsd->htd"}> : () -> ()
    %cst_30 = arith.constant dense<0.000000e+00> : vector<4x8x32xf32>
    %92 = tpu.matmul %91, %70, %cst_30 {dimension_numbers = #tpu.dot_dimension_numbers<[2], [1], [1], [2], [0, 0, 0, 1, 1, 2], [0], [0]>} : vector<4x8x8xbf16>, vector<4x8x32xbf16>, vector<4x8x32xf32> -> vector<4x8x32xf32>
    "tpu.trace_stop"() : () -> ()
    %93 = vector.extract_strided_slice %92 {offsets = [0, 0, 0], sizes = [1, 8, 32], strides = [1, 1, 1]} : vector<4x8x32xf32> to vector<1x8x32xf32>
    %94 = vector.shape_cast %93 : vector<1x8x32xf32> to vector<8x32xf32>
    %95 = vector.extract_strided_slice %92 {offsets = [1, 0, 0], sizes = [1, 8, 32], strides = [1, 1, 1]} : vector<4x8x32xf32> to vector<1x8x32xf32>
    %96 = vector.shape_cast %95 : vector<1x8x32xf32> to vector<8x32xf32>
    %97 = vector.extract_strided_slice %92 {offsets = [2, 0, 0], sizes = [1, 8, 32], strides = [1, 1, 1]} : vector<4x8x32xf32> to vector<1x8x32xf32>
    %98 = vector.shape_cast %97 : vector<1x8x32xf32> to vector<8x32xf32>
    %99 = vector.extract_strided_slice %92 {offsets = [3, 0, 0], sizes = [1, 8, 32], strides = [1, 1, 1]} : vector<4x8x32xf32> to vector<1x8x32xf32>
    %100 = vector.shape_cast %99 : vector<1x8x32xf32> to vector<8x32xf32>
    %101 = tpu.concatenate %94, %96, %98, %100 in 1 : vector<8x32xf32>, vector<8x32xf32>, vector<8x32xf32>, vector<8x32xf32> -> vector<8x128xf32>
    %102 = arith.truncf %101 : vector<8x128xf32> to vector<8x128xbf16>
    %c0_31 = arith.constant 0 : index
    %c0_32 = arith.constant 0 : index
    %103 = vector.load %arg9[%c0_31, %c0_32] : memref<128x128xbf16, #tpu.memory_space<vmem>>, vector<128x128xbf16>
    %cst_33 = arith.constant dense<0.000000e+00> : vector<8x128xf32>
    %104 = tpu.matmul %102, %103, %cst_33 {dimension_numbers = #tpu.dot_dimension_numbers<[1], [0], [0], [1], [0, 0, 1, 1], [], []>} : vector<8x128xbf16>, vector<128x128xbf16>, vector<8x128xf32> -> vector<8x128xf32>
    %105 = arith.addf %1, %104 : vector<8x128xf32>
    %c0_34 = arith.constant 0 : index
    %c0_35 = arith.constant 0 : index
    %106 = vector.load %arg10[%c0_34, %c0_35] : memref<1x128xf32, #tpu.memory_space<vmem>>, vector<1x128xf32>
    %107 = vector.broadcast %106 : vector<1x128xf32> to vector<8x128xf32>
    %108 = arith.addf %105, %107 : vector<8x128xf32>
    %c0_36 = arith.constant 0 : index
    %c0_37 = arith.constant 0 : index
    %109 = vector.load %arg11[%c0_36, %c0_37] : memref<1x128xf32, #tpu.memory_space<vmem>>, vector<1x128xf32>
    %c0_38 = arith.constant 0 : index
    %c0_39 = arith.constant 0 : index
    %110 = vector.load %arg12[%c0_38, %c0_39] : memref<1x128xf32, #tpu.memory_space<vmem>>, vector<1x128xf32>
    %cst_40 = arith.constant dense<0.000000e+00> : vector<8xf32>
    %111 = vector.multi_reduction <add>, %108, %cst_40 [1] : vector<8x128xf32> to vector<8xf32>
    %112 = vector.shape_cast %111 : vector<8xf32> to vector<8x1xf32>
    %cst_41 = arith.constant 1.280000e+02 : f32
    %113 = vector.broadcast %cst_41 : f32 to vector<8x1xf32>
    %114 = arith.divf %112, %113 : vector<8x1xf32>
    %115 = vector.broadcast %114 : vector<8x1xf32> to vector<8x128xf32>
    %116 = arith.subf %108, %115 : vector<8x128xf32>
    %117 = arith.mulf %116, %116 : vector<8x128xf32>
    %cst_42 = arith.constant dense<0.000000e+00> : vector<8xf32>
    %118 = vector.multi_reduction <add>, %117, %cst_42 [1] : vector<8x128xf32> to vector<8xf32>
    %119 = vector.shape_cast %118 : vector<8xf32> to vector<8x1xf32>
    %cst_43 = arith.constant 1.280000e+02 : f32
    %120 = vector.broadcast %cst_43 : f32 to vector<8x1xf32>
    %121 = arith.divf %119, %120 : vector<8x1xf32>
    %122 = vector.broadcast %114 : vector<8x1xf32> to vector<8x128xf32>
    %123 = arith.subf %108, %122 : vector<8x128xf32>
    %cst_44 = arith.constant 9.99999974E-6 : f32
    %124 = vector.broadcast %cst_44 : f32 to vector<8x1xf32>
    %125 = arith.addf %121, %124 : vector<8x1xf32>
    %126 = math.rsqrt %125 : vector<8x1xf32>
    %127 = vector.broadcast %126 : vector<8x1xf32> to vector<8x128xf32>
    %128 = arith.mulf %123, %127 : vector<8x128xf32>
    %129 = vector.broadcast %109 : vector<1x128xf32> to vector<8x128xf32>
    %130 = arith.mulf %128, %129 : vector<8x128xf32>
    %131 = vector.broadcast %110 : vector<1x128xf32> to vector<8x128xf32>
    %132 = arith.addf %130, %131 : vector<8x128xf32>
    %133 = arith.truncf %132 : vector<8x128xf32> to vector<8x128xbf16>
    %c0_45 = arith.constant 0 : index
    %c0_46 = arith.constant 0 : index
    %134 = vector.load %arg13[%c0_45, %c0_46] : memref<128x128xbf16, #tpu.memory_space<vmem>>, vector<128x128xbf16>
    %cst_47 = arith.constant dense<0.000000e+00> : vector<8x128xf32>
    %135 = tpu.matmul %133, %134, %cst_47 {dimension_numbers = #tpu.dot_dimension_numbers<[1], [0], [0], [1], [0, 0, 1, 1], [], []>} : vector<8x128xbf16>, vector<128x128xbf16>, vector<8x128xf32> -> vector<8x128xf32>
    %c0_48 = arith.constant 0 : index
    %c0_49 = arith.constant 0 : index
    %136 = vector.load %arg14[%c0_48, %c0_49] : memref<1x128xf32, #tpu.memory_space<vmem>>, vector<1x128xf32>
    %137 = vector.broadcast %136 : vector<1x128xf32> to vector<8x128xf32>
    %138 = arith.addf %135, %137 : vector<8x128xf32>
    %139 = arith.truncf %3 : vector<16x128xf32> to vector<16x128xbf16>
    %c0_50 = arith.constant 0 : index
    %c0_51 = arith.constant 0 : index
    %140 = vector.load %arg15[%c0_50, %c0_51] : memref<128x256xbf16, #tpu.memory_space<vmem>>, vector<128x256xbf16>
    %cst_52 = arith.constant dense<0.000000e+00> : vector<16x256xf32>
    %141 = tpu.matmul %139, %140, %cst_52 {dimension_numbers = #tpu.dot_dimension_numbers<[1], [0], [0], [1], [0, 0, 1, 1], [], []>} : vector<16x128xbf16>, vector<128x256xbf16>, vector<16x256xf32> -> vector<16x256xf32>
    %c0_53 = arith.constant 0 : index
    %c0_54 = arith.constant 0 : index
    %142 = vector.load %arg16[%c0_53, %c0_54] : memref<1x256xf32, #tpu.memory_space<vmem>>, vector<1x256xf32>
    %143 = vector.broadcast %142 : vector<1x256xf32> to vector<16x256xf32>
    %144 = arith.addf %141, %143 : vector<16x256xf32>
    %145 = vector.extract_strided_slice %144 {offsets = [0, 0], sizes = [16, 128], strides = [1, 1]} : vector<16x256xf32> to vector<16x128xf32>
    %146 = vector.extract_strided_slice %144 {offsets = [0, 128], sizes = [16, 128], strides = [1, 1]} : vector<16x256xf32> to vector<16x128xf32>
    %147 = arith.truncf %138 : vector<8x128xf32> to vector<8x128xbf16>
    %148 = vector.extract_strided_slice %147 {offsets = [0, 0], sizes = [8, 32], strides = [1, 1]} : vector<8x128xbf16> to vector<8x32xbf16>
    %149 = vector.extract_strided_slice %147 {offsets = [0, 32], sizes = [8, 32], strides = [1, 1]} : vector<8x128xbf16> to vector<8x32xbf16>
    %150 = vector.extract_strided_slice %147 {offsets = [0, 64], sizes = [8, 32], strides = [1, 1]} : vector<8x128xbf16> to vector<8x32xbf16>
    %151 = vector.extract_strided_slice %147 {offsets = [0, 96], sizes = [8, 32], strides = [1, 1]} : vector<8x128xbf16> to vector<8x32xbf16>
    %152 = vector.shape_cast %148 : vector<8x32xbf16> to vector<1x8x32xbf16>
    %153 = vector.shape_cast %149 : vector<8x32xbf16> to vector<1x8x32xbf16>
    %154 = vector.shape_cast %150 : vector<8x32xbf16> to vector<1x8x32xbf16>
    %155 = vector.shape_cast %151 : vector<8x32xbf16> to vector<1x8x32xbf16>
    %156 = tpu.concatenate %152, %153, %154, %155 in 0 : vector<1x8x32xbf16>, vector<1x8x32xbf16>, vector<1x8x32xbf16>, vector<1x8x32xbf16> -> vector<4x8x32xbf16>
    %157 = arith.truncf %145 : vector<16x128xf32> to vector<16x128xbf16>
    %158 = vector.extract_strided_slice %157 {offsets = [0, 0], sizes = [16, 32], strides = [1, 1]} : vector<16x128xbf16> to vector<16x32xbf16>
    %159 = vector.extract_strided_slice %157 {offsets = [0, 32], sizes = [16, 32], strides = [1, 1]} : vector<16x128xbf16> to vector<16x32xbf16>
    %160 = vector.extract_strided_slice %157 {offsets = [0, 64], sizes = [16, 32], strides = [1, 1]} : vector<16x128xbf16> to vector<16x32xbf16>
    %161 = vector.extract_strided_slice %157 {offsets = [0, 96], sizes = [16, 32], strides = [1, 1]} : vector<16x128xbf16> to vector<16x32xbf16>
    %162 = vector.shape_cast %158 : vector<16x32xbf16> to vector<1x16x32xbf16>
    %163 = vector.shape_cast %159 : vector<16x32xbf16> to vector<1x16x32xbf16>
    %164 = vector.shape_cast %160 : vector<16x32xbf16> to vector<1x16x32xbf16>
    %165 = vector.shape_cast %161 : vector<16x32xbf16> to vector<1x16x32xbf16>
    %166 = tpu.concatenate %162, %163, %164, %165 in 0 : vector<1x16x32xbf16>, vector<1x16x32xbf16>, vector<1x16x32xbf16>, vector<1x16x32xbf16> -> vector<4x16x32xbf16>
    %167 = arith.truncf %146 : vector<16x128xf32> to vector<16x128xbf16>
    %168 = vector.extract_strided_slice %167 {offsets = [0, 0], sizes = [16, 32], strides = [1, 1]} : vector<16x128xbf16> to vector<16x32xbf16>
    %169 = vector.extract_strided_slice %167 {offsets = [0, 32], sizes = [16, 32], strides = [1, 1]} : vector<16x128xbf16> to vector<16x32xbf16>
    %170 = vector.extract_strided_slice %167 {offsets = [0, 64], sizes = [16, 32], strides = [1, 1]} : vector<16x128xbf16> to vector<16x32xbf16>
    %171 = vector.extract_strided_slice %167 {offsets = [0, 96], sizes = [16, 32], strides = [1, 1]} : vector<16x128xbf16> to vector<16x32xbf16>
    %172 = vector.shape_cast %168 : vector<16x32xbf16> to vector<1x16x32xbf16>
    %173 = vector.shape_cast %169 : vector<16x32xbf16> to vector<1x16x32xbf16>
    %174 = vector.shape_cast %170 : vector<16x32xbf16> to vector<1x16x32xbf16>
    %175 = vector.shape_cast %171 : vector<16x32xbf16> to vector<1x16x32xbf16>
    %176 = tpu.concatenate %172, %173, %174, %175 in 0 : vector<1x16x32xbf16>, vector<1x16x32xbf16>, vector<1x16x32xbf16>, vector<1x16x32xbf16> -> vector<4x16x32xbf16>
    "tpu.trace_start"() <{level = 10 : i32, message = "htd,hsd->hts"}> : () -> ()
    %cst_55 = arith.constant dense<0.000000e+00> : vector<4x8x16xf32>
    %177 = tpu.matmul %156, %166, %cst_55 {dimension_numbers = #tpu.dot_dimension_numbers<[2], [2], [1], [1], [0, 0, 0, 1, 1, 1], [0], [0]>} : vector<4x8x32xbf16>, vector<4x16x32xbf16>, vector<4x8x16xf32> -> vector<4x8x16xf32>
    "tpu.trace_stop"() : () -> ()
    %cst_56 = arith.constant 0.176776692 : f32
    %178 = vector.broadcast %cst_56 : f32 to vector<4x8x16xf32>
    %179 = arith.mulf %177, %178 : vector<4x8x16xf32>
    %180 = vector.shape_cast %7 : vector<1x16xf32> to vector<1x1x16xf32>
    %cst_57 = arith.constant 0.000000e+00 : f32
    %181 = vector.broadcast %cst_57 : f32 to vector<1x1x16xf32>
    %182 = arith.cmpf ogt, %180, %181 : vector<1x1x16xf32>
    %cst_58 = arith.constant -1.000000e+09 : f32
    %183 = vector.shape_cast %182 : vector<1x1x16xi1> to vector<1x1x16xi1>
    %184 = vector.broadcast %183 : vector<1x1x16xi1> to vector<4x8x16xi1>
    %185 = vector.broadcast %cst_58 : f32 to vector<4x8x16xf32>
    %186 = arith.select %184, %179, %185 : vector<4x8x16xi1>, vector<4x8x16xf32>
    %cst_59 = arith.constant dense<0xFF800000> : vector<4x8xf32>
    %187 = vector.multi_reduction <maximumf>, %186, %cst_59 [2] : vector<4x8x16xf32> to vector<4x8xf32>
    %188 = vector.shape_cast %187 : vector<4x8xf32> to vector<4x8x1xf32>
    %189 = vector.broadcast %188 : vector<4x8x1xf32> to vector<4x8x16xf32>
    %190 = arith.subf %186, %189 : vector<4x8x16xf32>
    %191 = math.exp %190 : vector<4x8x16xf32>
    %cst_60 = arith.constant dense<0.000000e+00> : vector<4x8xf32>
    %192 = vector.multi_reduction <add>, %191, %cst_60 [2] : vector<4x8x16xf32> to vector<4x8xf32>
    %193 = vector.shape_cast %192 : vector<4x8xf32> to vector<4x8x1xf32>
    %194 = vector.broadcast %193 : vector<4x8x1xf32> to vector<4x8x16xf32>
    %195 = arith.divf %191, %194 : vector<4x8x16xf32>
    %196 = arith.truncf %195 : vector<4x8x16xf32> to vector<4x8x16xbf16>
    "tpu.trace_start"() <{level = 10 : i32, message = "hts,hsd->htd"}> : () -> ()
    %cst_61 = arith.constant dense<0.000000e+00> : vector<4x8x32xf32>
    %197 = tpu.matmul %196, %176, %cst_61 {dimension_numbers = #tpu.dot_dimension_numbers<[2], [1], [1], [2], [0, 0, 0, 1, 1, 2], [0], [0]>} : vector<4x8x16xbf16>, vector<4x16x32xbf16>, vector<4x8x32xf32> -> vector<4x8x32xf32>
    "tpu.trace_stop"() : () -> ()
    %198 = vector.extract_strided_slice %197 {offsets = [0, 0, 0], sizes = [1, 8, 32], strides = [1, 1, 1]} : vector<4x8x32xf32> to vector<1x8x32xf32>
    %199 = vector.shape_cast %198 : vector<1x8x32xf32> to vector<8x32xf32>
    %200 = vector.extract_strided_slice %197 {offsets = [1, 0, 0], sizes = [1, 8, 32], strides = [1, 1, 1]} : vector<4x8x32xf32> to vector<1x8x32xf32>
    %201 = vector.shape_cast %200 : vector<1x8x32xf32> to vector<8x32xf32>
    %202 = vector.extract_strided_slice %197 {offsets = [2, 0, 0], sizes = [1, 8, 32], strides = [1, 1, 1]} : vector<4x8x32xf32> to vector<1x8x32xf32>
    %203 = vector.shape_cast %202 : vector<1x8x32xf32> to vector<8x32xf32>
    %204 = vector.extract_strided_slice %197 {offsets = [3, 0, 0], sizes = [1, 8, 32], strides = [1, 1, 1]} : vector<4x8x32xf32> to vector<1x8x32xf32>
    %205 = vector.shape_cast %204 : vector<1x8x32xf32> to vector<8x32xf32>
    %206 = tpu.concatenate %199, %201, %203, %205 in 1 : vector<8x32xf32>, vector<8x32xf32>, vector<8x32xf32>, vector<8x32xf32> -> vector<8x128xf32>
    %c0_62 = arith.constant 0 : index
    %c0_63 = arith.constant 0 : index
    %c0_64 = arith.constant 0 : index
    %c0_65 = arith.constant 0 : index
    %207 = vector.load %arg28[%c0_62, %c0_63, %c0_64, %c0_65] : memref<1x4x8x16xf32, #tpu.memory_space<vmem>>, vector<1x4x8x16xf32>
    %208 = vector.shape_cast %207 : vector<1x4x8x16xf32> to vector<4x8x16xf32>
    %209 = vector.shape_cast %195 : vector<4x8x16xf32> to vector<1x4x8x16xf32>
    tpu.vector_store %arg28[%c0_62, %c0_63, %c0_64, %c0_65], %209 {strides = array<i32>} : memref<1x4x8x16xf32, #tpu.memory_space<vmem>>, vector<1x4x8x16xf32>,
    %210 = arith.truncf %206 : vector<8x128xf32> to vector<8x128xbf16>
    %c0_66 = arith.constant 0 : index
    %c0_67 = arith.constant 0 : index
    %211 = vector.load %arg17[%c0_66, %c0_67] : memref<128x128xbf16, #tpu.memory_space<vmem>>, vector<128x128xbf16>
    %cst_68 = arith.constant dense<0.000000e+00> : vector<8x128xf32>
    %212 = tpu.matmul %210, %211, %cst_68 {dimension_numbers = #tpu.dot_dimension_numbers<[1], [0], [0], [1], [0, 0, 1, 1], [], []>} : vector<8x128xbf16>, vector<128x128xbf16>, vector<8x128xf32> -> vector<8x128xf32>
    %213 = arith.addf %108, %212 : vector<8x128xf32>
    %c0_69 = arith.constant 0 : index
    %c0_70 = arith.constant 0 : index
    %214 = vector.load %arg18[%c0_69, %c0_70] : memref<1x128xf32, #tpu.memory_space<vmem>>, vector<1x128xf32>
    %215 = vector.broadcast %214 : vector<1x128xf32> to vector<8x128xf32>
    %216 = arith.addf %213, %215 : vector<8x128xf32>
    %c0_71 = arith.constant 0 : index
    %c0_72 = arith.constant 0 : index
    %217 = vector.load %arg19[%c0_71, %c0_72] : memref<1x128xf32, #tpu.memory_space<vmem>>, vector<1x128xf32>
    %c0_73 = arith.constant 0 : index
    %c0_74 = arith.constant 0 : index
    %218 = vector.load %arg20[%c0_73, %c0_74] : memref<1x128xf32, #tpu.memory_space<vmem>>, vector<1x128xf32>
    %cst_75 = arith.constant dense<0.000000e+00> : vector<8xf32>
    %219 = vector.multi_reduction <add>, %216, %cst_75 [1] : vector<8x128xf32> to vector<8xf32>
    %220 = vector.shape_cast %219 : vector<8xf32> to vector<8x1xf32>
    %cst_76 = arith.constant 1.280000e+02 : f32
    %221 = vector.broadcast %cst_76 : f32 to vector<8x1xf32>
    %222 = arith.divf %220, %221 : vector<8x1xf32>
    %223 = vector.broadcast %222 : vector<8x1xf32> to vector<8x128xf32>
    %224 = arith.subf %216, %223 : vector<8x128xf32>
    %225 = arith.mulf %224, %224 : vector<8x128xf32>
    %cst_77 = arith.constant dense<0.000000e+00> : vector<8xf32>
    %226 = vector.multi_reduction <add>, %225, %cst_77 [1] : vector<8x128xf32> to vector<8xf32>
    %227 = vector.shape_cast %226 : vector<8xf32> to vector<8x1xf32>
    %cst_78 = arith.constant 1.280000e+02 : f32
    %228 = vector.broadcast %cst_78 : f32 to vector<8x1xf32>
    %229 = arith.divf %227, %228 : vector<8x1xf32>
    %230 = vector.broadcast %222 : vector<8x1xf32> to vector<8x128xf32>
    %231 = arith.subf %216, %230 : vector<8x128xf32>
    %cst_79 = arith.constant 9.99999974E-6 : f32
    %232 = vector.broadcast %cst_79 : f32 to vector<8x1xf32>
    %233 = arith.addf %229, %232 : vector<8x1xf32>
    %234 = math.rsqrt %233 : vector<8x1xf32>
    %235 = vector.broadcast %234 : vector<8x1xf32> to vector<8x128xf32>
    %236 = arith.mulf %231, %235 : vector<8x128xf32>
    %237 = vector.broadcast %217 : vector<1x128xf32> to vector<8x128xf32>
    %238 = arith.mulf %236, %237 : vector<8x128xf32>
    %239 = vector.broadcast %218 : vector<1x128xf32> to vector<8x128xf32>
    %240 = arith.addf %238, %239 : vector<8x128xf32>
    %241 = arith.truncf %240 : vector<8x128xf32> to vector<8x128xbf16>
    %c0_80 = arith.constant 0 : index
    %c0_81 = arith.constant 0 : index
    %242 = vector.load %arg21[%c0_80, %c0_81] : memref<128x256xbf16, #tpu.memory_space<vmem>>, vector<128x256xbf16>
    %cst_82 = arith.constant dense<0.000000e+00> : vector<8x256xf32>
    %243 = tpu.matmul %241, %242, %cst_82 {dimension_numbers = #tpu.dot_dimension_numbers<[1], [0], [0], [1], [0, 0, 1, 1], [], []>} : vector<8x128xbf16>, vector<128x256xbf16>, vector<8x256xf32> -> vector<8x256xf32>
    %c0_83 = arith.constant 0 : index
    %c0_84 = arith.constant 0 : index
    %244 = vector.load %arg22[%c0_83, %c0_84] : memref<1x256xf32, #tpu.memory_space<vmem>>, vector<1x256xf32>
    %245 = vector.broadcast %244 : vector<1x256xf32> to vector<8x256xf32>
    %246 = arith.addf %243, %245 : vector<8x256xf32>
    %cst_85 = arith.constant 0.000000e+00 : f32
    %247 = vector.broadcast %cst_85 : f32 to vector<8x256xf32>
    %248 = arith.maximumf %246, %247 : vector<8x256xf32>
    %249 = arith.truncf %248 : vector<8x256xf32> to vector<8x256xbf16>
    %c0_86 = arith.constant 0 : index
    %c0_87 = arith.constant 0 : index
    %250 = vector.load %arg23[%c0_86, %c0_87] : memref<256x128xbf16, #tpu.memory_space<vmem>>, vector<256x128xbf16>
    %cst_88 = arith.constant dense<0.000000e+00> : vector<8x128xf32>
    %251 = tpu.matmul %249, %250, %cst_88 {dimension_numbers = #tpu.dot_dimension_numbers<[1], [0], [0], [1], [0, 0, 1, 1], [], []>} : vector<8x256xbf16>, vector<256x128xbf16>, vector<8x128xf32> -> vector<8x128xf32>
    %252 = arith.addf %216, %251 : vector<8x128xf32>
    %c0_89 = arith.constant 0 : index
    %c0_90 = arith.constant 0 : index
    %253 = vector.load %arg24[%c0_89, %c0_90] : memref<1x128xf32, #tpu.memory_space<vmem>>, vector<1x128xf32>
    %254 = vector.broadcast %253 : vector<1x128xf32> to vector<8x128xf32>
    %255 = arith.addf %252, %254 : vector<8x128xf32>
    %c0_91 = arith.constant 0 : index
    %c0_92 = arith.constant 0 : index
    %256 = vector.load %arg25[%c0_91, %c0_92] : memref<1x128xf32, #tpu.memory_space<vmem>>, vector<1x128xf32>
    %c0_93 = arith.constant 0 : index
    %c0_94 = arith.constant 0 : index
    %257 = vector.load %arg26[%c0_93, %c0_94] : memref<1x128xf32, #tpu.memory_space<vmem>>, vector<1x128xf32>
    %cst_95 = arith.constant dense<0.000000e+00> : vector<8xf32>
    %258 = vector.multi_reduction <add>, %255, %cst_95 [1] : vector<8x128xf32> to vector<8xf32>
    %259 = vector.shape_cast %258 : vector<8xf32> to vector<8x1xf32>
    %cst_96 = arith.constant 1.280000e+02 : f32
    %260 = vector.broadcast %cst_96 : f32 to vector<8x1xf32>
    %261 = arith.divf %259, %260 : vector<8x1xf32>
    %262 = vector.broadcast %261 : vector<8x1xf32> to vector<8x128xf32>
    %263 = arith.subf %255, %262 : vector<8x128xf32>
    %264 = arith.mulf %263, %263 : vector<8x128xf32>
    %cst_97 = arith.constant dense<0.000000e+00> : vector<8xf32>
    %265 = vector.multi_reduction <add>, %264, %cst_97 [1] : vector<8x128xf32> to vector<8xf32>
    %266 = vector.shape_cast %265 : vector<8xf32> to vector<8x1xf32>
    %cst_98 = arith.constant 1.280000e+02 : f32
    %267 = vector.broadcast %cst_98 : f32 to vector<8x1xf32>
    %268 = arith.divf %266, %267 : vector<8x1xf32>
    %269 = vector.broadcast %261 : vector<8x1xf32> to vector<8x128xf32>
    %270 = arith.subf %255, %269 : vector<8x128xf32>
    %cst_99 = arith.constant 9.99999974E-6 : f32
    %271 = vector.broadcast %cst_99 : f32 to vector<8x1xf32>
    %272 = arith.addf %268, %271 : vector<8x1xf32>
    %273 = math.rsqrt %272 : vector<8x1xf32>
    %274 = vector.broadcast %273 : vector<8x1xf32> to vector<8x128xf32>
    %275 = arith.mulf %270, %274 : vector<8x128xf32>
    %276 = vector.broadcast %256 : vector<1x128xf32> to vector<8x128xf32>
    %277 = arith.mulf %275, %276 : vector<8x128xf32>
    %278 = vector.broadcast %257 : vector<1x128xf32> to vector<8x128xf32>
    %279 = arith.addf %277, %278 : vector<8x128xf32>
    %c0_100 = arith.constant 0 : index
    %c0_101 = arith.constant 0 : index
    %c0_102 = arith.constant 0 : index
    %280 = vector.load %arg27[%c0_100, %c0_101, %c0_102] : memref<1x8x128xf32, #tpu.memory_space<vmem>>, vector<1x8x128xf32>
    %281 = vector.shape_cast %280 : vector<1x8x128xf32> to vector<8x128xf32>
    %282 = vector.shape_cast %279 : vector<8x128xf32> to vector<1x8x128xf32>
    tpu.vector_store %arg27[%c0_100, %c0_101, %c0_102], %282 {strides = array<i32>} : memref<1x8x128xf32, #tpu.memory_space<vmem>>, vector<1x8x128xf32>,
    return
  }
  func.func @transform_0(%arg0: i32) -> (i32, i32, i32) {
    %c0_i32 = arith.constant 0 : i32
    %c0_i32_0 = arith.constant 0 : i32
    %c0_i32_1 = arith.constant 0 : i32
    return %arg0, %c0_i32, %c0_i32_0 : i32, i32, i32
  }
  func.func @transform_1(%arg0: i32) -> (i32, i32, i32) {
    %c0_i32 = arith.constant 0 : i32
    %c0_i32_0 = arith.constant 0 : i32
    %c0_i32_1 = arith.constant 0 : i32
    return %arg0, %c0_i32, %c0_i32_0 : i32, i32, i32
  }
  func.func @transform_2(%arg0: i32) -> (i32, i32, i32) {
    %c0_i32 = arith.constant 0 : i32
    %c0_i32_0 = arith.constant 0 : i32
    %c0_i32_1 = arith.constant 0 : i32
    return %arg0, %c0_i32, %c0_i32_0 : i32, i32, i32
  }
  func.func @transform_3(%arg0: i32) -> (i32, i32, i32) {
    %c0_i32 = arith.constant 0 : i32
    %c0_i32_0 = arith.constant 0 : i32
    %c0_i32_1 = arith.constant 0 : i32
    return %arg0, %c0_i32, %c0_i32_0 : i32, i32, i32
  }
  func.func @transform_4(%arg0: i32) -> (i32, i32) {
    %c0_i32 = arith.constant 0 : i32
    %c0_i32_0 = arith.constant 0 : i32
    %c0_i32_1 = arith.constant 0 : i32
    return %c0_i32, %c0_i32_0 : i32, i32
  }
  func.func @transform_5(%arg0: i32) -> (i32, i32) {
    %c0_i32 = arith.constant 0 : i32
    %c0_i32_0 = arith.constant 0 : i32
    %c0_i32_1 = arith.constant 0 : i32
    return %c0_i32, %c0_i32_0 : i32, i32
  }
  func.func @transform_6(%arg0: i32) -> (i32, i32) {
    %c0_i32 = arith.constant 0 : i32
    %c0_i32_0 = arith.constant 0 : i32
    %c0_i32_1 = arith.constant 0 : i32
    return %c0_i32, %c0_i32_0 : i32, i32
  }
  func.func @transform_7(%arg0: i32) -> (i32, i32) {
    %c0_i32 = arith.constant 0 : i32
    %c0_i32_0 = arith.constant 0 : i32
    %c0_i32_1 = arith.constant 0 : i32
    return %c0_i32, %c0_i32_0 : i32, i32
  }
  func.func @transform_8(%arg0: i32) -> (i32, i32) {
    %c0_i32 = arith.constant 0 : i32
    %c0_i32_0 = arith.constant 0 : i32
    %c0_i32_1 = arith.constant 0 : i32
    return %c0_i32, %c0_i32_0 : i32, i32
  }
  func.func @transform_9(%arg0: i32) -> (i32, i32) {
    %c0_i32 = arith.constant 0 : i32
    %c0_i32_0 = arith.constant 0 : i32
    %c0_i32_1 = arith.constant 0 : i32
    return %c0_i32, %c0_i32_0 : i32, i32
  }
  func.func @transform_10(%arg0: i32) -> (i32, i32) {
    %c0_i32 = arith.constant 0 : i32
    %c0_i32_0 = arith.constant 0 : i32
    %c0_i32_1 = arith.constant 0 : i32
    return %c0_i32, %c0_i32_0 : i32, i32
  }
  func.func @transform_11(%arg0: i32) -> (i32, i32) {
    %c0_i32 = arith.constant 0 : i32
    %c0_i32_0 = arith.constant 0 : i32
    %c0_i32_1 = arith.constant 0 : i32
    return %c0_i32, %c0_i32_0 : i32, i32
  }
  func.func @transform_12(%arg0: i32) -> (i32, i32) {
    %c0_i32 = arith.constant 0 : i32
    %c0_i32_0 = arith.constant 0 : i32
    %c0_i32_1 = arith.constant 0 : i32
    return %c0_i32, %c0_i32_0 : i32, i32
  }
  func.func @transform_13(%arg0: i32) -> (i32, i32) {
    %c0_i32 = arith.constant 0 : i32
    %c0_i32_0 = arith.constant 0 : i32
    %c0_i32_1 = arith.constant 0 : i32
    return %c0_i32, %c0_i32_0 : i32, i32
  }
  func.func @transform_14(%arg0: i32) -> (i32, i32) {
    %c0_i32 = arith.constant 0 : i32
    %c0_i32_0 = arith.constant 0 : i32
    %c0_i32_1 = arith.constant 0 : i32
    return %c0_i32, %c0_i32_0 : i32, i32
  }
  func.func @transform_15(%arg0: i32) -> (i32, i32) {
    %c0_i32 = arith.constant 0 : i32
    %c0_i32_0 = arith.constant 0 : i32
    %c0_i32_1 = arith.constant 0 : i32
    return %c0_i32, %c0_i32_0 : i32, i32
  }
  func.func @transform_16(%arg0: i32) -> (i32, i32) {
    %c0_i32 = arith.constant 0 : i32
    %c0_i32_0 = arith.constant 0 : i32
    %c0_i32_1 = arith.constant 0 : i32
    return %c0_i32, %c0_i32_0 : i32, i32
  }
  func.func @transform_17(%arg0: i32) -> (i32, i32) {
    %c0_i32 = arith.constant 0 : i32
    %c0_i32_0 = arith.constant 0 : i32
    %c0_i32_1 = arith.constant 0 : i32
    return %c0_i32, %c0_i32_0 : i32, i32
  }
  func.func @transform_18(%arg0: i32) -> (i32, i32) {
    %c0_i32 = arith.constant 0 : i32
    %c0_i32_0 = arith.constant 0 : i32
    %c0_i32_1 = arith.constant 0 : i32
    return %c0_i32, %c0_i32_0 : i32, i32
  }
  func.func @transform_19(%arg0: i32) -> (i32, i32) {
    %c0_i32 = arith.constant 0 : i32
    %c0_i32_0 = arith.constant 0 : i32
    %c0_i32_1 = arith.constant 0 : i32
    return %c0_i32, %c0_i32_0 : i32, i32
  }
  func.func @transform_20(%arg0: i32) -> (i32, i32) {
    %c0_i32 = arith.constant 0 : i32
    %c0_i32_0 = arith.constant 0 : i32
    %c0_i32_1 = arith.constant 0 : i32
    return %c0_i32, %c0_i32_0 : i32, i32
  }
  func.func @transform_21(%arg0: i32) -> (i32, i32) {
    %c0_i32 = arith.constant 0 : i32
    %c0_i32_0 = arith.constant 0 : i32
    %c0_i32_1 = arith.constant 0 : i32
    return %c0_i32, %c0_i32_0 : i32, i32
  }
  func.func @transform_22(%arg0: i32) -> (i32, i32) {
    %c0_i32 = arith.constant 0 : i32
    %c0_i32_0 = arith.constant 0 : i32
    %c0_i32_1 = arith.constant 0 : i32
    return %c0_i32, %c0_i32_0 : i32, i32
  }
  func.func @transform_23(%arg0: i32) -> (i32, i32) {
    %c0_i32 = arith.constant 0 : i32
    %c0_i32_0 = arith.constant 0 : i32
    %c0_i32_1 = arith.constant 0 : i32
    return %c0_i32, %c0_i32_0 : i32, i32
  }
  func.func @transform_24(%arg0: i32) -> (i32, i32) {
    %c0_i32 = arith.constant 0 : i32
    %c0_i32_0 = arith.constant 0 : i32
    %c0_i32_1 = arith.constant 0 : i32
    return %c0_i32, %c0_i32_0 : i32, i32
  }
  func.func @transform_25(%arg0: i32) -> (i32, i32) {
    %c0_i32 = arith.constant 0 : i32
    %c0_i32_0 = arith.constant 0 : i32
    %c0_i32_1 = arith.constant 0 : i32
    return %c0_i32, %c0_i32_0 : i32, i32
  }
  func.func @transform_26(%arg0: i32) -> (i32, i32, i32) {
    %c0_i32 = arith.constant 0 : i32
    %c0_i32_0 = arith.constant 0 : i32
    %c0_i32_1 = arith.constant 0 : i32
    return %arg0, %c0_i32, %c0_i32_0 : i32, i32, i32
  }
  func.func @transform_27(%arg0: i32) -> (i32, i32, i32, i32) {
    %c0_i32 = arith.constant 0 : i32
    %c0_i32_0 = arith.constant 0 : i32
    %c0_i32_1 = arith.constant 0 : i32
    %c0_i32_2 = arith.constant 0 : i32
    return %arg0, %c0_i32, %c0_i32_0, %c0_i32_1 : i32, i32, i32, i32
  }
}

</mosaic_0001>

<bundles_post_ra>
// kernel: decoder_forward.2
= control target key start
LH: loop header
LB: loop body
LE: loop exit
PB: predicated region body
PF: predicated region fallthrough
CT: control target
= control target key end

     0   :  { %s5771_s0 = inlined_call_operand.vmem [shape: f32[2,8,128], index: 0, kind: input, shape index: {}]   ;;  %s5772_s1 = inlined_call_operand.vmem [shape: f32[2,16,128], index: 1, kind: input, shape index: {}]   ;;  %s5773_s2 = inlined_call_operand.vmem [shape: f32[2,8,8], index: 2, kind: input, shape index: {}]   ;;  %s5774_s3 = inlined_call_operand.vmem [shape: f32[2,1,16], index: 3, kind: input, shape index: {}]   ;;  %s5775_s4 = inlined_call_operand.hbm [shape: f32[1,128], index: 4, kind: input, shape index: {}]   ;;  %s5776_s5 = inlined_call_operand.hbm [shape: f32[1,128], index: 5, kind: input, shape index: {}]   ;;  %s5777_s6 = inlined_call_operand.hbm [shape: bf16[128,384], index: 6, kind: input, shape index: {}]   ;;  %s5778_s7 = inlined_call_operand.hbm [shape: f32[1,384], index: 7, kind: input, shape index: {}]   ;;  %s5779_s8 = inlined_call_operand.hbm [shape: bf16[128,128], index: 8, kind: input, shape index: {}]   ;;  %s5780_s9 = inlined_call_operand.hbm [shape: f32[1,128], index: 9, kind: input, shape index: {}]   ;;  %s5781_s10 = inlined_call_operand.hbm [shape: f32[1,128], index: 10, kind: input, shape index: {}]   ;;  %s5782_s11 = inlined_call_operand.hbm [shape: f32[1,128], index: 11, kind: input, shape index: {}]   ;;  %s5783_s12 = inlined_call_operand.hbm [shape: bf16[128,128], index: 12, kind: input, shape index: {}]   ;;  %s5784_s13 = inlined_call_operand.hbm [shape: f32[1,128], index: 13, kind: input, shape index: {}]   ;;  %s5785_s14 = inlined_call_operand.hbm [shape: bf16[128,256], index: 14, kind: input, shape index: {}]   ;;  %s5786_s15 = inlined_call_operand.hbm [shape: f32[1,256], index: 15, kind: input, shape index: {}]   ;;  %s5787_s16 = inlined_call_operand.hbm [shape: bf16[128,128], index: 16, kind: input, shape index: {}]   ;;  %s5788_s17 = inlined_call_operand.hbm [shape: f32[1,128], index: 17, kind: input, shape index: {}]   ;;  %s5789_s18 = inlined_call_operand.hbm [shape: f32[1,128], index: 18, kind: input, shape index: {}]   ;;  %s5790_s19 = inlined_call_operand.hbm [shape: f32[1,128], index: 19, kind: input, shape index: {}]   ;;  %s5791_s20 = inlined_call_operand.hbm [shape: bf16[128,256], index: 20, kind: input, shape index: {}]   ;;  %s5792_s21 = inlined_call_operand.hbm [shape: f32[1,256], index: 21, kind: input, shape index: {}]   ;;  %s5793_s22 = inlined_call_operand.hbm [shape: bf16[256,128], index: 22, kind: input, shape index: {}]   ;;  %s5794_s23 = inlined_call_operand.hbm [shape: f32[1,128], index: 23, kind: input, shape index: {}]   ;;  %s5795_s24 = inlined_call_operand.vmem [shape: f32[2,8,128], index: 24, kind: output, shape index: {}]  }
   0x1   :  { %5810 = sst [smem:[#allocation47_spill]] %s5771_s0 }
   0x2   :  { %5811 = sst [smem:[#allocation48_spill]] %s5772_s1 }
   0x3   :  { %5812 = sst [smem:[#allocation49_spill]] %s5773_s2 }
   0x4   :  { %5813 = sst [smem:[#allocation50_spill]] %s5774_s3 }
   0x5   :  { %5814 = sst [smem:[#allocation51_spill]] %s5775_s4 }
   0x6   :  { %5815 = sst [smem:[#allocation52_spill]] %s5776_s5 }
   0x7   :  { %5816 = sst [smem:[#allocation53_spill]] %s5777_s6 }
   0x8   :  { %5817 = sst [smem:[#allocation54_spill]] %s5778_s7 }
   0x9   :  { %5818 = sst [smem:[#allocation55_spill]] %s5779_s8 }
   0xa   :  { %5819 = sst [smem:[#allocation56_spill]] %s5780_s9 }
   0xb   :  { %5820 = sst [smem:[#allocation57_spill]] %s5782_s11 }
   0xc   :  { %5821 = sst [smem:[#allocation58_spill]] %s5784_s13 }
   0xd   :  { %5822 = sst [smem:[#allocation59_spill]] %s5786_s15 }
   0xe   :  { %5823 = sst [smem:[#allocation60_spill]] %s5794_s23 }
   0xf   :  { %5824 = sst [smem:[#allocation61_spill]] %s5795_s24 }
  0x10   :  { %29 = vsyncpa [#allocation3], 0 }
  0x11   :  { %30 = vsyncpa [#allocation5], 0 }
  0x12   :  { %31 = vsyncpa [#allocation8], 0 }
  0x13   :  { %32 = vsyncpa [#allocation11], 0 }
  0x14   :  { %33 = vsyncpa [#allocation14], 0 }
  0x15   :  { %34 = vsyncpa [#allocation17], 0 }
  0x16   :  { %35 = vsyncpa [#allocation20], 0 }
  0x17   :  { %36 = vsyncpa [#allocation23], 0 }
  0x18   :  { %37 = vsyncpa [#allocation26], 0 }
  0x19   :  { %38 = vsyncpa [#allocation29], 0 }
  0x1a   :  { %39 = vsyncpa [#allocation32], 0  ;;  %s5021_s5 = smov 0  }
  0x1b LB: > { %5825 = sst [smem:[#allocation44_spill]] %s4862_s5  ;;  %s4864_s26 = smov [#allocation4]   ;;  %s4862_s5 = sphi %s5021_s5, %s45_s5  }
  0x1c   : > { %s624_s27 = sshll.u32 %s4864_s26, 4  ;;  %s5027_s28 = sadd.s32 4294967295, %s4862_s5   ;;  %s5032_s27 = int_to_ptr.vmem [resolvable:$true] %s624_s27 }
  0x1d   : > { %5826 = sst [smem:[#allocation45_spill]] %s5027_s28  ;;  %p3434_p0 = scmp.ge.s32.totalorder %s4862_s5, 1 }
  0x1e   : > { %p600_p1 = scmp.lt.s32.totalorder %s4862_s5, 3  ;;  %p5806_p2 = scmp.eq.s32.totalorder %s5027_s28, 0 }
  0x1f   : > { %s4865_s2 = smov [#allocation7]   ;;  %s4866_s0 = smov [#allocation10]  }
  0x20   : > { %p5034_p3 = pnand %p3434_p0, %p600_p1  ;;  %s648_s29 = sshll.u32 %s4865_s2, 4  ;;  %s5040_s29 = int_to_ptr.vmem [resolvable:$true] %s648_s29 }
  0x21   : > { %s672_s7 = sshll.u32 %s4866_s0, 4  ;;  %s4867_s3 = smov [#allocation13]   ;;  %s5048_s7 = int_to_ptr.vmem [resolvable:$true] %s672_s7 }
  0x22   : > { %s5827_s6 = scalar_select %p5034_p3, 1, 0 }
  0x23   : > { %p3953_p4 = pneg %p5034_p3  ;;  %s694_s25 = sshll.u32 %s4867_s3, 4  ;;  %s5050_s25 = int_to_ptr.vmem [resolvable:$true] %s694_s25 }
  0x24   : > { %5828 = sst [smem:[#allocation46_spill]] %s5827_s6  ;;  %s5830_s1 = sld [smem:[#allocation52_spill]] }
  0x25   : > { %p5044_p5 = pnand %p5806_p2, %p3953_p4 }
  0x27   : > { %p5060_p7 = pneg %p5044_p5 }
  0x2a   : > { %s4252_s26 = scalar_lea.hbm %s5830_s1, 16 }
  0x2b   : > { %p4253_p6 = scmp.ne.s32.totalorder %s5830_s1, %s4252_s26  ;;  %p4259_p10 = scmp.lt.u32.totalorder %s4252_s26, %s5830_s1 }
  0x2d   : > { %p4255_p8 = pnand %p5060_p7, %p4253_p6 }
  0x2f   : > { %p4256_p9 = pneg %p4255_p8 }
  0x31   : > { %p4261_p11 = pnand %p4259_p10, %p4256_p9 }
  0x33   : > { %4264 = shalt.err (!%p4261_p11)
}
  0x34   : > { %s4265_s5 = scalar_lea.vmem %s5032_s27, 16  ;;  %s4272_s8 = scalar_lea.vmem %s5032_s27, 32 }
  0x35   : > { %p4266_p12 = scmp.ne.s32.totalorder %s5032_s27, %s4265_s5  ;;  %p4273_p1 = scmp.lt.s32.totalorder %s5032_s27, %s5032_s27 }
  0x36   : > { %p4274_p4 = scmp.lt.s32.totalorder %s4272_s8, %s4265_s5 }
  0x37   : > { %p4268_p13 = pnand %p4266_p12, %p5060_p7 }
  0x38   : > { %p4275_p6 = por %p4274_p4, %p4273_p1 }
  0x39   : > { %p4269_p0 = pneg %p4268_p13 }
  0x3b   : > { %p4276_p8 = pnand %p4275_p6, %p4269_p0 }
  0x3d   : > { %4279 = shalt.err (!%p4276_p8)
}
  0x3e   : > { %3959 = dma.hbm_to_vmem [thread:$0]  (!%p5044_p5), %s5830_s1, 16, %s5032_s27, [#allocation5]  }
  0x3f   : > { %s5832_s3 = sld [smem:[#allocation54_spill]] }
  0x45   : > { %s4280_s28 = scalar_lea.hbm %s5832_s3, 48 }
  0x46   : > { %p4281_p9 = scmp.ne.s32.totalorder %s5832_s3, %s4280_s28  ;;  %p4287_p12 = scmp.lt.u32.totalorder %s4280_s28, %s5832_s3 }
  0x48   : > { %p4283_p10 = pnand %p4281_p9, %p5060_p7 }
  0x4a   : > { %p4284_p11 = pneg %p4283_p10 }
  0x4c   : > { %p4289_p13 = pnand %p4287_p12, %p4284_p11 }
  0x4e   : > { %4292 = shalt.err (!%p4289_p13)
}
  0x4f   : > { %s4293_s27 = scalar_lea.vmem %s5040_s29, 48  ;;  %s4300_s23 = scalar_lea.vmem %s5040_s29, 64 }
  0x50   : > { %p4294_p0 = scmp.ne.s32.totalorder %s5040_s29, %s4293_s27  ;;  %p4301_p6 = scmp.lt.s32.totalorder %s5040_s29, %s5040_s29 }
  0x51   : > { %p4302_p8 = scmp.lt.s32.totalorder %s4300_s23, %s4293_s27 }
  0x52   : > { %p4296_p1 = pnand %p4294_p0, %p5060_p7 }
  0x53   : > { %p4303_p9 = por %p4302_p8, %p4301_p6 }
  0x54   : > { %p4297_p4 = pneg %p4296_p1 }
  0x56   : > { %p4304_p10 = pnand %p4303_p9, %p4297_p4 }
  0x58   : > { %4307 = shalt.err (!%p4304_p10)
}
  0x59   : > { %3965 = dma.hbm_to_vmem [thread:$0]  (!%p5044_p5), %s5832_s3, 48, %s5040_s29, [#allocation8]  }
  0x5a   : > { %s5833_s9 = sld [smem:[#allocation56_spill]] }
  0x60   : > { %s4308_s26 = scalar_lea.hbm %s5833_s9, 16 }
  0x61   : > { %p4309_p11 = scmp.ne.s32.totalorder %s5833_s9, %s4308_s26  ;;  %p4315_p0 = scmp.lt.u32.totalorder %s4308_s26, %s5833_s9 }
  0x63   : > { %p4311_p12 = pnand %p4309_p11, %p5060_p7 }
  0x65   : > { %p4312_p13 = pneg %p4311_p12 }
  0x67   : > { %p4317_p1 = pnand %p4315_p0, %p4312_p13 }
  0x69   : > { %4320 = shalt.err (!%p4317_p1)
}
  0x6a   : > { %s4321_s29 = scalar_lea.vmem %s5048_s7, 16  ;;  %s4328_s23 = scalar_lea.vmem %s5048_s7, 32 }
  0x6b   : > { %p4322_p4 = scmp.ne.s32.totalorder %s5048_s7, %s4321_s29  ;;  %p4329_p9 = scmp.lt.s32.totalorder %s5048_s7, %s5048_s7 }
  0x6c   : > { %p4330_p10 = scmp.lt.s32.totalorder %s4328_s23, %s4321_s29 }
  0x6d   : > { %p4324_p6 = pnand %p4322_p4, %p5060_p7 }
  0x6e   : > { %p4331_p11 = por %p4330_p10, %p4329_p9 }
  0x6f   : > { %p4325_p8 = pneg %p4324_p6 }
  0x71   : > { %p4332_p12 = pnand %p4331_p11, %p4325_p8 }
  0x73   : > { %4335 = shalt.err (!%p4332_p12)
}
  0x74   : > { %3971 = dma.hbm_to_vmem [thread:$0]  (!%p5044_p5), %s5833_s9, 16, %s5048_s7, [#allocation11]  }
  0x75   : > { %s5834_s11 = sld [smem:[#allocation57_spill]] }
  0x7b   : > { %s4336_s26 = scalar_lea.hbm %s5834_s11, 16 }
  0x7c   : > { %p4337_p13 = scmp.ne.s32.totalorder %s5834_s11, %s4336_s26  ;;  %p4343_p4 = scmp.lt.u32.totalorder %s4336_s26, %s5834_s11 }
  0x7e   : > { %p4339_p0 = pnand %p4337_p13, %p5060_p7 }
  0x80   : > { %p4340_p1 = pneg %p4339_p0 }
  0x82   : > { %p4345_p6 = pnand %p4343_p4, %p4340_p1 }
  0x84   : > { %4348 = shalt.err (!%p4345_p6)
}
  0x85   : > { %s4349_s7 = scalar_lea.vmem %s5050_s25, 16  ;;  %s4356_s29 = scalar_lea.vmem %s5050_s25, 32 }
  0x86   : > { %p4350_p8 = scmp.ne.s32.totalorder %s5050_s25, %s4349_s7  ;;  %p4357_p11 = scmp.lt.s32.totalorder %s5050_s25, %s5050_s25 }
  0x87   : > { %p4358_p12 = scmp.lt.s32.totalorder %s4356_s29, %s4349_s7 }
  0x88   : > { %p4352_p9 = pnand %p4350_p8, %p5060_p7 }
  0x89   : > { %p4359_p13 = por %p4358_p12, %p4357_p11 }
  0x8a   : > { %p4353_p10 = pneg %p4352_p9 }
  0x8c   : > { %p4360_p0 = pnand %p4359_p13, %p4353_p10 }
  0x8e   : > { %4363 = shalt.err (!%p4360_p0)
}
  0x8f   : > { %3977 = dma.hbm_to_vmem [thread:$0]  (!%p5044_p5), %s5834_s11, 16, %s5050_s25, [#allocation14]  }
  0x90   : > { %s4868_s6 = smov [#allocation16]   ;;  %s4869_s4 = smov [#allocation19]  }
  0x91   : > { %s718_s24 = sshll.u32 %s4868_s6, 4  ;;  %s742_s26 = sshll.u32 %s4869_s4, 4  ;;  %s719_s24 = int_to_ptr.vmem [resolvable:$true] %s718_s24  ;;  %s743_s26 = int_to_ptr.vmem [resolvable:$true] %s742_s26 }
  0x92   : > { %s5835_s13 = sld [smem:[#allocation58_spill]] }
  0x98   : > { %s4364_s8 = scalar_lea.hbm %s5835_s13, 16 }
  0x99   : > { %p4365_p1 = scmp.ne.s32.totalorder %s5835_s13, %s4364_s8  ;;  %p4371_p8 = scmp.lt.u32.totalorder %s4364_s8, %s5835_s13 }
  0x9b   : > { %p4367_p4 = pnand %p4365_p1, %p5060_p7 }
  0x9d   : > { %p4368_p6 = pneg %p4367_p4 }
  0x9f   : > { %p4373_p9 = pnand %p4371_p8, %p4368_p6 }
  0xa1   : > { %4376 = shalt.err (!%p4373_p9)
}
  0xa2   : > { %s4377_s25 = scalar_lea.vmem %s719_s24, 16  ;;  %s4384_s28 = scalar_lea.vmem %s719_s24, 32 }
  0xa3   : > { %p4378_p10 = scmp.ne.s32.totalorder %s719_s24, %s4377_s25  ;;  %p4385_p13 = scmp.lt.s32.totalorder %s719_s24, %s719_s24 }
  0xa4   : > { %p4386_p0 = scmp.lt.s32.totalorder %s4384_s28, %s4377_s25 }
  0xa5   : > { %p4380_p11 = pnand %p4378_p10, %p5060_p7 }
  0xa6   : > { %p4387_p2 = por %p4386_p0, %p4385_p13 }
  0xa7   : > { %p4381_p12 = pneg %p4380_p11 }
  0xa9   : > { %p4388_p3 = pnand %p4387_p2, %p4381_p12 }
  0xab   : > { %4391 = shalt.err (!%p4388_p3)
}
  0xac   : > { %3983 = dma.hbm_to_vmem [thread:$0]  (!%p5044_p5), %s5835_s13, 16, %s719_s24, [#allocation17]  }
  0xad   : > { %s5836_s15 = sld [smem:[#allocation59_spill]] }
  0xb3   : > { %s4392_s8 = scalar_lea.hbm %s5836_s15, 32 }
  0xb4   : > { %p4393_p1 = scmp.ne.s32.totalorder %s5836_s15, %s4392_s8  ;;  %p4399_p3 = scmp.lt.u32.totalorder %s4392_s8, %s5836_s15 }
  0xb6   : > { %p4395_p4 = pnand %p4393_p1, %p5060_p7 }
  0xb8   : > { %p4396_p2 = pneg %p4395_p4 }
  0xba   : > { %p4401_p6 = pnand %p4399_p3, %p4396_p2 }
  0xbc   : > { %4404 = shalt.err (!%p4401_p6)
}
  0xbd   : > { %s4405_s25 = scalar_lea.vmem %s743_s26, 32  ;;  %p4413_p11 = scmp.lt.s32.totalorder %s743_s26, %s743_s26 }
  0xbe   : > { %p4406_p8 = scmp.ne.s32.totalorder %s743_s26, %s4405_s25  ;;  %p4414_p12 = scmp.lt.s32.totalorder %s4405_s25, %s4405_s25 }
  0xc0   : > { %p4408_p9 = pnand %p4406_p8, %p5060_p7  ;;  %p4415_p13 = por %p4414_p12, %p4413_p11 }
  0xc2   : > { %p4409_p10 = pneg %p4408_p9 }
  0xc4   : > { %p4416_p0 = pnand %p4415_p13, %p4409_p10 }
  0xc6   : > { %4419 = shalt.err (!%p4416_p0)
}
  0xc7   : > { %3989 = dma.hbm_to_vmem [thread:$0]  (!%p5044_p5), %s5836_s15, 32, %s743_s26, [#allocation20]  }
  0xc8   : > { %s4870_s6 = smov [#allocation22]   ;;  %s4871_s2 = smov [#allocation25]  }
  0xc9   : > { %s766_s4 = sshll.u32 %s4870_s6, 4  ;;  %s788_s5 = sshll.u32 %s4871_s2, 4  ;;  %s767_s4 = int_to_ptr.vmem [resolvable:$true] %s766_s4  ;;  %s789_s5 = int_to_ptr.vmem [resolvable:$true] %s788_s5 }
  0xca   : > { %s4420_s7 = scalar_lea.hbm %s5788_s17, 16 }
  0xcb   : > { %p4421_p1 = scmp.ne.s32.totalorder %s5788_s17, %s4420_s7  ;;  %p4427_p3 = scmp.lt.u32.totalorder %s4420_s7, %s5788_s17 }
  0xcd   : > { %p4423_p4 = pnand %p4421_p1, %p5060_p7 }
  0xcf   : > { %p4424_p2 = pneg %p4423_p4 }
  0xd1   : > { %p4429_p6 = pnand %p4427_p3, %p4424_p2 }
  0xd3   : > { %4432 = shalt.err (!%p4429_p6)
}
  0xd4   : > { %s4433_s26 = scalar_lea.vmem %s767_s4, 16  ;;  %s4440_s28 = scalar_lea.vmem %s767_s4, 32 }
  0xd5   : > { %p4434_p8 = scmp.ne.s32.totalorder %s767_s4, %s4433_s26  ;;  %p4441_p11 = scmp.lt.s32.totalorder %s767_s4, %s767_s4 }
  0xd6   : > { %p4442_p12 = scmp.lt.s32.totalorder %s4440_s28, %s4433_s26 }
  0xd7   : > { %p4436_p9 = pnand %p4434_p8, %p5060_p7 }
  0xd8   : > { %p4443_p13 = por %p4442_p12, %p4441_p11 }
  0xd9   : > { %p4437_p10 = pneg %p4436_p9 }
  0xdb   : > { %p4444_p0 = pnand %p4443_p13, %p4437_p10 }
  0xdd   : > { %4447 = shalt.err (!%p4444_p0)
}
  0xde   : > { %3995 = dma.hbm_to_vmem [thread:$0]  (!%p5044_p5), %s5788_s17, 16, %s767_s4, [#allocation23]  }
  0xdf   : > { %s4448_s7 = scalar_lea.hbm %s5790_s19, 16 }
  0xe0   : > { %p4449_p1 = scmp.ne.s32.totalorder %s5790_s19, %s4448_s7  ;;  %p4455_p3 = scmp.lt.u32.totalorder %s4448_s7, %s5790_s19 }
  0xe2   : > { %p4451_p4 = pnand %p4449_p1, %p5060_p7 }
  0xe4   : > { %p4452_p2 = pneg %p4451_p4 }
  0xe6   : > { %p4457_p6 = pnand %p4455_p3, %p4452_p2 }
  0xe8   : > { %4460 = shalt.err (!%p4457_p6)
}
  0xe9   : > { %s4461_s26 = scalar_lea.vmem %s789_s5, 16  ;;  %s4468_s4 = scalar_lea.vmem %s789_s5, 32 }
  0xea   : > { %p4462_p8 = scmp.ne.s32.totalorder %s789_s5, %s4461_s26  ;;  %p4469_p11 = scmp.lt.s32.totalorder %s789_s5, %s789_s5 }
  0xeb   : > { %p4470_p12 = scmp.lt.s32.totalorder %s4468_s4, %s4461_s26 }
  0xec   : > { %p4464_p9 = pnand %p4462_p8, %p5060_p7 }
  0xed   : > { %p4471_p13 = por %p4470_p12, %p4469_p11 }
  0xee   : > { %p4465_p10 = pneg %p4464_p9 }
  0xf0   : > { %p4472_p0 = pnand %p4471_p13, %p4465_p10 }
  0xf2   : > { %4475 = shalt.err (!%p4472_p0)
}
  0xf3   : > { %4001 = dma.hbm_to_vmem [thread:$0]  (!%p5044_p5), %s5790_s19, 16, %s789_s5, [#allocation26]  }
  0xf4   : > { %s4872_s2 = smov [#allocation28]   ;;  %s4873_s27 = smov [#allocation2]  }
  0xf5   : > { %s812_s8 = sshll.u32 %s4872_s2, 4  ;;  %s613_s7 = sshll.u32 %s4873_s27, 4  ;;  %s813_s8 = int_to_ptr.vmem [resolvable:$true] %s812_s8  ;;  %s614_s7 = int_to_ptr.vmem [resolvable:$true] %s613_s7 }
  0xf6   : > { %s4476_s25 = scalar_lea.hbm %s5792_s21, 32 }
  0xf7   : > { %p4477_p1 = scmp.ne.s32.totalorder %s5792_s21, %s4476_s25  ;;  %p4483_p3 = scmp.lt.u32.totalorder %s4476_s25, %s5792_s21 }
  0xf9   : > { %p4479_p4 = pnand %p4477_p1, %p5060_p7 }
  0xfb   : > { %p4480_p2 = pneg %p4479_p4 }
  0xfd   : > { %p4485_p6 = pnand %p4483_p3, %p4480_p2 }
  0xff   : > { %4488 = shalt.err (!%p4485_p6)
}
 0x100   : > { %s4489_s5 = scalar_lea.vmem %s813_s8, 32  ;;  %p4497_p11 = scmp.lt.s32.totalorder %s813_s8, %s813_s8 }
 0x101   : > { %p4490_p8 = scmp.ne.s32.totalorder %s813_s8, %s4489_s5  ;;  %p4498_p12 = scmp.lt.s32.totalorder %s4489_s5, %s4489_s5 }
 0x103   : > { %p4492_p9 = pnand %p4490_p8, %p5060_p7  ;;  %p4499_p13 = por %p4498_p12, %p4497_p11 }
 0x105   : > { %p4493_p10 = pneg %p4492_p9 }
 0x107   : > { %p4500_p0 = pnand %p4499_p13, %p4493_p10 }
 0x109   : > { %4503 = shalt.err (!%p4500_p0)
}
 0x10a   : > { %4007 = dma.hbm_to_vmem [thread:$0]  (!%p5044_p5), %s5792_s21, 32, %s813_s8, [#allocation29]  }
 0x10b   : > { %s5837_s23 = sld [smem:[#allocation51_spill]] }
 0x111   : > { %s4504_s25 = scalar_lea.hbm %s5837_s23, 16 }
 0x112   : > { %p4505_p1 = scmp.ne.s32.totalorder %s5837_s23, %s4504_s25  ;;  %p4511_p3 = scmp.lt.u32.totalorder %s4504_s25, %s5837_s23 }
 0x114   : > { %p4507_p4 = pnand %p4505_p1, %p5060_p7 }
 0x116   : > { %p4508_p2 = pneg %p4507_p4 }
 0x118   : > { %p4513_p6 = pnand %p4511_p3, %p4508_p2 }
 0x11a   : > { %4516 = shalt.err (!%p4513_p6)
}
 0x11b   : > { %s4517_s5 = scalar_lea.vmem %s614_s7, 16  ;;  %s4524_s8 = scalar_lea.vmem %s614_s7, 32 }
 0x11c   : > { %p4518_p8 = scmp.ne.s32.totalorder %s614_s7, %s4517_s5  ;;  %p4525_p11 = scmp.lt.s32.totalorder %s614_s7, %s614_s7 }
 0x11d   : > { %p4526_p12 = scmp.lt.s32.totalorder %s4524_s8, %s4517_s5 }
 0x11e   : > { %p4520_p9 = pnand %p4518_p8, %p5060_p7 }
 0x11f   : > { %p4527_p13 = por %p4526_p12, %p4525_p11 }
 0x120   : > { %p4521_p10 = pneg %p4520_p9 }
 0x122   : > { %p4528_p0 = pnand %p4527_p13, %p4521_p10 }
 0x124   : > { %4531 = shalt.err (!%p4528_p0)
}
 0x125   : > { %3956 = dma.hbm_to_vmem [thread:$0]  (!%p5044_p5), %s5837_s23, 16, %s614_s7, [#allocation3]  }
 0x126   : > { %s4874_s27 = smov [#allocation6]   ;;  %s5838_s26 = sld [smem:[#allocation53_spill]] }
 0x127   : > { %s634_s29 = sshll.u32 %s4874_s27, 4  ;;  %s635_s29 = int_to_ptr.vmem [resolvable:$true] %s634_s29 }
 0x12c   : > { %s4532_s4 = scalar_lea.hbm %s5838_s26, 3072 }
 0x12d   : > { %p4533_p1 = scmp.ne.s32.totalorder %s5838_s26, %s4532_s4  ;;  %p4539_p3 = scmp.lt.u32.totalorder %s4532_s4, %s5838_s26 }
 0x12f   : > { %p4535_p4 = pnand %p4533_p1, %p5060_p7 }
 0x131   : > { %p4536_p2 = pneg %p4535_p4 }
 0x133   : > { %p4541_p6 = pnand %p4539_p3, %p4536_p2 }
 0x135   : > { %4544 = shalt.err (!%p4541_p6)
}
 0x136   : > { %s4545_s7 = scalar_lea.vmem %s635_s29, 3072  ;;  %p4553_p11 = scmp.lt.s32.totalorder %s635_s29, %s635_s29 }
 0x137   : > { %p4546_p8 = scmp.ne.s32.totalorder %s635_s29, %s4545_s7  ;;  %p4554_p12 = scmp.lt.s32.totalorder %s4545_s7, %s4545_s7 }
 0x139   : > { %p4548_p9 = pnand %p4546_p8, %p5060_p7  ;;  %p4555_p13 = por %p4554_p12, %p4553_p11 }
 0x13b   : > { %p4549_p10 = pneg %p4548_p9 }
 0x13d   : > { %p4556_p0 = pnand %p4555_p13, %p4549_p10 }
 0x13f   : > { %4559 = shalt.err (!%p4556_p0)
}
 0x140   : > { %s4875_s1 = smov 192   ;;  %s4876_s6 = smov 12  }
 0x141   : > { %3962 = dma.hbm_to_vmem [thread:$0]  (!%p5044_p5), %s5838_s26, 3072, %s635_s29, [#allocation5], %s4875_s1, %s4875_s1, %s4876_s6  }
 0x142   : > { %s4877_s25 = smov [#allocation9]   ;;  %s5839_s5 = sld [smem:[#allocation55_spill]] }
 0x143   : > { %s658_s24 = sshll.u32 %s4877_s25, 4  ;;  %s659_s24 = int_to_ptr.vmem [resolvable:$true] %s658_s24 }
 0x148   : > { %s5840_s8 = smov %s5839_s5  ;;  %s4560_s3 = scalar_lea.hbm %s5839_s5, 1024 }
 0x149   : > { %p4561_p1 = scmp.ne.s32.totalorder %s5840_s8, %s4560_s3  ;;  %p4567_p3 = scmp.lt.u32.totalorder %s4560_s3, %s5840_s8 }
 0x14b   : > { %p4563_p4 = pnand %p4561_p1, %p5060_p7 }
 0x14d   : > { %p4564_p2 = pneg %p4563_p4 }
 0x14f   : > { %p4569_p6 = pnand %p4567_p3, %p4564_p2 }
 0x151   : > { %4572 = shalt.err (!%p4569_p6)
}
 0x152   : > { %s4573_s29 = scalar_lea.vmem %s659_s24, 1024  ;;  %p4581_p11 = scmp.lt.s32.totalorder %s659_s24, %s659_s24 }
 0x153   : > { %p4574_p8 = scmp.ne.s32.totalorder %s659_s24, %s4573_s29  ;;  %p4582_p12 = scmp.lt.s32.totalorder %s4573_s29, %s4573_s29 }
 0x155   : > { %p4576_p9 = pnand %p4574_p8, %p5060_p7  ;;  %p4583_p13 = por %p4582_p12, %p4581_p11 }
 0x157   : > { %p4577_p10 = pneg %p4576_p9 }
 0x159   : > { %p4584_p0 = pnand %p4583_p13, %p4577_p10 }
 0x15b   : > { %4587 = shalt.err (!%p4584_p0)
}
 0x15c   : > { %s4878_s9 = smov 64   ;;  %s4879_s1 = smov 4  }
 0x15d   : > { %3968 = dma.hbm_to_vmem [thread:$0]  (!%p5044_p5), %s5840_s8, 1024, %s659_s24, [#allocation8], %s4878_s9, %s4878_s9, %s4879_s1  }
 0x15e   : > { %s4880_s3 = smov [#allocation12]   ;;  %s4881_s2 = smov [#allocation15]  }
 0x15f   : > { %s683_s6 = sshll.u32 %s4880_s3, 4  ;;  %s704_s27 = sshll.u32 %s4881_s2, 4  ;;  %s684_s6 = int_to_ptr.vmem [resolvable:$true] %s683_s6  ;;  %s705_s27 = int_to_ptr.vmem [resolvable:$true] %s704_s27 }
 0x160   : > { %s4588_s28 = scalar_lea.hbm %s5781_s10, 16 }
 0x161   : > { %p4589_p1 = scmp.ne.s32.totalorder %s5781_s10, %s4588_s28  ;;  %p4595_p3 = scmp.lt.u32.totalorder %s4588_s28, %s5781_s10 }
 0x163   : > { %p4591_p4 = pnand %p4589_p1, %p5060_p7 }
 0x165   : > { %p4592_p2 = pneg %p4591_p4 }
 0x167   : > { %p4597_p6 = pnand %p4595_p3, %p4592_p2 }
 0x169   : > { %4600 = shalt.err (!%p4597_p6)
}
 0x16a   : > { %s4601_s24 = scalar_lea.vmem %s684_s6, 16  ;;  %s4608_s11 = scalar_lea.vmem %s684_s6, 32 }
 0x16b   : > { %p4602_p8 = scmp.ne.s32.totalorder %s684_s6, %s4601_s24  ;;  %p4609_p11 = scmp.lt.s32.totalorder %s684_s6, %s684_s6 }
 0x16c   : > { %p4610_p12 = scmp.lt.s32.totalorder %s4608_s11, %s4601_s24 }
 0x16d   : > { %p4604_p9 = pnand %p4602_p8, %p5060_p7 }
 0x16e   : > { %p4611_p13 = por %p4610_p12, %p4609_p11 }
 0x16f   : > { %p4605_p10 = pneg %p4604_p9 }
 0x171   : > { %p4612_p0 = pnand %p4611_p13, %p4605_p10 }
 0x173   : > { %4615 = shalt.err (!%p4612_p0)
}
 0x174   : > { %3974 = dma.hbm_to_vmem [thread:$0]  (!%p5044_p5), %s5781_s10, 16, %s684_s6, [#allocation11]  }
 0x175   : > { %s4616_s25 = scalar_lea.hbm %s5783_s12, 1024 }
 0x176   : > { %p4617_p1 = scmp.ne.s32.totalorder %s5783_s12, %s4616_s25  ;;  %p4623_p3 = scmp.lt.u32.totalorder %s4616_s25, %s5783_s12 }
 0x178   : > { %p4619_p4 = pnand %p4617_p1, %p5060_p7 }
 0x17a   : > { %p4620_p2 = pneg %p4619_p4 }
 0x17c   : > { %p4625_p6 = pnand %p4623_p3, %p4620_p2 }
 0x17e   : > { %4628 = shalt.err (!%p4625_p6)
}
 0x17f   : > { %s4629_s29 = scalar_lea.vmem %s705_s27, 1024  ;;  %p4637_p11 = scmp.lt.s32.totalorder %s705_s27, %s705_s27 }
 0x180   : > { %p4630_p8 = scmp.ne.s32.totalorder %s705_s27, %s4629_s29  ;;  %p4638_p12 = scmp.lt.s32.totalorder %s4629_s29, %s4629_s29 }
 0x182   : > { %p4632_p9 = pnand %p4630_p8, %p5060_p7  ;;  %p4639_p13 = por %p4638_p12, %p4637_p11 }
 0x184   : > { %p4633_p10 = pneg %p4632_p9 }
 0x186   : > { %p4640_p0 = pnand %p4639_p13, %p4633_p10 }
 0x188   : > { %4643 = shalt.err (!%p4640_p0)
}
 0x189   : > { %3980 = dma.hbm_to_vmem [thread:$0]  (!%p5044_p5), %s5783_s12, 1024, %s705_s27, [#allocation14], %s4878_s9, %s4878_s9, %s4879_s1  }
 0x18a   : > { %s4882_s11 = smov [#allocation18]   ;;  %s4644_s2 = scalar_lea.hbm %s5785_s14, 2048 }
 0x18b   : > { %s728_s13 = sshll.u32 %s4882_s11, 4  ;;  %p4645_p1 = scmp.ne.s32.totalorder %s5785_s14, %s4644_s2  ;;  %s729_s13 = int_to_ptr.vmem [resolvable:$true] %s728_s13 }
 0x18c   : > { %p4651_p3 = scmp.lt.u32.totalorder %s4644_s2, %s5785_s14 }
 0x18d   : > { %p4647_p4 = pnand %p4645_p1, %p5060_p7 }
 0x18f   : > { %p4648_p2 = pneg %p4647_p4 }
 0x191   : > { %p4653_p6 = pnand %p4651_p3, %p4648_p2 }
 0x193   : > { %4656 = shalt.err (!%p4653_p6)
}
 0x194   : > { %s4657_s27 = scalar_lea.vmem %s729_s13, 2048  ;;  %p4665_p11 = scmp.lt.s32.totalorder %s729_s13, %s729_s13 }
 0x195   : > { %p4658_p8 = scmp.ne.s32.totalorder %s729_s13, %s4657_s27  ;;  %p4666_p12 = scmp.lt.s32.totalorder %s4657_s27, %s4657_s27 }
 0x197   : > { %p4660_p9 = pnand %p4658_p8, %p5060_p7  ;;  %p4667_p13 = por %p4666_p12, %p4665_p11 }
 0x199   : > { %p4661_p10 = pneg %p4660_p9 }
 0x19b   : > { %p4668_p0 = pnand %p4667_p13, %p4661_p10 }
 0x19d   : > { %4671 = shalt.err (!%p4668_p0)
}
 0x19e   : > { %s4883_s7 = smov 128   ;;  %s4884_s29 = smov 8  }
 0x19f   : > { %3986 = dma.hbm_to_vmem [thread:$0]  (!%p5044_p5), %s5785_s14, 2048, %s729_s13, [#allocation17], %s4883_s7, %s4883_s7, %s4884_s29  }
 0x1a0   : > { %s4885_s11 = smov [#allocation21]   ;;  %s4886_s15 = smov [#allocation24]  }
 0x1a1   : > { %s752_s3 = sshll.u32 %s4885_s11, 4  ;;  %s777_s2 = sshll.u32 %s4886_s15, 4  ;;  %s753_s3 = int_to_ptr.vmem [resolvable:$true] %s752_s3  ;;  %s5361_s2 = int_to_ptr.vmem [resolvable:$true] %s777_s2 }
 0x1a2   : > { %s4672_s28 = scalar_lea.hbm %s5787_s16, 1024 }
 0x1a3   : > { %p4673_p1 = scmp.ne.s32.totalorder %s5787_s16, %s4672_s28  ;;  %p4679_p3 = scmp.lt.u32.totalorder %s4672_s28, %s5787_s16 }
 0x1a5   : > { %p4675_p4 = pnand %p4673_p1, %p5060_p7 }
 0x1a7   : > { %p4676_p2 = pneg %p4675_p4 }
 0x1a9   : > { %p4681_p6 = pnand %p4679_p3, %p4676_p2 }
 0x1ab   : > { %4684 = shalt.err (!%p4681_p6)
}
 0x1ac   : > { %s4685_s24 = scalar_lea.vmem %s753_s3, 1024  ;;  %p4693_p11 = scmp.lt.s32.totalorder %s753_s3, %s753_s3 }
 0x1ad   : > { %p4686_p8 = scmp.ne.s32.totalorder %s753_s3, %s4685_s24  ;;  %p4694_p12 = scmp.lt.s32.totalorder %s4685_s24, %s4685_s24 }
 0x1af   : > { %p4688_p9 = pnand %p4686_p8, %p5060_p7  ;;  %p4695_p13 = por %p4694_p12, %p4693_p11 }
 0x1b1   : > { %p4689_p10 = pneg %p4688_p9 }
 0x1b3   : > { %p4696_p0 = pnand %p4695_p13, %p4689_p10 }
 0x1b5   : > { %4699 = shalt.err (!%p4696_p0)
}
 0x1b6   : > { %3992 = dma.hbm_to_vmem [thread:$0]  (!%p5044_p5), %s5787_s16, 1024, %s753_s3, [#allocation20], %s4878_s9, %s4878_s9, %s4879_s1  }
 0x1b7   : > { %s4700_s28 = scalar_lea.hbm %s5789_s18, 16 }
 0x1b8   : > { %p4701_p1 = scmp.ne.s32.totalorder %s5789_s18, %s4700_s28  ;;  %p4707_p3 = scmp.lt.u32.totalorder %s4700_s28, %s5789_s18 }
 0x1ba   : > { %p4703_p4 = pnand %p4701_p1, %p5060_p7 }
 0x1bc   : > { %p4704_p2 = pneg %p4703_p4 }
 0x1be   : > { %p4709_p6 = pnand %p4707_p3, %p4704_p2 }
 0x1c0   : > { %4712 = shalt.err (!%p4709_p6)
}
 0x1c1   : > { %s4713_s3 = scalar_lea.vmem %s5361_s2, 16  ;;  %s4720_s24 = scalar_lea.vmem %s5361_s2, 32 }
 0x1c2   : > { %p4714_p8 = scmp.ne.s32.totalorder %s5361_s2, %s4713_s3  ;;  %p4721_p11 = scmp.lt.s32.totalorder %s5361_s2, %s5361_s2 }
 0x1c3   : > { %p4722_p12 = scmp.lt.s32.totalorder %s4720_s24, %s4713_s3 }
 0x1c4   : > { %p4716_p9 = pnand %p4714_p8, %p5060_p7 }
 0x1c5   : > { %p4723_p13 = por %p4722_p12, %p4721_p11 }
 0x1c6   : > { %p4717_p10 = pneg %p4716_p9 }
 0x1c8   : > { %p4724_p0 = pnand %p4723_p13, %p4717_p10 }
 0x1ca   : > { %4727 = shalt.err (!%p4724_p0)
}
 0x1cb   : > { %3998 = dma.hbm_to_vmem [thread:$0]  (!%p5044_p5), %s5789_s18, 16, %s5361_s2, [#allocation23]  }
 0x1cc   : > { %s4887_s25 = smov [#allocation27]   ;;  %s4888_s28 = smov [#allocation30]  }
 0x1cd   : > { %s798_s4 = sshll.u32 %s4887_s25, 4  ;;  %s822_s5 = sshll.u32 %s4888_s28, 4  ;;  %s799_s4 = int_to_ptr.vmem [resolvable:$true] %s798_s4  ;;  %s5408_s5 = int_to_ptr.vmem [resolvable:$true] %s822_s5 }
 0x1ce   : > { %s4728_s13 = scalar_lea.hbm %s5791_s20, 2048 }
 0x1cf   : > { %p4729_p1 = scmp.ne.s32.totalorder %s5791_s20, %s4728_s13  ;;  %p4735_p3 = scmp.lt.u32.totalorder %s4728_s13, %s5791_s20 }
 0x1d1   : > { %p4731_p4 = pnand %p4729_p1, %p5060_p7 }
 0x1d3   : > { %p4732_p2 = pneg %p4731_p4 }
 0x1d5   : > { %p4737_p6 = pnand %p4735_p3, %p4732_p2 }
 0x1d7   : > { %4740 = shalt.err (!%p4737_p6)
}
 0x1d8   : > { %s4741_s15 = scalar_lea.vmem %s799_s4, 2048  ;;  %p4749_p11 = scmp.lt.s32.totalorder %s799_s4, %s799_s4 }
 0x1d9   : > { %p4742_p8 = scmp.ne.s32.totalorder %s799_s4, %s4741_s15  ;;  %p4750_p12 = scmp.lt.s32.totalorder %s4741_s15, %s4741_s15 }
 0x1db   : > { %p4744_p9 = pnand %p4742_p8, %p5060_p7  ;;  %p4751_p13 = por %p4750_p12, %p4749_p11 }
 0x1dd   : > { %p4745_p10 = pneg %p4744_p9 }
 0x1df   : > { %p4752_p0 = pnand %p4751_p13, %p4745_p10 }
 0x1e1   : > { %4755 = shalt.err (!%p4752_p0)
}
 0x1e2   : > { %4004 = dma.hbm_to_vmem [thread:$0]  (!%p5044_p5), %s5791_s20, 2048, %s799_s4, [#allocation26], %s4883_s7, %s4883_s7, %s4884_s29  }
 0x1e3   : > { %s4756_s13 = scalar_lea.hbm %s5793_s22, 2048 }
 0x1e4   : > { %p4757_p1 = scmp.ne.s32.totalorder %s5793_s22, %s4756_s13  ;;  %p4763_p3 = scmp.lt.u32.totalorder %s4756_s13, %s5793_s22 }
 0x1e6   : > { %p4759_p4 = pnand %p4757_p1, %p5060_p7 }
 0x1e8   : > { %p4760_p2 = pneg %p4759_p4 }
 0x1ea   : > { %p4765_p6 = pnand %p4763_p3, %p4760_p2 }
 0x1ec   : > { %4768 = shalt.err (!%p4765_p6)
}
 0x1ed   : > { %s4769_s7 = scalar_lea.vmem %s5408_s5, 2048  ;;  %p4777_p11 = scmp.lt.s32.totalorder %s5408_s5, %s5408_s5 }
 0x1ee   : > { %p4770_p8 = scmp.ne.s32.totalorder %s5408_s5, %s4769_s7  ;;  %p4778_p12 = scmp.lt.s32.totalorder %s4769_s7, %s4769_s7 }
 0x1f0   : > { %p4772_p9 = pnand %p4770_p8, %p5060_p7  ;;  %p4779_p13 = por %p4778_p12, %p4777_p11 }
 0x1f2   : > { %p4773_p10 = pneg %p4772_p9 }
 0x1f4   : > { %p4780_p0 = pnand %p4779_p13, %p4773_p10 }
 0x1f6   : > { %4783 = shalt.err (!%p4780_p0)
}
 0x1f7   : > { %4010 = dma.hbm_to_vmem [thread:$0]  (!%p5044_p5), %s5793_s22, 2048, %s5408_s5, [#allocation29], %s4878_s9, %s4878_s9, %s4879_s1  }
 0x1f8   : > { %s4889_s15 = smov [#allocation31]   ;;  %s5841_s6 = sld [smem:[#allocation60_spill]] }
 0x1f9   : > { %s836_s25 = sshll.u32 %s4889_s15, 4  ;;  %s837_s25 = int_to_ptr.vmem [resolvable:$true] %s836_s25 }
 0x1fe   : > { %s4784_s13 = scalar_lea.hbm %s5841_s6, 16 }
 0x1ff   : > { %p4785_p1 = scmp.ne.s32.totalorder %s5841_s6, %s4784_s13  ;;  %p4791_p3 = scmp.lt.u32.totalorder %s4784_s13, %s5841_s6 }
 0x201   : > { %p4787_p4 = pnand %p4785_p1, %p5060_p7 }
 0x203   : > { %p4788_p2 = pneg %p4787_p4 }
 0x205   : > { %p4793_p6 = pnand %p4791_p3, %p4788_p2 }
 0x207   : > { %4796 = shalt.err (!%p4793_p6)
}
 0x208   : > { %s4797_s9 = scalar_lea.vmem %s837_s25, 16  ;;  %s4804_s1 = scalar_lea.vmem %s837_s25, 32 }
 0x209   : > { %p4798_p8 = scmp.ne.s32.totalorder %s837_s25, %s4797_s9  ;;  %p4805_p11 = scmp.lt.s32.totalorder %s837_s25, %s837_s25 }
 0x20a   : > { %p4806_p12 = scmp.lt.s32.totalorder %s4804_s1, %s4797_s9 }
 0x20b   : > { %p4800_p9 = pnand %p4798_p8, %p5060_p7 }
 0x20c   : > { %p4807_p13 = por %p4806_p12, %p4805_p11 }
 0x20d   : > { %p4801_p10 = pneg %p4800_p9 }
 0x20f   : > { %p4808_p0 = pnand %p4807_p13, %p4801_p10 }
 0x211   : > { %4811 = shalt.err (!%p4808_p0)
}
 0x212   : > { %4013 = dma.hbm_to_vmem [thread:$0]  (!%p5044_p5), %s5841_s6, 16, %s837_s25, [#allocation32]  }
 0x213   : > { %s5842_s29 = sld [smem:[#allocation46_spill]] }
 0x219   : > { %p5843_p1 = scmp.ne.s32.totalorder %s5842_s29, 0 }
 0x21a   : > { %s5844_s4 = sld [smem:[#allocation45_spill]] (!%p5843_p1) }
 0x21b   : > { %877 = sbr.rel (%p5843_p1) target bundleno = 4896 (0x1320), region = 116 }
 0x220   : > { %p5845_p4 = scmp.eq.s32.totalorder (!%p5843_p1), %s5844_s4, 0 }
 0x222   : > { %4817 = dma.done.wait (%p5845_p4), [#allocation3], 16   ;;  %p5846_p7 = pmov %p5845_p4 }
 0x223   : > { %p5847_p2 = pmov %p5845_p4 }
 0x224   : > { %4819 = vsyncadd (%p5846_p7), [#allocation3], 4294967280 }
 0x225   : > { %4821 = dma.done.wait (%p5847_p2), [#allocation5], 3088   ;;  %p5848_p3 = pmov %p5847_p2 }
 0x226   : > { %p5849_p6 = pmov %p5847_p2 }
 0x227   : > { %4823 = vsyncadd (%p5848_p3), [#allocation5], 4294964208 }
 0x228   : > { %4825 = dma.done.wait (%p5849_p6), [#allocation8], 1072   ;;  %p5850_p5 = pmov %p5847_p2 }
 0x229   : > { %p5851_p8 = pmov %p5847_p2 }
 0x22a   : > { %4827 = vsyncadd (%p5850_p5), [#allocation8], 4294966224 }
 0x22b   : > { %4829 = dma.done.wait (%p5851_p8), [#allocation11], 32   ;;  %p5852_p9 = pmov %p5847_p2 }
 0x22c   : > { %p5853_p10 = pmov %p5847_p2 }
 0x22d   : > { %4831 = vsyncadd (%p5852_p9), [#allocation11], 4294967264 }
 0x22e   : > { %4833 = dma.done.wait (%p5853_p10), [#allocation14], 1040   ;;  %p5854_p11 = pmov %p5847_p2 }
 0x22f   : > { %p5855_p12 = pmov %p5847_p2 }
 0x230   : > { %4835 = vsyncadd (%p5854_p11), [#allocation14], 4294966256 }
 0x231   : > { %4837 = dma.done.wait (%p5855_p12), [#allocation17], 2064   ;;  %p5856_p13 = pmov %p5847_p2 }
 0x232   : > { %p5857_p0 = pmov %p5847_p2 }
 0x233   : > { %4839 = vsyncadd (%p5856_p13), [#allocation17], 4294965232 }
 0x234   : > { %4841 = dma.done.wait (%p5857_p0), [#allocation20], 1056   ;;  %p5858_p1 = pmov %p5857_p0 }
 0x235   : > { %p5859_p4 = pmov %p5857_p0 }
 0x236   : > { %4843 = vsyncadd (%p5858_p1), [#allocation20], 4294966240 }
 0x237   : > { %4845 = dma.done.wait (%p5859_p4), [#allocation23], 32   ;;  %p5860_p7 = pmov %p5857_p0 }
 0x238   : > { %p5861_p2 = pmov %p5857_p0 }
 0x239   : > { %4847 = vsyncadd (%p5860_p7), [#allocation23], 4294967264 }
 0x23a   : > { %4849 = dma.done.wait (%p5861_p2), [#allocation26], 2064   ;;  %p5862_p3 = pmov %p5857_p0 }
 0x23b   : > { %p5863_p6 = pmov %p5857_p0 }
 0x23c   : > { %4851 = vsyncadd (%p5862_p3), [#allocation26], 4294965232 }
 0x23d   : > { %4853 = dma.done.wait (%p5863_p6), [#allocation29], 2080   ;;  %p5864_p5 = pmov %p5857_p0 }
 0x23e   : > { %p5865_p8 = pmov %p5857_p0 }
 0x23f   : > { %4855 = vsyncadd (%p5864_p5), [#allocation29], 4294965216 }
 0x240   : > { %4857 = dma.done.wait (%p5865_p8), [#allocation32], 16   ;;  %p5866_p9 = pmov %p5857_p0 }
 0x241   : > { %p1029_p10 = scmp.lt.s32.totalorder %s5844_s4, 1  ;;  %s5867_s25 = sld [smem:[#allocation47_spill]]  ;;  %v4094_v1 = vld [vmem:[#allocation6 + $0x4] ss:$12 sps:$4 sm:$0xff]   ;;  %v4096_v2 = vld [vmem:[#allocation6] ss:$12 sps:$4 sm:$0xff]   ;;  %v1118_v41 = vlaneseq }
 0x242   : > { %4859 = vsyncadd (%p5866_p9), [#allocation32], 4294967280  ;;  %v4890_v3 = vmov 0.0   ;;  %v4097_v4 = vld [vmem:[#allocation6 + $0x8] ss:$12 sps:$4 sm:$0xff]   ;;  %1261 = vmatprep.subr.bf16.mxu0 %v4094_v1  ;;  %v4891_v25 = vmov 0  }
 0x243   : > { %s5876_s4 = smov (!%p1029_p10, %s5844_s4), 1  ;;  %3697 = vmatprep.subr.bf16.mxu1 %v4890_v3  ;;  %v4098_v5 = vld [vmem:[#allocation6 + $0x1c] ss:$12 sps:$4 sm:$0xff]   ;;  %v4100_v6 = vld [vmem:[#allocation6 + $0x18] ss:$12 sps:$4 sm:$0xff]   ;;  %1262 = vmatpush1.bf16.msra.mxu0 %v4096_v2  ;;  %vm4892_vm0 = vmmov 0  }
 0x244   : > { %s5526_s30 = sshll.u32 %s5876_s4, 3  ;;  %v4101_v7 = vld [vmem:[#allocation6 + $0x20] ss:$12 sps:$4 sm:$0xff]   ;;  %3698 = vmatpush3.bf16.msra.mxu1 %v4097_v4  ;;  %1263 = vmatprep.subr.bf16.mxu0 %v4098_v5  ;;  %v4104_v13 = vld [vmem:[#allocation6 + $0x30] ss:$12 sps:$4 sm:$0xff]   ;;  %v1119_v42 = vshrl.u32 %v1118_v41, 7 }
 0x245   : > { %v4102_v8 = vld [vmem:[#allocation6 + $0x34] ss:$12 sps:$4 sm:$0xff]   ;;  %3699 = vmatprep.subr.bf16.mxu1 %v4890_v3  ;;  %v4105_v14 = vld [vmem:[#allocation6 + $0x38] ss:$12 sps:$4 sm:$0xff]   ;;  %v4109_v17 = vld [vmem:[#allocation6 + $0x50] ss:$12 sps:$4 sm:$0xff]   ;;  %1293 = vmatprep.mubr.bf16.mxu0 %v4891_v25 }
 0x246   : > { %v4106_v15 = vld [vmem:[#allocation6 + $0x4c] ss:$12 sps:$4 sm:$0xff]   ;;  %v4108_v16 = vld [vmem:[#allocation6 + $0x48] ss:$12 sps:$4 sm:$0xff]   ;;  %v4110_v18 = vld [vmem:[#allocation6 + $0x64] ss:$12 sps:$4 sm:$0xff]   ;;  %3713 = vmatprep.mubr.msk.bf16.mxu1 %vm4892_vm0, %v4890_v3 }
 0x247   : > { %s1032_s28 = scalar_lea.vmem %s5867_s25, %s5526_s30  ;;  %1264 = vmatpush1.bf16.msra.mxu0 %v4100_v6  ;;  %v4112_v19 = vld [vmem:[#allocation6 + $0x60] ss:$12 sps:$4 sm:$0xff]   ;;  %v4113_v20 = vld [vmem:[#allocation6 + $0x68] ss:$12 sps:$4 sm:$0xff]   ;;  %v4116_v22 = vld [vmem:[#allocation6 + $0x78] ss:$12 sps:$4 sm:$0xff]  }
 0x248   : > { %v5532_v0 = vld [vmem:[%s1032_s28] sm:$0xff]  ;;  %3700 = vmatpush3.bf16.msra.mxu1 %v4101_v7  ;;  %1265 = vmatprep.subr.bf16.mxu0 %v4102_v8  ;;  %v4121_v27 = vld [vmem:[#allocation6 + $0x98] ss:$12 sps:$4 sm:$0xff]   ;;  %v4124_v29 = vld [vmem:[#allocation6 + $0xa8] ss:$12 sps:$4 sm:$0xff]   ;;  %v1128_v43 = vsub.s32 2, %v1119_v42 }
 0x249   : > { %1057 = vadd.xlane.f32.xlu0 %v5532_v0  ;;  %3701 = vmatprep.subr.bf16.mxu1 %v4890_v3  ;;  %v4114_v21 = vld [vmem:[#allocation6 + $0x7c] ss:$12 sps:$4 sm:$0xff]   ;;  %v4117_v23 = vld [vmem:[#allocation6 + $0x80] ss:$12 sps:$4 sm:$0xff]   ;;  %v5553_v45 = vsub.s32 1, %v1119_v42  ;;  %v5555_v46 = vsub.s32 0, %v1119_v42 }
 0x24a   : > { %v4118_v24 = vld [vmem:[#allocation6 + $0x94] ss:$12 sps:$4 sm:$0xff]   ;;  %v4120_v26 = vld [vmem:[#allocation6 + $0x90] ss:$12 sps:$4 sm:$0xff]   ;;  %v4122_v28 = vld [vmem:[#allocation6 + $0xac] ss:$12 sps:$4 sm:$0xff]  }
 0x24b   : > { %1266 = vmatpush1.bf16.msra.mxu0 %v4104_v13  ;;  %v4125_v30 = vld [vmem:[#allocation6 + $0xb0] ss:$12 sps:$4 sm:$0xff]   ;;  %v1116_v44 = vld [vmem:[#allocation7] sm:$0x7]  ;;  %vm1614_vm1 = vcmask 1043456   ;;  %vm1366_vm2 = vcmask 261120  }
 0x24c   : > { %3702 = vmatpush3.bf16.msra.mxu1 %v4105_v14  ;;  %1267 = vmatprep.subr.bf16.mxu0 %v4106_v15  ;;  %v3482_v35 = vld [vmem:[#allocation2] ss:$0 sm:$0xff]  ;;  %v3483_v37 = vld [vmem:[#allocation4] ss:$0 sm:$0xff]  ;;  %v1129_v47 = vrot.slane %v1116_v44, %v1128_v43  ;;  %v1125_v48 = vrot.slane %v1116_v44, %v5553_v45  ;;  %v1121_v51 = vrot.slane %v1116_v44, %v5555_v46  ;;  %s4893_s27 = smov 64   ;;  %s4894_s13 = smov 96  }
 0x24d   : > { %3703 = vmatprep.subr.bf16.mxu1 %v4890_v3  ;;  %s4895_s3 = smov 32   ;;  %s5868_s2 = sld [smem:[#allocation49_spill]]  ;;  %vm1562_vm4 = vcmask 64512   ;;  %vm1809_vm5 = vcmask 523264   ;;  %vm1811_vm6 = vcmask 785408   ;;  %vm2444_vm9 = vcmask 130048  }
 0x24e   : > { %s3606_s1 = sshll.u32 %s5876_s4, 4  ;;  %s5869_s29 = sld [smem:[#allocation48_spill]] }
 0x24f   : > { %1268 = vmatpush1.bf16.msra.mxu0 %v4108_v16  ;;  %s5870_s28 = sld [smem:[#allocation50_spill]] }
 0x250   : > { %3704 = vmatpush3.bf16.msra.mxu1 %v4109_v17  ;;  %1269 = vmatprep.subr.bf16.mxu0 %v4110_v18 }
 0x251   : > { %3705 = vmatprep.subr.bf16.mxu1 %v4890_v3 }
 0x253   : > { %1270 = vmatpush1.bf16.msra.mxu0 %v4112_v19  ;;  %s1041_s9 = scalar_lea.vmem %s5868_s2, %s5526_s30 }
 0x254   : > { %3706 = vmatpush3.bf16.msra.mxu1 %v4113_v20  ;;  %1271 = vmatprep.subr.bf16.mxu0 %v4114_v21  ;;  %v1053_v13 = vld [vmem:[%s1041_s9] sm:$0xff]  ;;  %s1037_s0 = scalar_lea.vmem %s5869_s29, %s3606_s1 }
 0x255   : > { %3707 = vmatprep.subr.bf16.mxu1 %v4890_v3  ;;  %vm1555_vm3 = vcmp.gt.f32.partialorder %v1053_v13, 0.0  ;;  %s1044_s24 = scalar_lea.vmem %s5870_s28, %s5876_s4 }
 0x257   : > { %1272 = vmatpush1.bf16.msra.mxu0 %v4116_v22 }
 0x258   : > { %3708 = vmatpush3.bf16.msra.mxu1 %v4117_v23  ;;  %1273 = vmatprep.subr.bf16.mxu0 %v4118_v24 }
 0x259   : > { %3709 = vmatprep.subr.bf16.mxu1 %v4890_v3 }
 0x25b   : > { %1274 = vmatpush1.bf16.msra.mxu0 %v4120_v26 }
 0x25c   : > { %3710 = vmatpush3.bf16.msra.mxu1 %v4121_v27  ;;  %1275 = vmatprep.subr.bf16.mxu0 %v4122_v28 }
 0x25d   : > { %3711 = vmatprep.subr.bf16.mxu1 %v4890_v3 }
 0x25f   : > { %1276 = vmatpush1.bf16.msra.mxu0 %v4124_v29 }
 0x260   : > { %3712 = vmatpush3.bf16.msra.mxu1 %v4125_v30  ;;  %3741 = vmatprep.subr.bf16.mxu0 %v4890_v3 }
 0x261   : > { %3717 = vmatprep.subr.bf16.mxu1 %v4890_v3 }
 0x2d6   : > { %v1058_v9 = vpop.xlane.xlu0 %1057 }
 0x2d7   : > { %v1060_v10 = vmul.f32 0.0078125, %v1058_v9 }
 0x2d9   : > { %v1061_v11 = vsub.f32 %v5532_v0, %v1060_v10 }
 0x2db   : > { %v1062_v12 = vmul.f32 %v1061_v11, %v1061_v11 }
 0x2dd   : > { %1063 = vadd.xlane.f32.xlu0 %v1062_v12 }
 0x36a   : > { %v1064_v31 = vpop.xlane.xlu0 %1063 }
 0x36b   : > { %v1065_v32 = vmul.f32 0.0078125, %v1064_v31 }
 0x36d   : > { %v1066_v33 = vadd.f32 1e-05, %v1065_v32 }
 0x36f   : > { %4214 = vrsqrt.f32 %v1066_v33 }
 0x379   : > { %v4215_v34 = vpop.eup %4214 }
 0x37a   : > { %v1068_v36 = vmul.f32 %v4215_v34, %v1061_v11 }
 0x37c   : > { %v1075_v38 = vmul.f32 %v3482_v35, %v1068_v36 }
 0x37e   : > { %v1082_v39 = vadd.f32 %v3483_v37, %v1075_v38 }
 0x380   : > { %v1083_v40 = vpack.c.bf16 %v1082_v39, %v1082_v39 }
 0x382   : > { %1294 = vmatmul.mubr.bf16.vlgmr.msra.gmra.mrb[0].mxu0 %v1083_v40  ;;  %3714 = vmatmul.mubr.bf16.vlgmr.msra.gmra.mrb[0].mxu1 %v1083_v40 }
 0x383   : > { %3719 = vmatprep.mubr.msk.bf16.mxu1 %vm4892_vm0, %v4890_v3  ;;  %3743 = vmatprep.mubr.msk.bf16.mxu0 %vm4892_vm0, %v4890_v3 }
 0x455   : > { %v1295_v49 = vpop.f32.mrb[0].mxu0  ;;  %v1336_v50 = vpop.f32.mrb[0].mxu1 }
 0x456   : > { %v1337_v52 = vadd.f32 %v1336_v50, %v1129_v47  ;;  %v1297_v53 = vpop.f32.mrb[1].mxu0  ;;  %v3715_v54 = vpop.f32.mrb[1].mxu1  ;;  %v1296_v62 = vadd.f32 %v1295_v49, %v1121_v51 }
 0x457   : > { %v1298_v55 = vadd.f32 %v1297_v53, %v1125_v48  ;;  %v1299_v56 = vpop.f32.mrb[2].mxu0  ;;  %v1339_v57 = vpop.f32.mrb[2].mxu1 }
 0x458   : > { %v5559_v58 = vpack.c.bf16 %v1337_v52, %v1337_v52  ;;  %v1300_v59 = vpop.f32.mrb[3].mxu0  ;;  %v3716_v60 = vpop.f32.mrb[3].mxu1  ;;  %v1342_v2 = vpack.c.bf16 %v1296_v62, %v1296_v62 }
 0x459   : > { %v1350_v61 = vpack.c.bf16 %v1298_v55, %v1298_v55 }
 0x45a   : > { %v1616_v63 = vsel %vm1614_vm1, %v5559_v58, 0 }
 0x45b   : > { %3742 = vmatpush3.bf16.msra.mxu0 %v1616_v63  ;;  %1354 = vrot.lane.b32.xlu0 %v1350_v61, %s4893_s27  ;;  %v1371_v1 = vsel %vm1366_vm2, %v1350_v61, 0 }
 0x45c   : > { %1352 = vrot.lane.b32.xlu1 %v1350_v61, %s4894_s13  ;;  %3718 = vmatpush3.bf16.xpose.msra.mxu1 %v1371_v1 }
 0x45d   : > { %3723 = vmatprep.subr.bf16.mxu1 %v4890_v3  ;;  %3753 = vmatprep.subr.bf16.mxu0 %v4890_v3 }
 0x460   : > { %1344 = vrot.lane.b32.xlu1 %v1342_v2, %s4894_s13 }
 0x463   : > { %3720 = vmatmul.mubr.msk.bf16.vlgmr.msra.gmra.mrb[4].mxu1 %vm1366_vm2, %v1342_v2 }
 0x464   : > { %1346 = vrot.lane.b32.xlu1 %v1342_v2, %s4893_s27  ;;  %3725 = vmatprep.mubr.msk.bf16.mxu1 %vm4892_vm0, %v4890_v3 }
 0x468   : > { %1356 = vrot.lane.b32.xlu1 %v1350_v61, %s4895_s3 }
 0x46c   : > { %1348 = vrot.lane.b32.xlu1 %v1342_v2, %s4895_s3 }
 0x4cd   : > { %v1355_v7 = vpop.permute.xlu0 %1354 }
 0x4ce   : > { %v1353_v4 = vpop.permute.xlu1 %1352  ;;  %v1463_v9 = vsel %vm1366_vm2, %v1355_v7, 0 }
 0x4cf   : > { %v1417_v5 = vsel %vm1366_vm2, %v1353_v4, 0 }
 0x4d0   : > { %3724 = vmatpush3.bf16.xpose.msra.mxu1 %v1417_v5 }
 0x4d1   : > { %3729 = vmatprep.subr.bf16.mxu1 %v4890_v3 }
 0x4d2   : > { %v1345_v6 = vpop.permute.xlu1 %1344 }
 0x4d6   : > { %v1347_v8 = vpop.permute.xlu1 %1346 }
 0x4d7   : > { %3726 = vmatmul.mubr.msk.bf16.vlgmr.msra.gmra.mrb[8].mxu1 %vm1366_vm2, %v1345_v6 }
 0x4d8   : > { %3730 = vmatpush3.bf16.xpose.msra.mxu1 %v1463_v9  ;;  %3731 = vmatprep.mubr.msk.bf16.mxu1 %vm4892_vm0, %v4890_v3 }
 0x4d9   : > { %3735 = vmatprep.subr.bf16.mxu1 %v4890_v3 }
 0x4da   : > { %v1357_v10 = vpop.permute.xlu1 %1356 }
 0x4db   : > { %v1509_v11 = vsel %vm1366_vm2, %v1357_v10, 0 }
 0x4de   : > { %v1349_v12 = vpop.permute.xlu1 %1348 }
 0x4df   : > { %3732 = vmatmul.mubr.msk.bf16.vlgmr.msra.gmra.mrb[12].mxu1 %vm1366_vm2, %v1347_v8 }
 0x4e0   : > { %3736 = vmatpush3.bf16.xpose.msra.mxu1 %v1509_v11  ;;  %3737 = vmatprep.mubr.msk.bf16.mxu1 %vm4892_vm0, %v4890_v3 }
 0x4e1   : > { %3747 = vmatprep.subr.bf16.mxu1 %v4890_v3 }
 0x4e7   : > { %3738 = vmatmul.mubr.msk.bf16.vlgmr.msra.gmra.mrb[16].mxu1 %vm1366_vm2, %v1349_v12 }
 0x4e8   : > { %3749 = vmatprep.mubr.msk.bf16.mxu1 %vm4892_vm0, %v4890_v3 }
 0x536   : > { %v1407_v14 = vpop.f32.mrb[4].mxu1 }
 0x537   : > { %v1551_v15 = vmul.f32 0.17677669, %v1407_v14  ;;  %v3721_v16 = vpop.f32.mrb[5].mxu1 }
 0x538   : > { %v1410_v17 = vpop.f32.mrb[6].mxu1 }
 0x539   : > { %v3722_v18 = vpop.f32.mrb[7].mxu1  ;;  %v1558_v19 = vsel %vm1555_vm3, %v1551_v15, -1e+09 }
 0x53a   : > { %v1563_v20 = vsel %vm1562_vm4, %v1558_v19, -inf }
 0x53b   : > { %1564 = vmax.xlane.f32.xlu1 %v1563_v20 }
 0x5aa   : > { %v1453_v21 = vpop.f32.mrb[8].mxu1 }
 0x5ab   : > { %v1552_v22 = vmul.f32 0.17677669, %v1453_v21  ;;  %v3727_v23 = vpop.f32.mrb[9].mxu1 }
 0x5ac   : > { %v1456_v24 = vpop.f32.mrb[10].mxu1 }
 0x5ad   : > { %v3728_v26 = vpop.f32.mrb[11].mxu1  ;;  %v1559_v27 = vsel %vm1555_vm3, %v1552_v22, -1e+09 }
 0x5ae   : > { %v1566_v28 = vsel %vm1562_vm4, %v1559_v27, -inf }
 0x5af   : > { %1567 = vmax.xlane.f32.xlu0 %v1566_v28 }
 0x5b2   : > { %v1499_v29 = vpop.f32.mrb[12].mxu1 }
 0x5b3   : > { %v1553_v30 = vmul.f32 0.17677669, %v1499_v29  ;;  %v3733_v31 = vpop.f32.mrb[13].mxu1 }
 0x5b4   : > { %v1502_v32 = vpop.f32.mrb[14].mxu1  ;;  %v4127_v31 = vld [vmem:[#allocation9 + $0x8] sm:$0xff]  }
 0x5b5   : > { %v3734_v33 = vpop.f32.mrb[15].mxu1  ;;  %v1560_v34 = vsel %vm1555_vm3, %v1553_v30, -1e+09  ;;  %v4126_v30 = vld [vmem:[#allocation9] sm:$0xff]  }
 0x5b6   : > { %v1569_v35 = vsel %vm1562_vm4, %v1560_v34, -inf }
 0x5b7   : > { %1570 = vmax.xlane.f32.xlu1 %v1569_v35 }
 0x5ba   : > { %v1545_v36 = vpop.f32.mrb[16].mxu1 }
 0x5bb   : > { %v1554_v37 = vmul.f32 0.17677669, %v1545_v36  ;;  %v3739_v38 = vpop.f32.mrb[17].mxu1 }
 0x5bc   : > { %v1548_v39 = vpop.f32.mrb[18].mxu1 }
 0x5bd   : > { %v3740_v40 = vpop.f32.mrb[19].mxu1  ;;  %v1561_v41 = vsel %vm1555_vm3, %v1554_v37, -1e+09  ;;  %v4129_v37 = vld [vmem:[#allocation9 + $0x18] sm:$0xff]  }
 0x5be   : > { %v1572_v42 = vsel %vm1562_vm4, %v1561_v41, -inf }
 0x5bf   : > { %1573 = vmax.xlane.f32.xlu1 %v1572_v42 }
 0x5c8   : > { %v1565_v43 = vpop.xlane.xlu1 %1564 }
 0x5c9   : > { %v1575_v44 = vsub.f32 %v1558_v19, %v1565_v43  ;;  %v4131_v43 = vld [vmem:[#allocation9 + $0x28] sm:$0xff]  }
 0x5cb   : > { %v1579_v47 = vmul.f32 1.442695, %v1575_v44  ;;  %v4132_v44 = vld [vmem:[#allocation9 + $0x30] sm:$0xff]  }
 0x5cd   : > { %4216 = vpow2.f32 %v1579_v47  ;;  %v4133_v47 = vld [vmem:[#allocation9 + $0x38] sm:$0xff]  }
 0x5d7   : > { %v4217_v48 = vpop.eup %4216 }
 0x5d8   : > { %v1587_v49 = vsel %vm1562_vm4, %v4217_v48, 0.0 }
 0x5d9   : > { %1588 = vadd.xlane.f32.xlu0 %v1587_v49 }
 0x63c   : > { %v1568_v50 = vpop.xlane.xlu0 %1567 }
 0x63d   : > { %v1576_v51 = vsub.f32 %v1559_v27, %v1568_v50 }
 0x63f   : > { %v1581_v52 = vmul.f32 1.442695, %v1576_v51 }
 0x641   : > { %4218 = vpow2.f32 %v1581_v52 }
 0x644   : > { %v1571_v53 = vpop.xlane.xlu1 %1570 }
 0x645   : > { %v1577_v54 = vsub.f32 %v1560_v34, %v1571_v53  ;;  %v4128_v34 = vld [vmem:[#allocation9 + $0x10] sm:$0xff]  }
 0x647   : > { %v1583_v55 = vmul.f32 1.442695, %v1577_v54 }
 0x649   : > { %4220 = vpow2.f32 %v1583_v55 }
 0x64b   : > { %v4219_v56 = vpop.eup %4218 }
 0x64c   : > { %v1590_v57 = vsel %vm1562_vm4, %v4219_v56, 0.0  ;;  %v1574_v62 = vpop.xlane.xlu1 %1573 }
 0x64d   : > { %1591 = vadd.xlane.f32.xlu1 %v1590_v57  ;;  %v1578_v63 = vsub.f32 %v1561_v41, %v1574_v62  ;;  %v4130_v41 = vld [vmem:[#allocation9 + $0x20] sm:$0xff]  }
 0x64f   : > { %v1585_v1 = vmul.f32 1.442695, %v1578_v63 }
 0x653   : > { %v4221_v59 = vpop.eup %4220 }
 0x654   : > { %v1593_v60 = vsel %vm1562_vm4, %v4221_v59, 0.0 }
 0x655   : > { %1594 = vadd.xlane.f32.xlu0 %v1593_v60 }
 0x65e   : > { %1362 = vrot.lane.b32.xlu1 %v5559_v58, %s4893_s27 }
 0x666   : > { %v1589_v61 = vpop.xlane.xlu0 %1588 }
 0x667   : > { %4222 = vrcp.f32 %v1589_v61  ;;  %v3524_v61 = vld [vmem:[#allocation10] ss:$0 sm:$0xff] }
 0x668   : > { %4224 = vpow2.f32 %v1585_v1 }
 0x66b   : > { %1360 = vrot.lane.b32.xlu0 %v5559_v58, %s4894_s13 }
 0x671   : > { %v4223_v2 = vpop.eup %4222 }
 0x672   : > { %v1603_v4 = vmul.f32 %v4223_v2, %v4217_v48  ;;  %v4225_v6 = vpop.eup %4224 }
 0x673   : > { %v1596_v7 = vsel %vm1562_vm4, %v4225_v6, 0.0 }
 0x674   : > { %v1607_v5 = vpack.c.bf16 %v1603_v4, %v1603_v4 }
 0x676   : > { %3744 = vmatmul.mubr.msk.bf16.vlgmr.msra.gmra.mrb[4].mxu0 %vm1562_vm4, %v1607_v5  ;;  %v4134_v5 = vld [vmem:[#allocation18] ss:$8 sps:$4 sm:$0xff]  }
 0x677   : > { %3755 = vmatprep.mubr.msk.bf16.mxu0 %vm4892_vm0, %v4890_v3 }
 0x682   : > { %1597 = vadd.xlane.f32.xlu1 %v1596_v7  ;;  %v4139_v7 = vld [vmem:[#allocation18 + $0x14] ss:$8 sps:$4 sm:$0xff]  }
 0x693   : > { %1364 = vrot.lane.b32.xlu1 %v5559_v58, %s4895_s3 }
 0x6da   : > { %v1592_v8 = vpop.xlane.xlu1 %1591 }
 0x6db   : > { %4226 = vrcp.f32 %v1592_v8  ;;  %v4146_v8 = vld [vmem:[#allocation15] sm:$0xff]  }
 0x6de   : > { %v1363_v9 = vpop.permute.xlu1 %1362 }
 0x6df   : > { %v1708_v10 = vsel %vm1614_vm1, %v1363_v9, 0  ;;  %v4137_v9 = vld [vmem:[#allocation18 + $0x10] ss:$8 sps:$4 sm:$0xff]  }
 0x6e0   : > { %3754 = vmatpush3.bf16.msra.mxu0 %v1708_v10  ;;  %v4142_v10 = vld [vmem:[#allocation18 + $0x24] ss:$8 sps:$4 sm:$0xff]  }
 0x6e1   : > { %3765 = vmatprep.subr.bf16.mxu0 %v4890_v3 }
 0x6e2   : > { %v1595_v11 = vpop.xlane.xlu0 %1594 }
 0x6e3   : > { %4228 = vrcp.f32 %v1595_v11  ;;  %v4150_v11 = vld [vmem:[#allocation15 + $0x8] sm:$0xff]  }
 0x6e5   : > { %v4227_v12 = vpop.eup %4226 }
 0x6e6   : > { %v1604_v13 = vmul.f32 %v4227_v12, %v4219_v56  ;;  %v1361_v14 = vpop.permute.xlu0 %1360  ;;  %v4145_v12 = vld [vmem:[#allocation18 + $0x34] ss:$8 sps:$4 sm:$0xff]  }
 0x6e7   : > { %v1662_v15 = vsel %vm1614_vm1, %v1361_v14, 0  ;;  %v4149_v14 = vld [vmem:[#allocation18 + $0x44] ss:$8 sps:$4 sm:$0xff]  }
 0x6e8   : > { %3748 = vmatpush3.bf16.msra.mxu1 %v1662_v15  ;;  %v1608_v16 = vpack.c.bf16 %v1604_v13, %v1604_v13  ;;  %v4143_v13 = vld [vmem:[#allocation18 + $0x30] ss:$8 sps:$4 sm:$0xff]   ;;  %v4147_v15 = vld [vmem:[#allocation18 + $0x40] ss:$8 sps:$4 sm:$0xff]  }
 0x6e9   : > { %3759 = vmatprep.subr.bf16.mxu1 %v4890_v3 }
 0x6eb   : > { %3750 = vmatmul.mubr.msk.bf16.vlgmr.msra.gmra.mrb[20].mxu1 %vm1562_vm4, %v1608_v16  ;;  %v4153_v16 = vld [vmem:[#allocation18 + $0x54] ss:$8 sps:$4 sm:$0xff]  }
 0x6ec   : > { %3761 = vmatprep.mubr.msk.bf16.mxu1 %vm4892_vm0, %v4890_v3 }
 0x6ed   : > { %v4229_v58 = vpop.eup %4228 }
 0x6ee   : > { %v1605_v17 = vmul.f32 %v4229_v58, %v4221_v59  ;;  %v4151_v58 = vld [vmem:[#allocation18 + $0x50] ss:$8 sps:$4 sm:$0xff]  }
 0x6f0   : > { %v1609_v18 = vpack.c.bf16 %v1605_v17, %v1605_v17 }
 0x6f2   : > { %3756 = vmatmul.mubr.msk.bf16.vlgmr.msra.gmra.mrb[8].mxu0 %vm1562_vm4, %v1609_v18 }
 0x6f3   : > { %3781 = vmatprep.mubr.msk.bf16.mxu0 %vm4892_vm0, %v4890_v3  ;;  %3766 = vmatpush3.bf16.msra.mxu0 %v4126_v30  ;;  %v1052_v30 = vld [vmem:[%s1037_s0 + $0x8] sm:$0xff] }
 0x6f4   : > { %3767 = vmatprep.subr.bf16.mxu0 %v4890_v3 }
 0x6f7   : > { %3768 = vmatpush3.bf16.msra.mxu0 %v4127_v31 }
 0x6f8   : > { %3769 = vmatprep.subr.bf16.mxu0 %v4890_v3 }
 0x6fb   : > { %3770 = vmatpush3.bf16.msra.mxu0 %v4128_v34  ;;  %v4165_v34 = vld [vmem:[#allocation15 + $0x38] sm:$0xff]  }
 0x6fc   : > { %3771 = vmatprep.subr.bf16.mxu0 %v4890_v3 }
 0x6ff   : > { %3772 = vmatpush3.bf16.msra.mxu0 %v4129_v37 }
 0x700   : > { %3773 = vmatprep.subr.bf16.mxu0 %v4890_v3 }
 0x703   : > { %3774 = vmatpush3.bf16.msra.mxu0 %v4130_v41  ;;  %v3526_v41 = vld [vmem:[#allocation13] ss:$0 sm:$0xff] }
 0x704   : > { %3775 = vmatprep.subr.bf16.mxu0 %v4890_v3 }
 0x707   : > { %3776 = vmatpush3.bf16.msra.mxu0 %v4131_v43 }
 0x708   : > { %3777 = vmatprep.subr.bf16.mxu0 %v4890_v3 }
 0x70b   : > { %3778 = vmatpush3.bf16.msra.mxu0 %v4132_v44 }
 0x70c   : > { %3779 = vmatprep.subr.bf16.mxu0 %v4890_v3 }
 0x70f   : > { %v1598_v19 = vpop.xlane.xlu1 %1597  ;;  %3780 = vmatpush3.bf16.msra.mxu0 %v4133_v47  ;;  %v2083_v47 = vld [vmem:[#allocation19] sm:$0x3] }
 0x710   : > { %4230 = vrcp.f32 %v1598_v19 }
 0x713   : > { %v1365_v20 = vpop.permute.xlu1 %1364 }
 0x714   : > { %v1754_v21 = vsel %vm1614_vm1, %v1365_v20, 0 }
 0x715   : > { %3760 = vmatpush3.bf16.msra.mxu1 %v1754_v21  ;;  %v4154_v21 = vld [vmem:[#allocation15 + $0x10] sm:$0xff]  }
 0x716   : > { %3785 = vmatprep.subr.bf16.mxu1 %v4890_v3 }
 0x71a   : > { %v4231_v22 = vpop.eup %4230 }
 0x71b   : > { %v1606_v23 = vmul.f32 %v4231_v22, %v4225_v6  ;;  %v4136_v6 = vld [vmem:[#allocation18 + $0x4] ss:$8 sps:$4 sm:$0xff]  }
 0x71c   : > { %2175 = vmatprep.subr.bf16.mxu0 %v4136_v6  ;;  %v4157_v22 = vld [vmem:[#allocation18 + $0x64] ss:$8 sps:$4 sm:$0xff]  }
 0x71d   : > { %v1610_v24 = vpack.c.bf16 %v1606_v23, %v1606_v23  ;;  %v4155_v23 = vld [vmem:[#allocation18 + $0x60] ss:$8 sps:$4 sm:$0xff]  }
 0x71f   : > { %3762 = vmatmul.mubr.msk.bf16.vlgmr.msra.gmra.mrb[24].mxu1 %vm1562_vm4, %v1610_v24  ;;  %v4158_v24 = vld [vmem:[#allocation15 + $0x18] sm:$0xff]  }
 0x720   : > { %3801 = vmatprep.mubr.msk.bf16.mxu1 %vm4892_vm0, %v4890_v3  ;;  %3786 = vmatpush3.bf16.msra.mxu1 %v4146_v8 }
 0x721   : > { %3787 = vmatprep.subr.bf16.mxu1 %v4890_v3 }
 0x724   : > { %3788 = vmatpush3.bf16.msra.mxu1 %v4150_v11 }
 0x725   : > { %3789 = vmatprep.subr.bf16.mxu1 %v4890_v3 }
 0x728   : > { %3790 = vmatpush3.bf16.msra.mxu1 %v4154_v21 }
 0x729   : > { %3791 = vmatprep.subr.bf16.mxu1 %v4890_v3 }
 0x72c   : > { %3792 = vmatpush3.bf16.msra.mxu1 %v4158_v24 }
 0x72d   : > { %3793 = vmatprep.subr.bf16.mxu1 %v4890_v3 }
 0x749   : > { %v1652_v26 = vpop.f32.mrb[4].mxu0 }
 0x74a   : > { %v3745_v27 = vpop.f32.mrb[5].mxu0 }
 0x74b   : > { %v1655_v28 = vpop.f32.mrb[6].mxu0  ;;  %v4161_v27 = vld [vmem:[#allocation18 + $0x74] ss:$8 sps:$4 sm:$0xff]  }
 0x74c   : > { %v3746_v29 = vpop.f32.mrb[7].mxu0  ;;  %v4162_v28 = vld [vmem:[#allocation15 + $0x20] sm:$0xff]  }
 0x74d   : > { %v1051_v29 = vld [vmem:[%s1037_s0] sm:$0xff]  ;;  %3794 = vmatpush3.bf16.msra.mxu1 %v4162_v28 }
 0x74e   : > { %v2066_v31 = vpack.c.bf16 %v1052_v30, %v1051_v29  ;;  %3795 = vmatprep.subr.bf16.mxu1 %v4890_v3 }
 0x7be   : > { %v1698_v32 = vpop.f32.mrb[20].mxu1 }
 0x7bf   : > { %1797 = vrot.lane.b32.xlu0 %v1698_v32, %s4895_s3  ;;  %v3751_v33 = vpop.f32.mrb[21].mxu1  ;;  %v4163_v32 = vld [vmem:[#allocation15 + $0x28] sm:$0xff]  }
 0x7c0   : > { %v1701_v35 = vpop.f32.mrb[22].mxu1  ;;  %3796 = vmatpush3.bf16.msra.mxu1 %v4163_v32  ;;  %v4164_v33 = vld [vmem:[#allocation15 + $0x30] sm:$0xff]  }
 0x7c1   : > { %v3752_v36 = vpop.f32.mrb[23].mxu1  ;;  %3797 = vmatprep.subr.bf16.mxu1 %v4890_v3 }
 0x7c4   : > { %3798 = vmatpush3.bf16.msra.mxu1 %v4164_v33 }
 0x7c5   : > { %v1744_v38 = vpop.f32.mrb[8].mxu0  ;;  %3799 = vmatprep.subr.bf16.mxu1 %v4890_v3 }
 0x7c6   : > { %1801 = vrot.lane.b32.xlu1 %v1744_v38, %s4893_s27  ;;  %v3757_v39 = vpop.f32.mrb[9].mxu0 }
 0x7c7   : > { %v1747_v40 = vpop.f32.mrb[10].mxu0  ;;  %v3525_v39 = vld [vmem:[#allocation12] ss:$0 sm:$0xff] }
 0x7c8   : > { %v3758_v42 = vpop.f32.mrb[11].mxu0  ;;  %3800 = vmatpush3.bf16.msra.mxu1 %v4165_v34 }
 0x7c9   : > { %3805 = vmatprep.subr.bf16.mxu1 %v4890_v3 }
 0x7f2   : > { %v1790_v48 = vpop.f32.mrb[24].mxu1 }
 0x7f3   : > { %1805 = vrot.lane.b32.xlu0 %v1790_v48, %s4894_s13  ;;  %v3763_v49 = vpop.f32.mrb[25].mxu1  ;;  %v2088_v48 = vrot.slane %v2083_v47, %v5555_v46 }
 0x7f4   : > { %v1793_v50 = vpop.f32.mrb[26].mxu1  ;;  %v2092_v49 = vrot.slane %v2083_v47, %v5553_v45 }
 0x7f5   : > { %v3764_v51 = vpop.f32.mrb[27].mxu1 }
 0x831   : > { %v1798_v52 = vpop.permute.xlu0 %1797 }
 0x832   : > { %v1808_v54 = vsel %vm1366_vm2, %v1652_v26, %v1798_v52  ;;  %v4159_v26 = vld [vmem:[#allocation18 + $0x70] ss:$8 sps:$4 sm:$0xff]  }
 0x838   : > { %v1802_v53 = vpop.permute.xlu1 %1801 }
 0x839   : > { %v1810_v55 = vsel %vm1809_vm5, %v1808_v54, %v1802_v53 }
 0x865   : > { %v1806_v56 = vpop.permute.xlu0 %1805 }
 0x866   : > { %v1812_v57 = vsel %vm1811_vm6, %v1810_v55, %v1806_v56 }
 0x867   : > { %v1813_v59 = vpack.c.bf16 %v1812_v57, %v1812_v57 }
 0x869   : > { %3782 = vmatmul.mubr.bf16.vlgmr.msra.gmra.mrb[12].mxu0 %v1813_v59 }
 0x86a   : > { %2207 = vmatprep.mubr.bf16.mxu0 %v4891_v25  ;;  %2176 = vmatpush1.bf16.msra.mxu0 %v4134_v5 }
 0x86b   : > { %2177 = vmatprep.subr.bf16.mxu0 %v4139_v7 }
 0x86e   : > { %2178 = vmatpush1.bf16.msra.mxu0 %v4137_v9 }
 0x86f   : > { %2179 = vmatprep.subr.bf16.mxu0 %v4142_v10 }
 0x93c   : > { %v1912_v60 = vpop.f32.mrb[12].mxu0 }
 0x93d   : > { %v1918_v62 = vadd.f32 %v1912_v60, %v5532_v0  ;;  %v3783_v63 = vpop.f32.mrb[13].mxu0  ;;  %v4140_v0 = vld [vmem:[#allocation18 + $0x20] ss:$8 sps:$4 sm:$0xff]  }
 0x93e   : > { %v1915_v1 = vpop.f32.mrb[14].mxu0  ;;  %2180 = vmatpush1.bf16.msra.mxu0 %v4140_v0 }
 0x93f   : > { %v5645_v2 = vadd.f32 %v3524_v61, %v1918_v62  ;;  %v3784_v4 = vpop.f32.mrb[15].mxu0  ;;  %2181 = vmatprep.subr.bf16.mxu0 %v4145_v12  ;;  %v3527_v62 = vld [vmem:[#allocation16] ss:$0 sm:$0xff] }
 0x941   : > { %1929 = vadd.xlane.f32.xlu1 %v5645_v2 }
 0x942   : > { %2182 = vmatpush1.bf16.msra.mxu0 %v4143_v13 }
 0x943   : > { %2183 = vmatprep.subr.bf16.mxu0 %v4149_v14 }
 0x946   : > { %2184 = vmatpush1.bf16.msra.mxu0 %v4147_v15 }
 0x947   : > { %2185 = vmatprep.subr.bf16.mxu0 %v4153_v16  ;;  %v1054_v16 = vld [vmem:[%s1044_s24] sm:$0x1] }
 0x948   : > { %vm2433_vm7 = vcmp.gt.f32.partialorder %v1054_v16, 0.0 }
 0x94a   : > { %2186 = vmatpush1.bf16.msra.mxu0 %v4151_v58  ;;  %v2434_v58 = vsel %vm2433_vm7, 1, %v4891_v25 }
 0x94b   : > { %2187 = vmatprep.subr.bf16.mxu0 %v4157_v22 }
 0x94e   : > { %2188 = vmatpush1.bf16.msra.mxu0 %v4155_v23 }
 0x94f   : > { %2189 = vmatprep.subr.bf16.mxu0 %v4161_v27 }
 0x952   : > { %2190 = vmatpush1.bf16.msra.mxu0 %v4159_v26 }
 0x953   : > { %3829 = vmatprep.subr.bf16.mxu0 %v4890_v3 }
 0x955   : > { %2208 = vmatmul.mubr.bf16.vlgmr.msra.gmra.mrb[16].mxu0 %v2066_v31 }
 0x956   : > { %3831 = vmatprep.mubr.msk.bf16.mxu0 %vm4892_vm0, %v4890_v3 }
 0x9ce   : > { %v1930_v17 = vpop.xlane.xlu1 %1929 }
 0x9cf   : > { %v1931_v18 = vmul.f32 0.0078125, %v1930_v17  ;;  %v2438_v17 = vrot.slane %v2434_v58, %v5555_v46 }
 0x9d1   : > { %v1932_v19 = vsub.f32 %v5645_v2, %v1931_v18  ;;  %vm5704_vm8 = vcmp.eq.s32.totalorder %v2438_v17, 1 }
 0x9d3   : > { %v1933_v20 = vmul.f32 %v1932_v19, %v1932_v19 }
 0x9d5   : > { %1934 = vadd.xlane.f32.xlu0 %v1933_v20 }
 0xa28   : > { %v2209_v50 = vpop.f32.mrb[16].mxu0 }
 0xa29   : > { %v2210_v51 = vadd.f32 %v2209_v50, %v2088_v48  ;;  %v2211_v52 = vpop.f32.mrb[17].mxu0 }
 0xa2a   : > { %v2212_v53 = vadd.f32 %v2211_v52, %v2092_v49  ;;  %v2213_v54 = vpop.f32.mrb[18].mxu0 }
 0xa2b   : > { %v2214_v55 = vadd.f32 %v2213_v54, %v2088_v48  ;;  %v2215_v56 = vpop.f32.mrb[19].mxu0 }
 0xa2c   : > { %v2216_v57 = vadd.f32 %v2215_v56, %v2092_v49 }
 0xa2d   : > { %v2226_v59 = vpack.c.bf16 %v2214_v55, %v2210_v51 }
 0xa2e   : > { %v5668_v60 = vpack.c.bf16 %v2216_v57, %v2212_v53 }
 0xa2f   : > { %2228 = vrot.lane.b32.xlu0 %v2226_v59, %s4894_s13  ;;  %v2249_v61 = vsel %vm1366_vm2, %v2226_v59, 0 }
 0xa30   : > { %3830 = vmatpush3.bf16.msra.mxu0 %v5668_v60 }
 0xa31   : > { %3841 = vmatprep.subr.bf16.mxu0 %v4890_v3 }
 0xa62   : > { %v1935_v35 = vpop.xlane.xlu0 %1934 }
 0xa63   : > { %v1936_v36 = vmul.f32 0.0078125, %v1935_v35 }
 0xa65   : > { %v1937_v37 = vadd.f32 1e-05, %v1936_v36 }
 0xa67   : > { %4232 = vrsqrt.f32 %v1937_v37 }
 0xa71   : > { %v4233_v38 = vpop.eup %4232 }
 0xa72   : > { %v1939_v40 = vmul.f32 %v4233_v38, %v1932_v19 }
 0xa74   : > { %v1946_v42 = vmul.f32 %v3525_v39, %v1939_v40 }
 0xa76   : > { %v1953_v43 = vadd.f32 %v3526_v41, %v1946_v42 }
 0xa78   : > { %v1954_v44 = vpack.c.bf16 %v1953_v43, %v1953_v43 }
 0xa7a   : > { %3802 = vmatmul.mubr.bf16.vlgmr.msra.gmra.mrb[28].mxu1 %v1954_v44 }
 0xa7b   : > { %3807 = vmatprep.mubr.msk.bf16.mxu1 %vm4892_vm0, %v4890_v3  ;;  %3806 = vmatpush3.bf16.xpose.msra.mxu1 %v2249_v61 }
 0xa7c   : > { %3811 = vmatprep.subr.bf16.mxu1 %v4890_v3 }
 0xaa1   : > { %v2229_v5 = vpop.permute.xlu0 %2228 }
 0xaa2   : > { %v2295_v9 = vsel %vm1366_vm2, %v2229_v5, 0 }
 0xb4d   : > { %v2060_v63 = vpop.f32.mrb[28].mxu1 }
 0xb4e   : > { %v2061_v1 = vadd.f32 %v3527_v62, %v2060_v63  ;;  %v3803_v4 = vpop.f32.mrb[29].mxu1 }
 0xb4f   : > { %v2063_v6 = vpop.f32.mrb[30].mxu1 }
 0xb50   : > { %v2218_v7 = vpack.c.bf16 %v2061_v1, %v2061_v1  ;;  %v3804_v8 = vpop.f32.mrb[31].mxu1 }
 0xb52   : > { %2222 = vrot.lane.b32.xlu0 %v2218_v7, %s4893_s27  ;;  %2220 = vrot.lane.b32.xlu1 %v2218_v7, %s4894_s13 }
 0xb53   : > { %3808 = vmatmul.mubr.msk.bf16.vlgmr.msra.gmra.mrb[32].mxu1 %vm1366_vm2, %v2218_v7 }
 0xb54   : > { %3812 = vmatpush3.bf16.xpose.msra.mxu1 %v2295_v9  ;;  %3813 = vmatprep.mubr.msk.bf16.mxu1 %vm4892_vm0, %v4890_v3 }
 0xb55   : > { %3817 = vmatprep.subr.bf16.mxu1 %v4890_v3 }
 0xb56   : > { %2224 = vrot.lane.b32.xlu0 %v2218_v7, %s4895_s3  ;;  %2230 = vrot.lane.b32.xlu1 %v2226_v59, %s4893_s27 }
 0xb5a   : > { %2232 = vrot.lane.b32.xlu1 %v2226_v59, %s4895_s3 }
 0xbc4   : > { %v2221_v10 = vpop.permute.xlu1 %2220  ;;  %v2223_v13 = vpop.permute.xlu0 %2222 }
 0xbc5   : > { %3814 = vmatmul.mubr.msk.bf16.vlgmr.msra.gmra.mrb[36].mxu1 %vm1366_vm2, %v2221_v10 }
 0xbc6   : > { %3819 = vmatprep.mubr.msk.bf16.mxu1 %vm4892_vm0, %v4890_v3 }
 0xbc8   : > { %v2231_v11 = vpop.permute.xlu1 %2230  ;;  %v2225_v15 = vpop.permute.xlu0 %2224 }
 0xbc9   : > { %v2341_v0 = vsel %vm1366_vm2, %v2231_v11, 0 }
 0xbca   : > { %3818 = vmatpush3.bf16.xpose.msra.mxu1 %v2341_v0 }
 0xbcb   : > { %3823 = vmatprep.subr.bf16.mxu1 %v4890_v3 }
 0xbcc   : > { %v2233_v12 = vpop.permute.xlu1 %2232 }
 0xbcd   : > { %v2387_v14 = vsel %vm1366_vm2, %v2233_v12, 0 }
 0xbd1   : > { %3820 = vmatmul.mubr.msk.bf16.vlgmr.msra.gmra.mrb[40].mxu1 %vm1366_vm2, %v2223_v13 }
 0xbd2   : > { %3824 = vmatpush3.bf16.xpose.msra.mxu1 %v2387_v14  ;;  %3825 = vmatprep.mubr.msk.bf16.mxu1 %vm4892_vm0, %v4890_v3 }
 0xbd3   : > { %3835 = vmatprep.subr.bf16.mxu1 %v4890_v3 }
 0xbd9   : > { %3826 = vmatmul.mubr.msk.bf16.vlgmr.msra.gmra.mrb[44].mxu1 %vm1366_vm2, %v2225_v15 }
 0xbda   : > { %3837 = vmatprep.mubr.msk.bf16.mxu1 %vm4892_vm0, %v4890_v3 }
 0xc26   : > { %v2285_v18 = vpop.f32.mrb[32].mxu1 }
 0xc27   : > { %v2429_v20 = vmul.f32 0.17677669, %v2285_v18  ;;  %v3809_v21 = vpop.f32.mrb[33].mxu1 }
 0xc28   : > { %v2288_v22 = vpop.f32.mrb[34].mxu1 }
 0xc29   : > { %v3810_v23 = vpop.f32.mrb[35].mxu1  ;;  %v2440_v24 = vsel %vm5704_vm8, %v2429_v20, -1e+09 }
 0xc2a   : > { %v2445_v26 = vsel %vm2444_vm9, %v2440_v24, -inf }
 0xc2b   : > { %2446 = vmax.xlane.f32.xlu1 %v2445_v26 }
 0xc98   : > { %v2331_v27 = vpop.f32.mrb[36].mxu1 }
 0xc99   : > { %v2430_v28 = vmul.f32 0.17677669, %v2331_v27  ;;  %v3815_v29 = vpop.f32.mrb[37].mxu1 }
 0xc9a   : > { %v2334_v30 = vpop.f32.mrb[38].mxu1 }
 0xc9b   : > { %v3816_v31 = vpop.f32.mrb[39].mxu1  ;;  %v2441_v32 = vsel %vm5704_vm8, %v2430_v28, -1e+09 }
 0xc9c   : > { %v2448_v33 = vsel %vm2444_vm9, %v2441_v32, -inf }
 0xc9d   : > { %2449 = vmax.xlane.f32.xlu0 %v2448_v33  ;;  %v4167_v33 = vld [vmem:[#allocation21 + $0x8] sm:$0xff]  }
 0xca4   : > { %v2377_v34 = vpop.f32.mrb[40].mxu1 }
 0xca5   : > { %v2431_v35 = vmul.f32 0.17677669, %v2377_v34  ;;  %v3821_v36 = vpop.f32.mrb[41].mxu1 }
 0xca6   : > { %v2380_v37 = vpop.f32.mrb[42].mxu1 }
 0xca7   : > { %v3822_v38 = vpop.f32.mrb[43].mxu1  ;;  %v2442_v39 = vsel %vm5704_vm8, %v2431_v35, -1e+09  ;;  %v4168_v37 = vld [vmem:[#allocation21 + $0x10] sm:$0xff]  }
 0xca8   : > { %v2451_v40 = vsel %vm2444_vm9, %v2442_v39, -inf }
 0xca9   : > { %2452 = vmax.xlane.f32.xlu0 %v2451_v40 }
 0xcac   : > { %v2423_v41 = vpop.f32.mrb[44].mxu1 }
 0xcad   : > { %v2432_v42 = vmul.f32 0.17677669, %v2423_v41  ;;  %v3827_v43 = vpop.f32.mrb[45].mxu1 }
 0xcae   : > { %v2426_v44 = vpop.f32.mrb[46].mxu1 }
 0xcaf   : > { %v3828_v47 = vpop.f32.mrb[47].mxu1  ;;  %v2443_v48 = vsel %vm5704_vm8, %v2432_v42, -1e+09  ;;  %v4170_v42 = vld [vmem:[#allocation21 + $0x20] sm:$0xff]   ;;  %v4171_v44 = vld [vmem:[#allocation21 + $0x28] sm:$0xff]  }
 0xcb0   : > { %v2454_v49 = vsel %vm2444_vm9, %v2443_v48, -inf  ;;  %v4172_v47 = vld [vmem:[#allocation21 + $0x30] sm:$0xff]  }
 0xcb1   : > { %2455 = vmax.xlane.f32.xlu1 %v2454_v49 }
 0xcb8   : > { %v2447_v50 = vpop.xlane.xlu1 %2446 }
 0xcb9   : > { %v2457_v51 = vsub.f32 %v2440_v24, %v2447_v50 }
 0xcbb   : > { %v2461_v52 = vmul.f32 1.442695, %v2457_v51 }
 0xcbd   : > { %4234 = vpow2.f32 %v2461_v52 }
 0xcc7   : > { %v4235_v53 = vpop.eup %4234 }
 0xcc8   : > { %v2469_v54 = vsel %vm2444_vm9, %v4235_v53, 0.0 }
 0xcc9   : > { %2470 = vadd.xlane.f32.xlu0 %v2469_v54 }
 0xd2a   : > { %v2450_v55 = vpop.xlane.xlu0 %2449 }
 0xd2b   : > { %v2458_v56 = vsub.f32 %v2441_v32, %v2450_v55  ;;  %v4166_v32 = vld [vmem:[#allocation21] sm:$0xff]  }
 0xd2d   : > { %v2463_v57 = vmul.f32 1.442695, %v2458_v56 }
 0xd2f   : > { %4236 = vpow2.f32 %v2463_v57 }
 0xd36   : > { %v2453_v59 = vpop.xlane.xlu0 %2452 }
 0xd37   : > { %v2459_v61 = vsub.f32 %v2442_v39, %v2453_v59 }
 0xd39   : > { %v4237_v62 = vpop.eup %4236  ;;  %v2465_v63 = vmul.f32 1.442695, %v2459_v61 }
 0xd3a   : > { %v2472_v1 = vsel %vm2444_vm9, %v4237_v62, 0.0 }
 0xd3b   : > { %4238 = vpow2.f32 %v2465_v63  ;;  %2473 = vadd.xlane.f32.xlu1 %v2472_v1 }
 0xd3e   : > { %v2456_v7 = vpop.xlane.xlu1 %2455 }
 0xd3f   : > { %v2460_v8 = vsub.f32 %v2443_v48, %v2456_v7  ;;  %v4173_v48 = vld [vmem:[#allocation21 + $0x38] sm:$0xff]   ;;  %v4174_v7 = vld [vmem:[#allocation27] ss:$8 sps:$4 sm:$0xff]  }
 0xd41   : > { %v2467_v9 = vmul.f32 1.442695, %v2460_v8  ;;  %v4176_v8 = vld [vmem:[#allocation27 + $0x4] ss:$8 sps:$4 sm:$0xff]  }
 0xd45   : > { %v4239_v4 = vpop.eup %4238 }
 0xd46   : > { %v2475_v5 = vsel %vm2444_vm9, %v4239_v4, 0.0 }
 0xd47   : > { %2476 = vadd.xlane.f32.xlu0 %v2475_v5 }
 0xd4c   : > { %2239 = vrot.lane.b32.xlu1 %v5668_v60, %s4893_s27 }
 0xd56   : > { %v2471_v6 = vpop.xlane.xlu0 %2470 }
 0xd57   : > { %4240 = vrcp.f32 %v2471_v6 }
 0xd58   : > { %4242 = vpow2.f32 %v2467_v9  ;;  %v4179_v9 = vld [vmem:[#allocation27 + $0x14] ss:$8 sps:$4 sm:$0xff]  }
 0xd5d   : > { %2236 = vrot.lane.b32.xlu0 %v5668_v60, %s4894_s13 }
 0xd61   : > { %v4241_v10 = vpop.eup %4240 }
 0xd62   : > { %v2485_v11 = vmul.f32 %v4241_v10, %v4235_v53  ;;  %v4243_v12 = vpop.eup %4242  ;;  %v4177_v10 = vld [vmem:[#allocation27 + $0x10] ss:$8 sps:$4 sm:$0xff]  }
 0xd63   : > { %v2478_v13 = vsel %vm2444_vm9, %v4243_v12, 0.0 }
 0xd64   : > { %v2489_v0 = vpack.c.bf16 %v2485_v11, %v2485_v11  ;;  %v4182_v11 = vld [vmem:[#allocation27 + $0x24] ss:$8 sps:$4 sm:$0xff]  }
 0xd66   : > { %3832 = vmatmul.mubr.msk.bf16.vlgmr.msra.gmra.mrb[20].mxu0 %vm2444_vm9, %v2489_v0  ;;  %v4180_v0 = vld [vmem:[#allocation27 + $0x20] ss:$8 sps:$4 sm:$0xff]  }
 0xd67   : > { %3843 = vmatprep.mubr.msk.bf16.mxu0 %vm4892_vm0, %v4890_v3 }
 0xd70   : > { %2479 = vadd.xlane.f32.xlu1 %v2478_v13 }
 0xd81   : > { %2242 = vrot.lane.b32.xlu1 %v5668_v60, %s4895_s3 }
 0xdc8   : > { %v2474_v14 = vpop.xlane.xlu1 %2473 }
 0xdc9   : > { %4244 = vrcp.f32 %v2474_v14 }
 0xdcc   : > { %v2240_v15 = vpop.permute.xlu1 %2239 }
 0xdcd   : > { %3842 = vmatpush3.bf16.msra.mxu0 %v2240_v15  ;;  %v4185_v15 = vld [vmem:[#allocation27 + $0x34] ss:$8 sps:$4 sm:$0xff]  }
 0xdce   : > { %3853 = vmatprep.subr.bf16.mxu0 %v4890_v3 }
 0xdd3   : > { %v4245_v16 = vpop.eup %4244 }
 0xdd4   : > { %v2477_v58 = vpop.xlane.xlu0 %2476  ;;  %v2486_v17 = vmul.f32 %v4245_v16, %v4237_v62  ;;  %v3568_v62 = vld [vmem:[#allocation22] ss:$0 sm:$0xff] }
 0xdd5   : > { %4246 = vrcp.f32 %v2477_v58  ;;  %v4183_v16 = vld [vmem:[#allocation27 + $0x30] ss:$8 sps:$4 sm:$0xff]   ;;  %v4188_v58 = vld [vmem:[#allocation27 + $0x44] ss:$8 sps:$4 sm:$0xff]  }
 0xdd6   : > { %v2490_v19 = vpack.c.bf16 %v2486_v17, %v2486_v17  ;;  %v4186_v17 = vld [vmem:[#allocation27 + $0x40] ss:$8 sps:$4 sm:$0xff]  }
 0xdd8   : > { %v2237_v18 = vpop.permute.xlu0 %2236 }
 0xdd9   : > { %3836 = vmatpush3.bf16.msra.mxu1 %v2237_v18  ;;  %v4191_v18 = vld [vmem:[#allocation27 + $0x54] ss:$8 sps:$4 sm:$0xff]  }
 0xdda   : > { %3847 = vmatprep.subr.bf16.mxu1 %v4890_v3 }
 0xddc   : > { %3838 = vmatmul.mubr.msk.bf16.vlgmr.msra.gmra.mrb[48].mxu1 %vm2444_vm9, %v2490_v19  ;;  %v4189_v19 = vld [vmem:[#allocation27 + $0x50] ss:$8 sps:$4 sm:$0xff]  }
 0xddd   : > { %3849 = vmatprep.mubr.msk.bf16.mxu1 %vm4892_vm0, %v4890_v3 }
 0xddf   : > { %v4247_v60 = vpop.eup %4246 }
 0xde0   : > { %v2487_v20 = vmul.f32 %v4247_v60, %v4239_v4  ;;  %v4194_v60 = vld [vmem:[#allocation27 + $0x64] ss:$8 sps:$4 sm:$0xff]  }
 0xde2   : > { %v2491_v21 = vpack.c.bf16 %v2487_v20, %v2487_v20  ;;  %v4192_v20 = vld [vmem:[#allocation27 + $0x60] ss:$8 sps:$4 sm:$0xff]  }
 0xde4   : > { %3844 = vmatmul.mubr.msk.bf16.vlgmr.msra.gmra.mrb[24].mxu0 %vm2444_vm9, %v2491_v21  ;;  %v4197_v21 = vld [vmem:[#allocation27 + $0x74] ss:$8 sps:$4 sm:$0xff]  }
 0xde5   : > { %3869 = vmatprep.mubr.msk.bf16.mxu0 %vm4892_vm0, %v4890_v3  ;;  %3854 = vmatpush3.bf16.msra.mxu0 %v4166_v32  ;;  %v4206_v32 = vld [vmem:[#allocation30 + $0x60] sm:$0xff]  }
 0xde6   : > { %3855 = vmatprep.subr.bf16.mxu0 %v4890_v3 }
 0xde9   : > { %3856 = vmatpush3.bf16.msra.mxu0 %v4167_v33  ;;  %v4207_v33 = vld [vmem:[#allocation30 + $0x20] sm:$0xff]  }
 0xdea   : > { %3857 = vmatprep.subr.bf16.mxu0 %v4890_v3 }
 0xded   : > { %3858 = vmatpush3.bf16.msra.mxu0 %v4168_v37 }
 0xdee   : > { %3859 = vmatprep.subr.bf16.mxu0 %v4890_v3 }
 0xdfd   : > { %v2480_v22 = vpop.xlane.xlu1 %2479 }
 0xdfe   : > { %4248 = vrcp.f32 %v2480_v22  ;;  %v4195_v22 = vld [vmem:[#allocation27 + $0x70] ss:$8 sps:$4 sm:$0xff]  }
 0xe01   : > { %v2243_v23 = vpop.permute.xlu1 %2242 }
 0xe02   : > { %3848 = vmatpush3.bf16.msra.mxu1 %v2243_v23  ;;  %v4198_v23 = vld [vmem:[#allocation30 + $0x40] sm:$0xff]  }
 0xe03   : > { %2930 = vmatprep.subr.bf16.mxu1 %v4176_v8 }
 0xe08   : > { %v4249_v24 = vpop.eup %4248 }
 0xe09   : > { %v2488_v26 = vmul.f32 %v4249_v24, %v4243_v12  ;;  %v4199_v24 = vld [vmem:[#allocation30] sm:$0xff]  }
 0xe0b   : > { %v2492_v27 = vpack.c.bf16 %v2488_v26, %v2488_v26  ;;  %v4200_v26 = vld [vmem:[#allocation30 + $0x48] sm:$0xff]  }
 0xe0d   : > { %3850 = vmatmul.mubr.msk.bf16.vlgmr.msra.gmra.mrb[52].mxu1 %vm2444_vm9, %v2492_v27  ;;  %v4201_v27 = vld [vmem:[#allocation30 + $0x8] sm:$0xff]  }
 0xe0e   : > { %2962 = vmatprep.mubr.bf16.mxu1 %v4891_v25  ;;  %v4169_v25 = vld [vmem:[#allocation21 + $0x18] sm:$0xff]   ;;  %2931 = vmatpush1.bf16.msra.mxu1 %v4174_v7 }
 0xe0f   : > { %3860 = vmatpush3.bf16.msra.mxu0 %v4169_v25  ;;  %2932 = vmatprep.subr.bf16.mxu1 %v4179_v9 }
 0xe10   : > { %3861 = vmatprep.subr.bf16.mxu0 %v4890_v3 }
 0xe12   : > { %2933 = vmatpush1.bf16.msra.mxu1 %v4177_v10 }
 0xe13   : > { %3862 = vmatpush3.bf16.msra.mxu0 %v4170_v42  ;;  %2934 = vmatprep.subr.bf16.mxu1 %v4182_v11 }
 0xe14   : > { %3863 = vmatprep.subr.bf16.mxu0 %v4890_v3 }
 0xe16   : > { %2935 = vmatpush1.bf16.msra.mxu1 %v4180_v0 }
 0xe17   : > { %3864 = vmatpush3.bf16.msra.mxu0 %v4171_v44  ;;  %2936 = vmatprep.subr.bf16.mxu1 %v4185_v15 }
 0xe18   : > { %3865 = vmatprep.subr.bf16.mxu0 %v4890_v3 }
 0xe1a   : > { %2937 = vmatpush1.bf16.msra.mxu1 %v4183_v16 }
 0xe1b   : > { %3866 = vmatpush3.bf16.msra.mxu0 %v4172_v47  ;;  %2938 = vmatprep.subr.bf16.mxu1 %v4188_v58  ;;  %v4210_v47 = vld [vmem:[#allocation30 + $0x70] sm:$0xff]  }
 0xe1c   : > { %3867 = vmatprep.subr.bf16.mxu0 %v4890_v3 }
 0xe1e   : > { %2939 = vmatpush1.bf16.msra.mxu1 %v4186_v17 }
 0xe1f   : > { %3868 = vmatpush3.bf16.msra.mxu0 %v4173_v48  ;;  %2940 = vmatprep.subr.bf16.mxu1 %v4191_v18  ;;  %v4211_v48 = vld [vmem:[#allocation30 + $0x30] sm:$0xff]  }
 0xe20   : > { %3675 = vmatprep.subr.bf16.mxu0 %v4198_v23 }
 0xe22   : > { %2941 = vmatpush1.bf16.msra.mxu1 %v4189_v19 }
 0xe23   : > { %2942 = vmatprep.subr.bf16.mxu1 %v4194_v60 }
 0xe26   : > { %2943 = vmatpush1.bf16.msra.mxu1 %v4192_v20 }
 0xe27   : > { %2944 = vmatprep.subr.bf16.mxu1 %v4197_v21 }
 0xe2a   : > { %2945 = vmatpush1.bf16.msra.mxu1 %v4195_v22 }
 0xe39   : > { %v2530_v28 = vpop.f32.mrb[20].mxu0 }
 0xe3a   : > { %v3833_v29 = vpop.f32.mrb[21].mxu0 }
 0xe3b   : > { %v2533_v30 = vpop.f32.mrb[22].mxu0  ;;  %v4203_v29 = vld [vmem:[#allocation30 + $0x10] sm:$0xff]  }
 0xe3c   : > { %v3834_v31 = vpop.f32.mrb[23].mxu0  ;;  %v4204_v30 = vld [vmem:[#allocation30 + $0x58] sm:$0xff]  }
 0xe3d   : > { %v4205_v31 = vld [vmem:[#allocation30 + $0x18] sm:$0xff]  }
 0xeaf   : > { %v2573_v34 = vpop.f32.mrb[48].mxu1 }
 0xeb0   : > { %2666 = vrot.lane.b32.xlu0 %v2573_v34, %s4895_s3  ;;  %v3839_v35 = vpop.f32.mrb[49].mxu1  ;;  %v4208_v34 = vld [vmem:[#allocation30 + $0x68] sm:$0xff]  }
 0xeb1   : > { %v2576_v36 = vpop.f32.mrb[50].mxu1  ;;  %v4209_v35 = vld [vmem:[#allocation30 + $0x28] sm:$0xff]  }
 0xeb2   : > { %v3840_v38 = vpop.f32.mrb[51].mxu1 }
 0xeb7   : > { %v2616_v39 = vpop.f32.mrb[24].mxu0 }
 0xeb8   : > { %2670 = vrot.lane.b32.xlu1 %v2616_v39, %s4893_s27  ;;  %v3845_v40 = vpop.f32.mrb[25].mxu0  ;;  %v3569_v39 = vld [vmem:[#allocation24] ss:$0 sm:$0xff] }
 0xeb9   : > { %v2619_v41 = vpop.f32.mrb[26].mxu0 }
 0xeba   : > { %v3846_v43 = vpop.f32.mrb[27].mxu0  ;;  %v3570_v41 = vld [vmem:[#allocation25] ss:$0 sm:$0xff] }
 0xee0   : > { %v2659_v49 = vpop.f32.mrb[52].mxu1 }
 0xee1   : > { %2674 = vrot.lane.b32.xlu0 %v2659_v49, %s4894_s13  ;;  %v3851_v50 = vpop.f32.mrb[53].mxu1  ;;  %v4212_v49 = vld [vmem:[#allocation30 + $0x78] sm:$0xff]   ;;  %s5873_s13 = sld [smem:[#allocation61_spill]] }
 0xee2   : > { %v2662_v51 = vpop.f32.mrb[54].mxu1  ;;  %v4213_v50 = vld [vmem:[#allocation30 + $0x38] sm:$0xff]  }
 0xee3   : > { %v3852_v52 = vpop.f32.mrb[55].mxu1  ;;  %v2838_v51 = vld [vmem:[#allocation28] sm:$0x3] }
 0xee4   : > { %v2843_v52 = vrot.slane %v2838_v51, %v5555_v46  ;;  %v3603_v46 = vld [vmem:[#allocation31] ss:$0 sm:$0xff] }
 0xee7   : > { %s1048_s3 = scalar_lea.vmem %s5873_s13, %s5526_s30 }
 0xf22   : > { %v2667_v53 = vpop.permute.xlu0 %2666 }
 0xf23   : > { %v2677_v55 = vsel %vm1366_vm2, %v2530_v28, %v2667_v53  ;;  %v4202_v28 = vld [vmem:[#allocation30 + $0x50] sm:$0xff]   ;;  %v2847_v53 = vrot.slane %v2838_v51, %v5553_v45 }
 0xf2a   : > { %v2671_v54 = vpop.permute.xlu1 %2670 }
 0xf2b   : > { %v2678_v56 = vsel %vm1809_vm5, %v2677_v55, %v2671_v54 }
 0xf53   : > { %v2675_v57 = vpop.permute.xlu0 %2674 }
 0xf54   : > { %v2679_v59 = vsel %vm1811_vm6, %v2678_v56, %v2675_v57 }
 0xf55   : > { %v2680_v61 = vpack.c.bf16 %v2679_v59, %v2679_v59 }
 0xf57   : > { %3870 = vmatmul.mubr.bf16.vlgmr.msra.gmra.mrb[28].mxu0 %v2680_v61 }
 0xf58   : > { %3676 = vmatpush3.bf16.msra.mxu0 %v4199_v24 }
 0xf59   : > { %3677 = vmatprep.subr.bf16.mxu0 %v4200_v26 }
 0xf5c   : > { %3678 = vmatpush3.bf16.msra.mxu0 %v4201_v27 }
 0xf5d   : > { %3679 = vmatprep.subr.bf16.mxu0 %v4202_v28 }
 0xf60   : > { %3680 = vmatpush3.bf16.msra.mxu0 %v4203_v29 }
 0xf61   : > { %3681 = vmatprep.subr.bf16.mxu0 %v4204_v30 }
 0xf64   : > { %3682 = vmatpush3.bf16.msra.mxu0 %v4205_v31 }
 0xf65   : > { %3683 = vmatprep.subr.bf16.mxu0 %v4206_v32 }
 0xf68   : > { %3684 = vmatpush3.bf16.msra.mxu0 %v4207_v33 }
 0xf69   : > { %3685 = vmatprep.subr.bf16.mxu0 %v4208_v34 }
 0xf6c   : > { %3686 = vmatpush3.bf16.msra.mxu0 %v4209_v35 }
 0xf6d   : > { %3687 = vmatprep.subr.bf16.mxu0 %v4210_v47 }
 0xf70   : > { %3688 = vmatpush3.bf16.msra.mxu0 %v4211_v48 }
 0xf71   : > { %3689 = vmatprep.subr.bf16.mxu0 %v4212_v49 }
 0xf74   : > { %3690 = vmatpush3.bf16.msra.mxu0 %v4213_v50 }
0x102a   : > { %v2779_v3 = vpop.f32.mrb[28].mxu0 }
0x102b   : > { %v2785_v63 = vadd.f32 %v2779_v3, %v5645_v2  ;;  %v3871_v1 = vpop.f32.mrb[29].mxu0 }
0x102c   : > { %v2782_v4 = vpop.f32.mrb[30].mxu0 }
0x102d   : > { %v5757_v5 = vadd.f32 %v3568_v62, %v2785_v63  ;;  %v3872_v6 = vpop.f32.mrb[31].mxu0 }
0x102f   : > { %2796 = vadd.xlane.f32.xlu1 %v5757_v5 }
0x10bc   : > { %v2797_v2 = vpop.xlane.xlu1 %2796 }
0x10bd   : > { %v2798_v12 = vmul.f32 0.0078125, %v2797_v2 }
0x10bf   : > { %v2799_v13 = vsub.f32 %v5757_v5, %v2798_v12 }
0x10c1   : > { %v2800_v14 = vmul.f32 %v2799_v13, %v2799_v13 }
0x10c3   : > { %2801 = vadd.xlane.f32.xlu0 %v2800_v14 }
0x1150   : > { %v2802_v36 = vpop.xlane.xlu0 %2801 }
0x1151   : > { %v2803_v37 = vmul.f32 0.0078125, %v2802_v36 }
0x1153   : > { %v2804_v38 = vadd.f32 1e-05, %v2803_v37 }
0x1155   : > { %4250 = vrsqrt.f32 %v2804_v38 }
0x115f   : > { %v4251_v25 = vpop.eup %4250 }
0x1160   : > { %v2806_v40 = vmul.f32 %v4251_v25, %v2799_v13 }
0x1162   : > { %v2813_v42 = vmul.f32 %v3569_v39, %v2806_v40 }
0x1164   : > { %v2820_v43 = vadd.f32 %v3570_v41, %v2813_v42 }
0x1166   : > { %v2821_v44 = vpack.c.bf16 %v2820_v43, %v2820_v43 }
0x1168   : > { %2963 = vmatmul.mubr.bf16.vlgmr.msra.gmra.mrb[56].mxu1 %v2821_v44 }
0x123b   : > { %v2964_v54 = vpop.f32.mrb[56].mxu1 }
0x123c   : > { %v2965_v55 = vadd.f32 %v2964_v54, %v2843_v52  ;;  %v2966_v56 = vpop.f32.mrb[57].mxu1 }
0x123d   : > { %v2967_v57 = vadd.f32 %v2966_v56, %v2847_v53  ;;  %v2968_v59 = vpop.f32.mrb[58].mxu1 }
0x123e   : > { %v2971_v61 = vmax.f32 %v2965_v55, 0.0  ;;  %v2969_v3 = vpop.f32.mrb[59].mxu1 }
0x123f   : > { %v2972_v62 = vmax.f32 %v2967_v57, 0.0 }
0x1240   : > { %v2973_v1 = vpack.c.bf16 %v2971_v61, %v2971_v61 }
0x1241   : > { %v2974_v63 = vpack.c.bf16 %v2972_v62, %v2972_v62 }
0x1243   : > { %3135 = vmatprep.mubr.bf16.mxu0 %v2974_v63 }
0x1244   : > { %3136 = vmatmul.mubr.bf16.vlgmr.msra.gmra.mrb[32].mxu0 %v2973_v1 }
0x1317   : > { %v3691_v4 = vpop.f32.mrb[32].mxu0 }
0x1318   : > { %v3692_v6 = vpop.f32.mrb[33].mxu0 }
0x1319   : > { %v3693_v7 = vadd.f32 %v3692_v6, %v3691_v4  ;;  %v3694_v8 = vpop.f32.mrb[34].mxu0 }
0x131a   : > { %v3695_v9 = vpop.f32.mrb[35].mxu0 }
0x131b   : > { %v3143_v45 = vadd.f32 %v3693_v7, %v5757_v5 }
0x131d   : > { %v3151_v10 = vadd.f32 %v3603_v46, %v3143_v45 }
0x131f   : > { %3152 = vst [vmem:[%s1048_s3] sm:$0xff] %v3151_v10 }
0x1320 PF: > { %s5874_s11 = sld [smem:[#allocation44_spill]] }
0x1326   : > { %s45_s5 = sadd.s32 1, %s5874_s11  }
0x1327   : > { %p42_p11 = scmp.ge.s32.totalorder %s45_s5, 4  }
0x1329   :  { %44 = sbr.rel (!%p42_p11) target bundleno = 27 (0x1b), region = 236 }
0x1330   :  { %3172 = vsyncpa [#allocation3], 1 }
0x1331   :  { %3174 = vsyncpa [#allocation3 + $0x1], 1 }
0x1332   :  { %3175 = vsyncpa [#allocation5], 1 }
0x1333   :  { %3176 = vsyncpa [#allocation8], 1 }
0x1334   :  { %3177 = vsyncpa [#allocation11], 1 }
0x1335   :  { %3178 = vsyncpa [#allocation14], 1 }
0x1336   :  { %3179 = vsyncpa [#allocation17], 1 }
0x1337   :  { %3180 = vsyncpa [#allocation20], 1 }
0x1338   :  { %3181 = vsyncpa [#allocation23], 1 }
0x1339   :  { %3182 = vsyncpa [#allocation26], 1 }
0x133a   :  { %3183 = vsyncpa [#allocation29], 1 }
0x133b   :  { %3184 = vsyncpa [#allocation32], 1 }

// kernel: decoder_forward.3
= control target key start
LH: loop header
LB: loop body
LE: loop exit
PB: predicated region body
PF: predicated region fallthrough
CT: control target
= control target key end

     0   :  { %s4756_s0 = inlined_call_operand.vmem [shape: f32[2,8,128], index: 0, kind: input, shape index: {}]   ;;  %s4757_s1 = inlined_call_operand.vmem [shape: f32[2,16,128], index: 1, kind: input, shape index: {}]   ;;  %s4758_s2 = inlined_call_operand.vmem [shape: f32[2,8,8], index: 2, kind: input, shape index: {}]   ;;  %s4759_s3 = inlined_call_operand.vmem [shape: f32[2,1,16], index: 3, kind: input, shape index: {}]   ;;  %s4760_s4 = inlined_call_operand.vmem [shape: f32[1,128], index: 4, kind: input, shape index: {}]   ;;  %s4761_s5 = inlined_call_operand.vmem [shape: f32[1,128], index: 5, kind: input, shape index: {}]   ;;  %s4762_s6 = inlined_call_operand.vmem [shape: bf16[128,384], index: 6, kind: input, shape index: {}]   ;;  %s4763_s7 = inlined_call_operand.vmem [shape: f32[1,384], index: 7, kind: input, shape index: {}]   ;;  %s4764_s8 = inlined_call_operand.vmem [shape: bf16[128,128], index: 8, kind: input, shape index: {}]   ;;  %s4765_s9 = inlined_call_operand.vmem [shape: f32[1,128], index: 9, kind: input, shape index: {}]   ;;  %s4766_s10 = inlined_call_operand.vmem [shape: f32[1,128], index: 10, kind: input, shape index: {}]   ;;  %s4767_s11 = inlined_call_operand.vmem [shape: f32[1,128], index: 11, kind: input, shape index: {}]   ;;  %s4768_s12 = inlined_call_operand.vmem [shape: bf16[128,128], index: 12, kind: input, shape index: {}]   ;;  %s4769_s13 = inlined_call_operand.vmem [shape: f32[1,128], index: 13, kind: input, shape index: {}]   ;;  %s4770_s14 = inlined_call_operand.vmem [shape: bf16[128,256], index: 14, kind: input, shape index: {}]   ;;  %s4771_s15 = inlined_call_operand.vmem [shape: f32[1,256], index: 15, kind: input, shape index: {}]   ;;  %s4772_s16 = inlined_call_operand.vmem [shape: bf16[128,128], index: 16, kind: input, shape index: {}]   ;;  %s4773_s17 = inlined_call_operand.vmem [shape: f32[1,128], index: 17, kind: input, shape index: {}]   ;;  %s4774_s18 = inlined_call_operand.vmem [shape: f32[1,128], index: 18, kind: input, shape index: {}]   ;;  %s4775_s19 = inlined_call_operand.vmem [shape: f32[1,128], index: 19, kind: input, shape index: {}]   ;;  %s4776_s20 = inlined_call_operand.vmem [shape: bf16[128,256], index: 20, kind: input, shape index: {}]   ;;  %s4777_s21 = inlined_call_operand.vmem [shape: f32[1,256], index: 21, kind: input, shape index: {}]   ;;  %s4778_s22 = inlined_call_operand.vmem [shape: bf16[256,128], index: 22, kind: input, shape index: {}]   ;;  %s4779_s23 = inlined_call_operand.vmem [shape: f32[1,128], index: 23, kind: input, shape index: {}]   ;;  %s4780_s24 = inlined_call_operand.vmem [shape: f32[1,128], index: 24, kind: input, shape index: {}]   ;;  %s4781_s25 = inlined_call_operand.vmem [shape: f32[1,128], index: 25, kind: input, shape index: {}]   ;;  %s4782_s26 = inlined_call_operand.hbm [shape: f32[2,8,128], index: 26, kind: output, shape index: {0}]   ;;  %s4783_s27 = inlined_call_operand.hbm [shape: f32[2,4,8,16], index: 27, kind: output, shape index: {1}]  }
   0x1   :  { %4800 = sst [smem:[#allocation14_spill]] %s4756_s0 }
   0x2   :  { %4801 = sst [smem:[#allocation15_spill]] %s4757_s1 }
   0x3   :  { %4802 = sst [smem:[#allocation16_spill]] %s4758_s2 }
   0x4   :  { %4803 = sst [smem:[#allocation17_spill]] %s4759_s3 }
   0x5   :  { %4804 = sst [smem:[#allocation18_spill]] %s4760_s4 }
   0x6   :  { %4805 = sst [smem:[#allocation19_spill]] %s4761_s5 }
   0x7   :  { %4806 = sst [smem:[#allocation20_spill]] %s4762_s6 }
   0x8   :  { %4807 = sst [smem:[#allocation21_spill]] %s4763_s7 }
   0x9   :  { %4808 = sst [smem:[#allocation22_spill]] %s4764_s8 }
   0xa   :  { %4809 = sst [smem:[#allocation23_spill]] %s4765_s9 }
   0xb   :  { %4810 = sst [smem:[#allocation24_spill]] %s4766_s10 }
   0xc   :  { %4811 = sst [smem:[#allocation25_spill]] %s4767_s11 }
   0xd   :  { %4812 = sst [smem:[#allocation26_spill]] %s4768_s12 }
   0xe   :  { %4813 = sst [smem:[#allocation27_spill]] %s4782_s26 }
   0xf   :  { %33 = vsyncpa [#allocation3], 0 }
  0x10   :  { %35 = vsyncpa [#allocation3 + $0x1], 0 }
  0x11   :  { %36 = vsyncpa [#allocation5], 0 }
  0x12   :  { %38 = vsyncpa [#allocation5 + $0x1], 0  ;;  %s4037_s7 = smov 0   ;;  %s4039_s4 = smov 0  }
  0x13   :  { %s4041_s8 = smov 0   ;;  %s4043_s30 = smov 0  }
  0x14 LB: > { %4814 = sst [smem:[#allocation8_spill]] %s3873_s7  ;;  %s4058_s9 = sadd.s32 4294967295, %s3885_s30   ;;  %s3885_s30 = sphi %s4043_s30, %s4845_s30   ;;  %s3881_s8 = sphi %s4041_s8, %s4847_s8   ;;  %s3877_s4 = sphi %s4039_s4, %s4849_s4   ;;  %s3873_s7 = sphi %s4037_s7, %s4848_s7  }
  0x15   : > { %4815 = sst [smem:[#allocation9_spill]] %s3881_s8  ;;  %s3170_s5 = sadd.s32 4294967294, %s3885_s30  }
  0x16   : > { %4816 = sst [smem:[#allocation10_spill]] %s3885_s30  ;;  %s4062_s28 = sadd.s32 1, %s3885_s30  }
  0x17   : > { %4817 = sst [smem:[#allocation11_spill]] %s4062_s28  ;;  %s617_s0 = sadd.s32 1, %s3881_s8 }
  0x18   : > { %s614_s10 = ssub.s32 %s3885_s30, %s4062_s28  ;;  %p627_p0 = scmp.ne.s32.totalorder %s3881_s8, %s3877_s4 }
  0x19   : > { %p615_p1 = scmp.eq.s32.totalorder %s614_s10, 0  ;;  %p628_p2 = scmp.eq.s32.totalorder %s4058_s9, 1 }
  0x1a   : > { %p633_p3 = scmp.ne.s32.totalorder %s3877_s4, %s3873_s7  ;;  %p634_p4 = scmp.eq.s32.totalorder %s3170_s5, 1 }
  0x1b   : > { %s4073_s29 = scalar_select %p615_p1, %s3881_s8, %s617_s0  }
  0x1c   : > { %p4075_p5 = por %p628_p2, %p627_p0  ;;  %p4079_p6 = por %p634_p4, %p633_p3 }
  0x1d   : > { %4818 = sst [smem:[#allocation12_spill]] %s4073_s29  ;;  %p3173_p7 = scmp.ge.s32.totalorder %s3885_s30, 1 }
  0x1e   : > { %s4820_s6 = scalar_select %p4079_p6, 1, 0 }
  0x1f   : > { %p772_p8 = scmp.lt.s32.totalorder %s3885_s30, 3 }
  0x20   : > { %4821 = sst [smem:[#allocation13_spill]] %s4820_s6 }
  0x21   : > { %p773_p9 = pnand %p3173_p7, %p772_p8 }
  0x22   : > { %p860_p10 = scmp.lt.s32.totalorder (!%p773_p9), %s4058_s9, 1  ;;  %s4822_s0 = sld [smem:[#allocation14_spill]] (!%p773_p9)  ;;  %v3887_v3 = vmov (!%p773_p9), 0.0   ;;  %v3888_v25 = vmov (!%p773_p9), 0   ;;  %vm3889_vm0 = vmmov (!%p773_p9), 0   ;;  %v945_v41 = vlaneseq (!%p773_p9) }
  0x23   : > { %776 = sbr.rel (%p773_p9) target bundleno = 4682 (0x124a), region = 124  ;;  %s4823_s28 = sld [smem:[#allocation20_spill]] (!%p773_p9)  ;;  %3403 = vmatprep.subr.bf16.mxu1 (!%p773_p9), %v3887_v3  ;;  %1120 = vmatprep.mubr.bf16.mxu0 (!%p773_p9), %v3888_v25  ;;  %vm1441_vm1 = vcmask (!%p773_p9), 1043456   ;;  %vm1193_vm2 = vcmask (!%p773_p9), 261120   ;;  %vm1389_vm4 = vcmask (!%p773_p9), 64512   ;;  %vm1636_vm5 = vcmask (!%p773_p9), 523264  }
  0x24   : > { %3419 = vmatprep.mubr.msk.bf16.mxu1 (!%p773_p9), %vm3889_vm0, %v3887_v3  ;;  %s4824_s8 = sld [smem:[#allocation18_spill]] (!%p773_p9)  ;;  %s4825_s6 = sld [smem:[#allocation19_spill]] (!%p773_p9)  ;;  %v946_v42 = vshrl.u32 (!%p773_p9), %v945_v41, 7  ;;  %vm1638_vm6 = vcmask (!%p773_p9), 785408   ;;  %vm2271_vm9 = vcmask (!%p773_p9), 130048  }
  0x25   : > { %s4826_s3 = sld [smem:[#allocation21_spill]] (!%p773_p9)  ;;  %s4795_s5 = smov (!%p773_p9), 64  }
  0x26   : > { %v955_v43 = vsub.s32 (!%p773_p9), 2, %v946_v42  ;;  %v4197_v45 = vsub.s32 (!%p773_p9), 1, %v946_v42  ;;  %v4199_v46 = vsub.s32 (!%p773_p9), 0, %v946_v42  ;;  %s4827_s7 = sld [smem:[#allocation16_spill]] (!%p773_p9)  ;;  %s4828_s30 = sld [smem:[#allocation22_spill]] (!%p773_p9) }
  0x27   : > { %s4831_s12 = sld [smem:[#allocation26_spill]] (!%p773_p9) }
  0x29   : > { %v3631_v1 = vld [vmem:[%s4823_s28 + $0x4] ss:$12 sps:$4 sm:$0xff] (!%p773_p9)   ;;  %v3633_v2 = vld [vmem:[%s4823_s28] ss:$12 sps:$4 sm:$0xff] (!%p773_p9)   ;;  %v3634_v4 = vld [vmem:[%s4823_s28 + $0x8] ss:$12 sps:$4 sm:$0xff] (!%p773_p9)  }
  0x2a   : > { %s4087_s11 = scalar_select %p860_p10, %s4058_s9, 1  ;;  %v3635_v5 = vld [vmem:[%s4823_s28 + $0x1c] ss:$12 sps:$4 sm:$0xff]   ;;  %v3637_v6 = vld [vmem:[%s4823_s28 + $0x18] ss:$12 sps:$4 sm:$0xff]   ;;  %1088 = vmatprep.subr.bf16.mxu0 %v3631_v1  ;;  %3404 = vmatpush3.bf16.msra.mxu1 %v3634_v4 }
  0x2b   : > { %v3638_v7 = vld [vmem:[%s4823_s28 + $0x20] ss:$12 sps:$4 sm:$0xff]   ;;  %1089 = vmatpush1.bf16.msra.mxu0 %v3633_v2  ;;  %3405 = vmatprep.subr.bf16.mxu1 %v3887_v3  ;;  %v3641_v13 = vld [vmem:[%s4823_s28 + $0x30] ss:$12 sps:$4 sm:$0xff]   ;;  %v3642_v14 = vld [vmem:[%s4823_s28 + $0x38] ss:$12 sps:$4 sm:$0xff]  }
  0x2c   : > { %s3176_s2 = sshll.u32 %s4087_s11, 3  ;;  %v3639_v8 = vld [vmem:[%s4823_s28 + $0x34] ss:$12 sps:$4 sm:$0xff]   ;;  %1090 = vmatprep.subr.bf16.mxu0 %v3635_v5  ;;  %v3643_v15 = vld [vmem:[%s4823_s28 + $0x4c] ss:$12 sps:$4 sm:$0xff]   ;;  %s3311_s26 = sshll.u32 %s4087_s11, 4 }
  0x2d   : > { %s863_s10 = scalar_lea.vmem %s4822_s0, %s3176_s2  ;;  %v3645_v16 = vld [vmem:[%s4823_s28 + $0x48] ss:$12 sps:$4 sm:$0xff]   ;;  %v3646_v17 = vld [vmem:[%s4823_s28 + $0x50] ss:$12 sps:$4 sm:$0xff]   ;;  %v3649_v19 = vld [vmem:[%s4823_s28 + $0x60] ss:$12 sps:$4 sm:$0xff]  }
  0x2e   : > { %v4095_v0 = vld [vmem:[%s863_s10] sm:$0xff]  ;;  %3406 = vmatpush3.bf16.msra.mxu1 %v3638_v7  ;;  %v3650_v20 = vld [vmem:[%s4823_s28 + $0x68] ss:$12 sps:$4 sm:$0xff]   ;;  %v3657_v26 = vld [vmem:[%s4823_s28 + $0x90] ss:$12 sps:$4 sm:$0xff]   ;;  %s4797_s0 = smov 96  }
  0x2f   : > { %884 = vadd.xlane.f32.xlu0 %v4095_v0  ;;  %1091 = vmatpush1.bf16.msra.mxu0 %v3637_v6  ;;  %v3647_v18 = vld [vmem:[%s4823_s28 + $0x64] ss:$12 sps:$4 sm:$0xff]   ;;  %v3651_v21 = vld [vmem:[%s4823_s28 + $0x7c] ss:$12 sps:$4 sm:$0xff]   ;;  %v3654_v23 = vld [vmem:[%s4823_s28 + $0x80] ss:$12 sps:$4 sm:$0xff]  }
  0x30   : > { %1092 = vmatprep.subr.bf16.mxu0 %v3639_v8  ;;  %3407 = vmatprep.subr.bf16.mxu1 %v3887_v3  ;;  %v3653_v22 = vld [vmem:[%s4823_s28 + $0x78] ss:$12 sps:$4 sm:$0xff]   ;;  %v3655_v24 = vld [vmem:[%s4823_s28 + $0x94] ss:$12 sps:$4 sm:$0xff]   ;;  %v3662_v30 = vld [vmem:[%s4823_s28 + $0xb0] ss:$12 sps:$4 sm:$0xff]  }
  0x31   : > { %v3658_v27 = vld [vmem:[%s4823_s28 + $0x98] ss:$12 sps:$4 sm:$0xff]   ;;  %v3661_v29 = vld [vmem:[%s4823_s28 + $0xa8] ss:$12 sps:$4 sm:$0xff]   ;;  %v3180_v35 = vld [vmem:[%s4824_s8] ss:$0 sm:$0xff] }
  0x32   : > { %3408 = vmatpush3.bf16.msra.mxu1 %v3642_v14  ;;  %v3659_v28 = vld [vmem:[%s4823_s28 + $0xac] ss:$12 sps:$4 sm:$0xff]   ;;  %v3181_v37 = vld [vmem:[%s4825_s6] ss:$0 sm:$0xff]  ;;  %s4793_s10 = smov 32   ;;  %s872_s6 = scalar_lea.vmem %s4827_s7, %s3176_s2 }
  0x33   : > { %1093 = vmatpush1.bf16.msra.mxu0 %v3641_v13  ;;  %3409 = vmatprep.subr.bf16.mxu1 %v3887_v3  ;;  %v943_v44 = vld [vmem:[%s4826_s3] sm:$0x7]  ;;  %s4829_s3 = smov %s4828_s30  ;;  %s4830_s7 = sld [smem:[#allocation23_spill]] }
  0x34   : > { %1094 = vmatprep.subr.bf16.mxu0 %v3643_v15  ;;  %v956_v47 = vrot.slane %v943_v44, %v955_v43  ;;  %v952_v48 = vrot.slane %v943_v44, %v4197_v45  ;;  %v948_v51 = vrot.slane %v943_v44, %v4199_v46  ;;  %v880_v13 = vld [vmem:[%s872_s6] sm:$0xff]  ;;  %s4832_s8 = sld [smem:[#allocation15_spill]]  ;;  %s4836_s2 = smov 64  }
  0x35   : > { %vm1382_vm3 = vcmp.gt.f32.partialorder %v880_v13, 0.0 }
  0x36   : > { %3410 = vmatpush3.bf16.msra.mxu1 %v3646_v17 }
  0x37   : > { %1095 = vmatpush1.bf16.msra.mxu0 %v3645_v16  ;;  %3411 = vmatprep.subr.bf16.mxu1 %v3887_v3 }
  0x38   : > { %1096 = vmatprep.subr.bf16.mxu0 %v3647_v18 }
  0x3a   : > { %3412 = vmatpush3.bf16.msra.mxu1 %v3650_v20 }
  0x3b   : > { %1097 = vmatpush1.bf16.msra.mxu0 %v3649_v19  ;;  %3413 = vmatprep.subr.bf16.mxu1 %v3887_v3 }
  0x3c   : > { %1098 = vmatprep.subr.bf16.mxu0 %v3651_v21 }
  0x3e   : > { %3414 = vmatpush3.bf16.msra.mxu1 %v3654_v23 }
  0x3f   : > { %1099 = vmatpush1.bf16.msra.mxu0 %v3653_v22  ;;  %3415 = vmatprep.subr.bf16.mxu1 %v3887_v3 }
  0x40   : > { %1100 = vmatprep.subr.bf16.mxu0 %v3655_v24 }
  0x42   : > { %3416 = vmatpush3.bf16.msra.mxu1 %v3658_v27 }
  0x43   : > { %1101 = vmatpush1.bf16.msra.mxu0 %v3657_v26  ;;  %3417 = vmatprep.subr.bf16.mxu1 %v3887_v3 }
  0x44   : > { %1102 = vmatprep.subr.bf16.mxu0 %v3659_v28 }
  0x46   : > { %3418 = vmatpush3.bf16.msra.mxu1 %v3662_v30 }
  0x47   : > { %1103 = vmatpush1.bf16.msra.mxu0 %v3661_v29  ;;  %3423 = vmatprep.subr.bf16.mxu1 %v3887_v3 }
  0x48   : > { %3447 = vmatprep.subr.bf16.mxu0 %v3887_v3 }
  0xbc   : > { %v885_v9 = vpop.xlane.xlu0 %884 }
  0xbd   : > { %v887_v10 = vmul.f32 0.0078125, %v885_v9 }
  0xbf   : > { %v888_v11 = vsub.f32 %v4095_v0, %v887_v10 }
  0xc1   : > { %v889_v12 = vmul.f32 %v888_v11, %v888_v11 }
  0xc3   : > { %890 = vadd.xlane.f32.xlu0 %v889_v12 }
 0x150   : > { %v891_v31 = vpop.xlane.xlu0 %890 }
 0x151   : > { %v892_v32 = vmul.f32 0.0078125, %v891_v31 }
 0x153   : > { %v893_v33 = vadd.f32 1e-05, %v892_v32 }
 0x155   : > { %3751 = vrsqrt.f32 %v893_v33 }
 0x15f   : > { %v3752_v34 = vpop.eup %3751 }
 0x160   : > { %v895_v36 = vmul.f32 %v3752_v34, %v888_v11 }
 0x162   : > { %v902_v38 = vmul.f32 %v3180_v35, %v895_v36 }
 0x164   : > { %v909_v39 = vadd.f32 %v3181_v37, %v902_v38 }
 0x166   : > { %v910_v40 = vpack.c.bf16 %v909_v39, %v909_v39 }
 0x168   : > { %1121 = vmatmul.mubr.bf16.vlgmr.msra.gmra.mrb[0].mxu0 %v910_v40  ;;  %3420 = vmatmul.mubr.bf16.vlgmr.msra.gmra.mrb[0].mxu1 %v910_v40 }
 0x169   : > { %3425 = vmatprep.mubr.msk.bf16.mxu1 %vm3889_vm0, %v3887_v3  ;;  %3449 = vmatprep.mubr.msk.bf16.mxu0 %vm3889_vm0, %v3887_v3 }
 0x23b   : > { %v1122_v49 = vpop.f32.mrb[0].mxu0  ;;  %v1163_v50 = vpop.f32.mrb[0].mxu1 }
 0x23c   : > { %v1164_v52 = vadd.f32 %v1163_v50, %v956_v47  ;;  %v1124_v53 = vpop.f32.mrb[1].mxu0  ;;  %v3421_v54 = vpop.f32.mrb[1].mxu1  ;;  %v1123_v62 = vadd.f32 %v1122_v49, %v948_v51 }
 0x23d   : > { %v1125_v55 = vadd.f32 %v1124_v53, %v952_v48  ;;  %v1126_v56 = vpop.f32.mrb[2].mxu0  ;;  %v1166_v57 = vpop.f32.mrb[2].mxu1 }
 0x23e   : > { %v4203_v58 = vpack.c.bf16 %v1164_v52, %v1164_v52  ;;  %v1127_v59 = vpop.f32.mrb[3].mxu0  ;;  %v3422_v60 = vpop.f32.mrb[3].mxu1  ;;  %v1169_v2 = vpack.c.bf16 %v1123_v62, %v1123_v62 }
 0x23f   : > { %v1177_v61 = vpack.c.bf16 %v1125_v55, %v1125_v55 }
 0x240   : > { %v1443_v63 = vsel %vm1441_vm1, %v4203_v58, 0 }
 0x241   : > { %3448 = vmatpush3.bf16.msra.mxu0 %v1443_v63  ;;  %1181 = vrot.lane.b32.xlu0 %v1177_v61, %s4795_s5  ;;  %v1198_v1 = vsel %vm1193_vm2, %v1177_v61, 0 }
 0x242   : > { %1179 = vrot.lane.b32.xlu1 %v1177_v61, %s4797_s0  ;;  %3424 = vmatpush3.bf16.xpose.msra.mxu1 %v1198_v1 }
 0x243   : > { %3429 = vmatprep.subr.bf16.mxu1 %v3887_v3  ;;  %3459 = vmatprep.subr.bf16.mxu0 %v3887_v3 }
 0x246   : > { %1171 = vrot.lane.b32.xlu1 %v1169_v2, %s4797_s0 }
 0x249   : > { %3426 = vmatmul.mubr.msk.bf16.vlgmr.msra.gmra.mrb[4].mxu1 %vm1193_vm2, %v1169_v2 }
 0x24a   : > { %1173 = vrot.lane.b32.xlu1 %v1169_v2, %s4795_s5  ;;  %3431 = vmatprep.mubr.msk.bf16.mxu1 %vm3889_vm0, %v3887_v3 }
 0x24e   : > { %1183 = vrot.lane.b32.xlu1 %v1177_v61, %s4793_s10 }
 0x252   : > { %1175 = vrot.lane.b32.xlu1 %v1169_v2, %s4793_s10 }
 0x2b3   : > { %v1182_v7 = vpop.permute.xlu0 %1181 }
 0x2b4   : > { %v1180_v4 = vpop.permute.xlu1 %1179  ;;  %v1290_v9 = vsel %vm1193_vm2, %v1182_v7, 0 }
 0x2b5   : > { %v1244_v5 = vsel %vm1193_vm2, %v1180_v4, 0 }
 0x2b6   : > { %3430 = vmatpush3.bf16.xpose.msra.mxu1 %v1244_v5 }
 0x2b7   : > { %3435 = vmatprep.subr.bf16.mxu1 %v3887_v3 }
 0x2b8   : > { %v1172_v6 = vpop.permute.xlu1 %1171 }
 0x2bc   : > { %v1174_v8 = vpop.permute.xlu1 %1173 }
 0x2bd   : > { %3432 = vmatmul.mubr.msk.bf16.vlgmr.msra.gmra.mrb[8].mxu1 %vm1193_vm2, %v1172_v6 }
 0x2be   : > { %3436 = vmatpush3.bf16.xpose.msra.mxu1 %v1290_v9  ;;  %3437 = vmatprep.mubr.msk.bf16.mxu1 %vm3889_vm0, %v3887_v3 }
 0x2bf   : > { %3441 = vmatprep.subr.bf16.mxu1 %v3887_v3 }
 0x2c0   : > { %v1184_v10 = vpop.permute.xlu1 %1183 }
 0x2c1   : > { %v1336_v11 = vsel %vm1193_vm2, %v1184_v10, 0 }
 0x2c4   : > { %v1176_v12 = vpop.permute.xlu1 %1175 }
 0x2c5   : > { %3438 = vmatmul.mubr.msk.bf16.vlgmr.msra.gmra.mrb[12].mxu1 %vm1193_vm2, %v1174_v8 }
 0x2c6   : > { %3442 = vmatpush3.bf16.xpose.msra.mxu1 %v1336_v11  ;;  %3443 = vmatprep.mubr.msk.bf16.mxu1 %vm3889_vm0, %v3887_v3 }
 0x2c7   : > { %3453 = vmatprep.subr.bf16.mxu1 %v3887_v3 }
 0x2cd   : > { %3444 = vmatmul.mubr.msk.bf16.vlgmr.msra.gmra.mrb[16].mxu1 %vm1193_vm2, %v1176_v12 }
 0x2ce   : > { %3455 = vmatprep.mubr.msk.bf16.mxu1 %vm3889_vm0, %v3887_v3 }
 0x31c   : > { %v1234_v14 = vpop.f32.mrb[4].mxu1 }
 0x31d   : > { %v1378_v15 = vmul.f32 0.17677669, %v1234_v14  ;;  %v3427_v16 = vpop.f32.mrb[5].mxu1 }
 0x31e   : > { %v1237_v17 = vpop.f32.mrb[6].mxu1 }
 0x31f   : > { %v3428_v18 = vpop.f32.mrb[7].mxu1  ;;  %v1385_v19 = vsel %vm1382_vm3, %v1378_v15, -1e+09 }
 0x320   : > { %v1390_v20 = vsel %vm1389_vm4, %v1385_v19, -inf }
 0x321   : > { %1391 = vmax.xlane.f32.xlu1 %v1390_v20 }
 0x390   : > { %v1280_v21 = vpop.f32.mrb[8].mxu1 }
 0x391   : > { %v1379_v22 = vmul.f32 0.17677669, %v1280_v21  ;;  %v3433_v23 = vpop.f32.mrb[9].mxu1 }
 0x392   : > { %v1283_v24 = vpop.f32.mrb[10].mxu1 }
 0x393   : > { %v3434_v26 = vpop.f32.mrb[11].mxu1  ;;  %v1386_v27 = vsel %vm1382_vm3, %v1379_v22, -1e+09 }
 0x394   : > { %v1393_v28 = vsel %vm1389_vm4, %v1386_v27, -inf }
 0x395   : > { %1394 = vmax.xlane.f32.xlu0 %v1393_v28 }
 0x398   : > { %v1326_v29 = vpop.f32.mrb[12].mxu1 }
 0x399   : > { %v1380_v30 = vmul.f32 0.17677669, %v1326_v29  ;;  %v3439_v31 = vpop.f32.mrb[13].mxu1 }
 0x39a   : > { %v1329_v32 = vpop.f32.mrb[14].mxu1  ;;  %v3664_v31 = vld [vmem:[%s4829_s3 + $0x8] sm:$0xff]  }
 0x39b   : > { %v3440_v33 = vpop.f32.mrb[15].mxu1  ;;  %v1387_v34 = vsel %vm1382_vm3, %v1380_v30, -1e+09  ;;  %v3663_v30 = vld [vmem:[%s4828_s30] sm:$0xff]   ;;  %s4833_s30 = sld [smem:[#allocation24_spill]] }
 0x39c   : > { %v1396_v35 = vsel %vm1389_vm4, %v1387_v34, -inf }
 0x39d   : > { %1397 = vmax.xlane.f32.xlu1 %v1396_v35 }
 0x3a0   : > { %v1372_v36 = vpop.f32.mrb[16].mxu1 }
 0x3a1   : > { %v1381_v37 = vmul.f32 0.17677669, %v1372_v36  ;;  %v3445_v38 = vpop.f32.mrb[17].mxu1 }
 0x3a2   : > { %v1375_v39 = vpop.f32.mrb[18].mxu1 }
 0x3a3   : > { %v3446_v40 = vpop.f32.mrb[19].mxu1  ;;  %v1388_v41 = vsel %vm1382_vm3, %v1381_v37, -1e+09  ;;  %v3666_v37 = vld [vmem:[%s4829_s3 + $0x18] sm:$0xff]  }
 0x3a4   : > { %v1399_v42 = vsel %vm1389_vm4, %v1388_v41, -inf }
 0x3a5   : > { %1400 = vmax.xlane.f32.xlu1 %v1399_v42 }
 0x3ae   : > { %v1392_v43 = vpop.xlane.xlu1 %1391 }
 0x3af   : > { %v1402_v44 = vsub.f32 %v1385_v19, %v1392_v43  ;;  %v3668_v43 = vld [vmem:[%s4829_s3 + $0x28] sm:$0xff]  }
 0x3b1   : > { %v1406_v47 = vmul.f32 1.442695, %v1402_v44  ;;  %v3669_v44 = vld [vmem:[%s4829_s3 + $0x30] sm:$0xff]  }
 0x3b3   : > { %3753 = vpow2.f32 %v1406_v47  ;;  %v3670_v47 = vld [vmem:[%s4829_s3 + $0x38] sm:$0xff]  }
 0x3bd   : > { %v3754_v48 = vpop.eup %3753 }
 0x3be   : > { %v1414_v49 = vsel %vm1389_vm4, %v3754_v48, 0.0 }
 0x3bf   : > { %1415 = vadd.xlane.f32.xlu0 %v1414_v49 }
 0x422   : > { %v1395_v50 = vpop.xlane.xlu0 %1394 }
 0x423   : > { %v1403_v51 = vsub.f32 %v1386_v27, %v1395_v50 }
 0x425   : > { %v1408_v52 = vmul.f32 1.442695, %v1403_v51 }
 0x427   : > { %3755 = vpow2.f32 %v1408_v52 }
 0x42a   : > { %v1398_v53 = vpop.xlane.xlu1 %1397 }
 0x42b   : > { %v1404_v54 = vsub.f32 %v1387_v34, %v1398_v53  ;;  %v3665_v34 = vld [vmem:[%s4829_s3 + $0x10] sm:$0xff]  }
 0x42d   : > { %v1410_v55 = vmul.f32 1.442695, %v1404_v54 }
 0x42f   : > { %3757 = vpow2.f32 %v1410_v55 }
 0x431   : > { %v3756_v56 = vpop.eup %3755 }
 0x432   : > { %v1417_v57 = vsel %vm1389_vm4, %v3756_v56, 0.0  ;;  %v1401_v62 = vpop.xlane.xlu1 %1400 }
 0x433   : > { %1418 = vadd.xlane.f32.xlu1 %v1417_v57  ;;  %v1405_v63 = vsub.f32 %v1388_v41, %v1401_v62  ;;  %v3667_v41 = vld [vmem:[%s4829_s3 + $0x20] sm:$0xff]   ;;  %s868_s3 = scalar_lea.vmem %s4832_s8, %s3311_s26  ;;  %s4837_s26 = smov 32  }
 0x434   : > { %s4838_s8 = sld [smem:[#allocation17_spill]] }
 0x435   : > { %v1412_v1 = vmul.f32 1.442695, %v1405_v63 }
 0x439   : > { %v3758_v59 = vpop.eup %3757 }
 0x43a   : > { %v1420_v60 = vsel %vm1389_vm4, %v3758_v59, 0.0 }
 0x43b   : > { %1421 = vadd.xlane.f32.xlu0 %v1420_v60 }
 0x444   : > { %1189 = vrot.lane.b32.xlu1 %v4203_v58, %s4795_s5 }
 0x44c   : > { %v1416_v61 = vpop.xlane.xlu0 %1415 }
 0x44d   : > { %3759 = vrcp.f32 %v1416_v61  ;;  %v3222_v61 = vld [vmem:[%s4830_s7] ss:$0 sm:$0xff]  ;;  %s4835_s7 = smov 96  }
 0x44e   : > { %3761 = vpow2.f32 %v1412_v1 }
 0x451   : > { %1187 = vrot.lane.b32.xlu0 %v4203_v58, %s4797_s0 }
 0x457   : > { %v3760_v2 = vpop.eup %3759 }
 0x458   : > { %v1430_v4 = vmul.f32 %v3760_v2, %v3754_v48  ;;  %v3762_v6 = vpop.eup %3761 }
 0x459   : > { %v1423_v7 = vsel %vm1389_vm4, %v3762_v6, 0.0 }
 0x45a   : > { %v1434_v5 = vpack.c.bf16 %v1430_v4, %v1430_v4 }
 0x45c   : > { %3450 = vmatmul.mubr.msk.bf16.vlgmr.msra.gmra.mrb[4].mxu0 %vm1389_vm4, %v1434_v5  ;;  %v3671_v5 = vld [vmem:[%s4770_s14] ss:$8 sps:$4 sm:$0xff]  }
 0x45d   : > { %3461 = vmatprep.mubr.msk.bf16.mxu0 %vm3889_vm0, %v3887_v3 }
 0x468   : > { %1424 = vadd.xlane.f32.xlu1 %v1423_v7  ;;  %v3676_v7 = vld [vmem:[%s4770_s14 + $0x14] ss:$8 sps:$4 sm:$0xff]  }
 0x479   : > { %1191 = vrot.lane.b32.xlu1 %v4203_v58, %s4793_s10 }
 0x4c0   : > { %v1419_v8 = vpop.xlane.xlu1 %1418 }
 0x4c1   : > { %3763 = vrcp.f32 %v1419_v8  ;;  %v3674_v8 = vld [vmem:[%s4770_s14 + $0x10] ss:$8 sps:$4 sm:$0xff]  }
 0x4c4   : > { %v1190_v9 = vpop.permute.xlu1 %1189 }
 0x4c5   : > { %v1535_v10 = vsel %vm1441_vm1, %v1190_v9, 0  ;;  %v3679_v9 = vld [vmem:[%s4770_s14 + $0x24] ss:$8 sps:$4 sm:$0xff]  }
 0x4c6   : > { %3460 = vmatpush3.bf16.msra.mxu0 %v1535_v10  ;;  %v3687_v10 = vld [vmem:[%s4831_s12 + $0x8] sm:$0xff]  }
 0x4c7   : > { %3471 = vmatprep.subr.bf16.mxu0 %v3887_v3 }
 0x4c8   : > { %v1422_v11 = vpop.xlane.xlu0 %1421 }
 0x4c9   : > { %3765 = vrcp.f32 %v1422_v11  ;;  %v3677_v11 = vld [vmem:[%s4770_s14 + $0x20] ss:$8 sps:$4 sm:$0xff]  }
 0x4cb   : > { %v3764_v12 = vpop.eup %3763 }
 0x4cc   : > { %v1431_v13 = vmul.f32 %v3764_v12, %v3756_v56  ;;  %v1188_v14 = vpop.permute.xlu0 %1187  ;;  %v3682_v12 = vld [vmem:[%s4770_s14 + $0x34] ss:$8 sps:$4 sm:$0xff]  }
 0x4cd   : > { %v1489_v15 = vsel %vm1441_vm1, %v1188_v14, 0  ;;  %v3686_v14 = vld [vmem:[%s4770_s14 + $0x44] ss:$8 sps:$4 sm:$0xff]  }
 0x4ce   : > { %3454 = vmatpush3.bf16.msra.mxu1 %v1489_v15  ;;  %v1435_v16 = vpack.c.bf16 %v1431_v13, %v1431_v13  ;;  %v3680_v13 = vld [vmem:[%s4770_s14 + $0x30] ss:$8 sps:$4 sm:$0xff]   ;;  %v3684_v15 = vld [vmem:[%s4770_s14 + $0x40] ss:$8 sps:$4 sm:$0xff]  }
 0x4cf   : > { %3465 = vmatprep.subr.bf16.mxu1 %v3887_v3 }
 0x4d1   : > { %3456 = vmatmul.mubr.msk.bf16.vlgmr.msra.gmra.mrb[20].mxu1 %vm1389_vm4, %v1435_v16  ;;  %v3690_v16 = vld [vmem:[%s4770_s14 + $0x54] ss:$8 sps:$4 sm:$0xff]  }
 0x4d2   : > { %3467 = vmatprep.mubr.msk.bf16.mxu1 %vm3889_vm0, %v3887_v3 }
 0x4d3   : > { %v3766_v58 = vpop.eup %3765 }
 0x4d4   : > { %v1432_v17 = vmul.f32 %v3766_v58, %v3758_v59  ;;  %v3688_v58 = vld [vmem:[%s4770_s14 + $0x50] ss:$8 sps:$4 sm:$0xff]  }
 0x4d6   : > { %v1436_v18 = vpack.c.bf16 %v1432_v17, %v1432_v17 }
 0x4d8   : > { %3462 = vmatmul.mubr.msk.bf16.vlgmr.msra.gmra.mrb[8].mxu0 %vm1389_vm4, %v1436_v18 }
 0x4d9   : > { %3487 = vmatprep.mubr.msk.bf16.mxu0 %vm3889_vm0, %v3887_v3  ;;  %3472 = vmatpush3.bf16.msra.mxu0 %v3663_v30  ;;  %v879_v30 = vld [vmem:[%s868_s3 + $0x8] sm:$0xff] }
 0x4da   : > { %3473 = vmatprep.subr.bf16.mxu0 %v3887_v3 }
 0x4dd   : > { %3474 = vmatpush3.bf16.msra.mxu0 %v3664_v31 }
 0x4de   : > { %3475 = vmatprep.subr.bf16.mxu0 %v3887_v3 }
 0x4e1   : > { %3476 = vmatpush3.bf16.msra.mxu0 %v3665_v34  ;;  %v3702_v34 = vld [vmem:[%s4831_s12 + $0x38] sm:$0xff]  }
 0x4e2   : > { %3477 = vmatprep.subr.bf16.mxu0 %v3887_v3 }
 0x4e5   : > { %3478 = vmatpush3.bf16.msra.mxu0 %v3666_v37 }
 0x4e6   : > { %3479 = vmatprep.subr.bf16.mxu0 %v3887_v3 }
 0x4e9   : > { %3480 = vmatpush3.bf16.msra.mxu0 %v3667_v41 }
 0x4ea   : > { %3481 = vmatprep.subr.bf16.mxu0 %v3887_v3 }
 0x4ed   : > { %3482 = vmatpush3.bf16.msra.mxu0 %v3668_v43 }
 0x4ee   : > { %3483 = vmatprep.subr.bf16.mxu0 %v3887_v3 }
 0x4f1   : > { %3484 = vmatpush3.bf16.msra.mxu0 %v3669_v44 }
 0x4f2   : > { %3485 = vmatprep.subr.bf16.mxu0 %v3887_v3 }
 0x4f5   : > { %v1425_v19 = vpop.xlane.xlu1 %1424  ;;  %3486 = vmatpush3.bf16.msra.mxu0 %v3670_v47  ;;  %v1910_v47 = vld [vmem:[%s4771_s15] sm:$0x3] }
 0x4f6   : > { %3767 = vrcp.f32 %v1425_v19 }
 0x4f9   : > { %v1192_v20 = vpop.permute.xlu1 %1191 }
 0x4fa   : > { %v1581_v21 = vsel %vm1441_vm1, %v1192_v20, 0 }
 0x4fb   : > { %3466 = vmatpush3.bf16.msra.mxu1 %v1581_v21  ;;  %v3691_v21 = vld [vmem:[%s4831_s12 + $0x10] sm:$0xff]  }
 0x4fc   : > { %3491 = vmatprep.subr.bf16.mxu1 %v3887_v3 }
 0x500   : > { %v3768_v22 = vpop.eup %3767 }
 0x501   : > { %v1433_v23 = vmul.f32 %v3768_v22, %v3762_v6  ;;  %v3673_v6 = vld [vmem:[%s4770_s14 + $0x4] ss:$8 sps:$4 sm:$0xff]  }
 0x502   : > { %2002 = vmatprep.subr.bf16.mxu0 %v3673_v6  ;;  %v3694_v22 = vld [vmem:[%s4770_s14 + $0x64] ss:$8 sps:$4 sm:$0xff]  }
 0x503   : > { %v1437_v24 = vpack.c.bf16 %v1433_v23, %v1433_v23  ;;  %v3692_v23 = vld [vmem:[%s4770_s14 + $0x60] ss:$8 sps:$4 sm:$0xff]  }
 0x505   : > { %3468 = vmatmul.mubr.msk.bf16.vlgmr.msra.gmra.mrb[24].mxu1 %vm1389_vm4, %v1437_v24  ;;  %v3695_v24 = vld [vmem:[%s4831_s12 + $0x18] sm:$0xff]  }
 0x506   : > { %3507 = vmatprep.mubr.msk.bf16.mxu1 %vm3889_vm0, %v3887_v3 }
 0x52f   : > { %v1479_v26 = vpop.f32.mrb[4].mxu0 }
 0x530   : > { %v3451_v27 = vpop.f32.mrb[5].mxu0 }
 0x531   : > { %v1482_v28 = vpop.f32.mrb[6].mxu0  ;;  %v3698_v27 = vld [vmem:[%s4770_s14 + $0x74] ss:$8 sps:$4 sm:$0xff]  }
 0x532   : > { %v3452_v29 = vpop.f32.mrb[7].mxu0  ;;  %v3699_v28 = vld [vmem:[%s4831_s12 + $0x20] sm:$0xff]  }
 0x533   : > { %v878_v29 = vld [vmem:[%s868_s3] sm:$0xff] }
 0x534   : > { %v1893_v31 = vpack.c.bf16 %v879_v30, %v878_v29 }
 0x5a4   : > { %v1525_v32 = vpop.f32.mrb[20].mxu1 }
 0x5a5   : > { %1624 = vrot.lane.b32.xlu0 %v1525_v32, %s4793_s10  ;;  %v3457_v33 = vpop.f32.mrb[21].mxu1  ;;  %v3700_v32 = vld [vmem:[%s4831_s12 + $0x28] sm:$0xff]   ;;  %s3312_s10 = sshll.u32 %s4058_s9, 9 }
 0x5a6   : > { %v1528_v35 = vpop.f32.mrb[22].mxu1  ;;  %v3701_v33 = vld [vmem:[%s4831_s12 + $0x30] sm:$0xff]  }
 0x5a7   : > { %v3458_v36 = vpop.f32.mrb[23].mxu1 }
 0x5ab   : > { %v1571_v38 = vpop.f32.mrb[8].mxu0 }
 0x5ac   : > { %1628 = vrot.lane.b32.xlu1 %v1571_v38, %s4795_s5  ;;  %v3463_v39 = vpop.f32.mrb[9].mxu0  ;;  %s4834_s5 = sld [smem:[#allocation25_spill]] }
 0x5ad   : > { %v1574_v40 = vpop.f32.mrb[10].mxu0  ;;  %v3223_v39 = vld [vmem:[%s4833_s30] ss:$0 sm:$0xff] }
 0x5ae   : > { %v3464_v42 = vpop.f32.mrb[11].mxu0 }
 0x5b2   : > { %v3224_v41 = vld [vmem:[%s4834_s5] ss:$0 sm:$0xff]  ;;  %s875_s5 = scalar_lea.vmem %s4838_s8, %s4087_s11  ;;  %s4482_s11 = sand.u32 1, %s3877_s4  }
 0x5d8   : > { %v1617_v48 = vpop.f32.mrb[24].mxu1 }
 0x5d9   : > { %1632 = vrot.lane.b32.xlu0 %v1617_v48, %s4797_s0  ;;  %v3469_v49 = vpop.f32.mrb[25].mxu1  ;;  %v1915_v48 = vrot.slane %v1910_v47, %v4199_v46  ;;  %s3175_s0 = sshll.u32 %s4482_s11, 5 }
 0x5da   : > { %v1620_v50 = vpop.f32.mrb[26].mxu1  ;;  %v1919_v49 = vrot.slane %v1910_v47, %v4197_v45  ;;  %s4487_s29 = scalar_lea.vmem [#allocation4], %s3175_s0  ;;  %s3017_s0 = scalar_lea.sflag [#allocation5], %s4482_s11 }
 0x5db   : > { %v3470_v51 = vpop.f32.mrb[27].mxu1  ;;  %s3043_s30 = sshll.u32 %s4487_s29, 4  ;;  %s4671_s30 = int_to_ptr.vmem [resolvable:$true] %s3043_s30 }
 0x5dc   : > { %s3791_s3 = scalar_lea.vmem %s4671_s30, 512 }
 0x5dd   : > { %p3792_p11 = scmp.ne.s32.totalorder %s4671_s30, %s3791_s3 }
 0x5df   : > { %p3793_p12 = pnand %p3792_p11, %p4075_p5 }
 0x5e1   : > { %p3794_p13 = pneg %p3793_p12 }
 0x617   : > { %v1625_v52 = vpop.permute.xlu0 %1624 }
 0x618   : > { %v1635_v54 = vsel %vm1193_vm2, %v1479_v26, %v1625_v52  ;;  %v3696_v26 = vld [vmem:[%s4770_s14 + $0x70] ss:$8 sps:$4 sm:$0xff]  }
 0x61e   : > { %v1629_v53 = vpop.permute.xlu1 %1628 }
 0x61f   : > { %v1637_v55 = vsel %vm1636_vm5, %v1635_v54, %v1629_v53 }
 0x64b   : > { %v1633_v56 = vpop.permute.xlu0 %1632 }
 0x64c   : > { %v1639_v57 = vsel %vm1638_vm6, %v1637_v55, %v1633_v56 }
 0x64d   : > { %v1640_v59 = vpack.c.bf16 %v1639_v57, %v1639_v57 }
 0x64f   : > { %3488 = vmatmul.mubr.bf16.vlgmr.msra.gmra.mrb[12].mxu0 %v1640_v59 }
 0x650   : > { %2034 = vmatprep.mubr.bf16.mxu0 %v3888_v25  ;;  %2003 = vmatpush1.bf16.msra.mxu0 %v3671_v5 }
 0x651   : > { %2004 = vmatprep.subr.bf16.mxu0 %v3676_v7 }
 0x654   : > { %2005 = vmatpush1.bf16.msra.mxu0 %v3674_v8 }
 0x655   : > { %2006 = vmatprep.subr.bf16.mxu0 %v3679_v9 }
 0x658   : > { %2007 = vmatpush1.bf16.msra.mxu0 %v3677_v11 }
 0x659   : > { %2008 = vmatprep.subr.bf16.mxu0 %v3682_v12 }
 0x65c   : > { %2009 = vmatpush1.bf16.msra.mxu0 %v3680_v13 }
 0x65d   : > { %2010 = vmatprep.subr.bf16.mxu0 %v3686_v14 }
 0x660   : > { %2011 = vmatpush1.bf16.msra.mxu0 %v3684_v15 }
 0x661   : > { %2012 = vmatprep.subr.bf16.mxu0 %v3690_v16  ;;  %v881_v16 = vld [vmem:[%s875_s5] sm:$0x1]  ;;  %s4676_s5 = scalar_lea.hbm %s4783_s27, %s3312_s10 }
 0x662   : > { %vm2260_vm7 = vcmp.gt.f32.partialorder %v881_v16, 0.0 }
 0x664   : > { %2013 = vmatpush1.bf16.msra.mxu0 %v3688_v58  ;;  %v2261_v58 = vsel %vm2260_vm7, 1, %v3888_v25 }
 0x665   : > { %2014 = vmatprep.subr.bf16.mxu0 %v3694_v22 }
 0x668   : > { %2015 = vmatpush1.bf16.msra.mxu0 %v3692_v23 }
 0x669   : > { %2016 = vmatprep.subr.bf16.mxu0 %v3698_v27 }
 0x66c   : > { %2017 = vmatpush1.bf16.msra.mxu0 %v3696_v26 }
 0x66d   : > { %3535 = vmatprep.subr.bf16.mxu0 %v3887_v3 }
 0x66f   : > { %2035 = vmatmul.mubr.bf16.vlgmr.msra.gmra.mrb[16].mxu0 %v1893_v31 }
 0x670   : > { %3537 = vmatprep.mubr.msk.bf16.mxu0 %vm3889_vm0, %v3887_v3 }
 0x722   : > { %v1739_v60 = vpop.f32.mrb[12].mxu0 }
 0x723   : > { %v1745_v62 = vadd.f32 %v1739_v60, %v4095_v0  ;;  %v3489_v63 = vpop.f32.mrb[13].mxu0  ;;  %v3683_v0 = vld [vmem:[%s4831_s12] sm:$0xff]  }
 0x724   : > { %v1742_v1 = vpop.f32.mrb[14].mxu0  ;;  %3492 = vmatpush3.bf16.msra.mxu1 %v3683_v0 }
 0x725   : > { %v4317_v2 = vadd.f32 %v3222_v61, %v1745_v62  ;;  %v3490_v4 = vpop.f32.mrb[15].mxu0  ;;  %3493 = vmatprep.subr.bf16.mxu1 %v3887_v3  ;;  %v3225_v62 = vld [vmem:[%s4769_s13] ss:$0 sm:$0xff] }
 0x727   : > { %1756 = vadd.xlane.f32.xlu1 %v4317_v2 }
 0x728   : > { %3494 = vmatpush3.bf16.msra.mxu1 %v3687_v10 }
 0x729   : > { %3495 = vmatprep.subr.bf16.mxu1 %v3887_v3 }
 0x72c   : > { %3496 = vmatpush3.bf16.msra.mxu1 %v3691_v21 }
 0x72d   : > { %3497 = vmatprep.subr.bf16.mxu1 %v3887_v3 }
 0x730   : > { %3498 = vmatpush3.bf16.msra.mxu1 %v3695_v24 }
 0x731   : > { %3499 = vmatprep.subr.bf16.mxu1 %v3887_v3 }
 0x734   : > { %3500 = vmatpush3.bf16.msra.mxu1 %v3699_v28 }
 0x735   : > { %3501 = vmatprep.subr.bf16.mxu1 %v3887_v3 }
 0x738   : > { %3502 = vmatpush3.bf16.msra.mxu1 %v3700_v32 }
 0x739   : > { %3503 = vmatprep.subr.bf16.mxu1 %v3887_v3 }
 0x73c   : > { %3504 = vmatpush3.bf16.msra.mxu1 %v3701_v33 }
 0x73d   : > { %3505 = vmatprep.subr.bf16.mxu1 %v3887_v3 }
 0x740   : > { %3506 = vmatpush3.bf16.msra.mxu1 %v3702_v34 }
 0x741   : > { %3511 = vmatprep.subr.bf16.mxu1 %v3887_v3 }
 0x742   : > { %v2036_v50 = vpop.f32.mrb[16].mxu0 }
 0x743   : > { %v2037_v51 = vadd.f32 %v2036_v50, %v1915_v48  ;;  %v2038_v52 = vpop.f32.mrb[17].mxu0 }
 0x744   : > { %v2039_v53 = vadd.f32 %v2038_v52, %v1919_v49  ;;  %v2040_v54 = vpop.f32.mrb[18].mxu0 }
 0x745   : > { %v2041_v55 = vadd.f32 %v2040_v54, %v1915_v48  ;;  %v2042_v56 = vpop.f32.mrb[19].mxu0 }
 0x746   : > { %v2043_v57 = vadd.f32 %v2042_v56, %v1919_v49 }
 0x747   : > { %v2053_v59 = vpack.c.bf16 %v2041_v55, %v2037_v51 }
 0x748   : > { %v4421_v60 = vpack.c.bf16 %v2043_v57, %v2039_v53 }
 0x749   : > { %v2076_v61 = vsel %vm1193_vm2, %v2053_v59, 0 }
 0x74a   : > { %3536 = vmatpush3.bf16.msra.mxu0 %v4421_v60 }
 0x74b   : > { %3547 = vmatprep.subr.bf16.mxu0 %v3887_v3 }
 0x7b4   : > { %v1757_v17 = vpop.xlane.xlu1 %1756 }
 0x7b5   : > { %v1758_v18 = vmul.f32 0.0078125, %v1757_v17  ;;  %v2265_v17 = vrot.slane %v2261_v58, %v4199_v46 }
 0x7b7   : > { %v1759_v19 = vsub.f32 %v4317_v2, %v1758_v18  ;;  %vm4460_vm8 = vcmp.eq.s32.totalorder %v2265_v17, 1 }
 0x7b9   : > { %v1760_v20 = vmul.f32 %v1759_v19, %v1759_v19 }
 0x7bb   : > { %1761 = vadd.xlane.f32.xlu0 %v1760_v20 }
 0x7d1   : > { %2055 = vrot.lane.b32.xlu0 %v2053_v59, %s4835_s7 }
 0x848   : > { %v1762_v35 = vpop.xlane.xlu0 %1761 }
 0x849   : > { %v1763_v36 = vmul.f32 0.0078125, %v1762_v35 }
 0x84b   : > { %v1764_v37 = vadd.f32 1e-05, %v1763_v36 }
 0x84c   : > { %v2056_v5 = vpop.permute.xlu0 %2055 }
 0x84d   : > { %3769 = vrsqrt.f32 %v1764_v37  ;;  %v2122_v8 = vsel %vm1193_vm2, %v2056_v5, 0 }
 0x857   : > { %v3770_v38 = vpop.eup %3769 }
 0x858   : > { %v1766_v40 = vmul.f32 %v3770_v38, %v1759_v19 }
 0x85a   : > { %v1773_v42 = vmul.f32 %v3223_v39, %v1766_v40 }
 0x85c   : > { %v1780_v43 = vadd.f32 %v3224_v41, %v1773_v42 }
 0x85e   : > { %v1781_v44 = vpack.c.bf16 %v1780_v43, %v1780_v43 }
 0x860   : > { %3508 = vmatmul.mubr.bf16.vlgmr.msra.gmra.mrb[28].mxu1 %v1781_v44 }
 0x861   : > { %3513 = vmatprep.mubr.msk.bf16.mxu1 %vm3889_vm0, %v3887_v3  ;;  %3512 = vmatpush3.bf16.xpose.msra.mxu1 %v2076_v61 }
 0x862   : > { %3517 = vmatprep.subr.bf16.mxu1 %v3887_v3 }
 0x933   : > { %v1887_v63 = vpop.f32.mrb[28].mxu1 }
 0x934   : > { %v1888_v1 = vadd.f32 %v3225_v62, %v1887_v63  ;;  %v3509_v4 = vpop.f32.mrb[29].mxu1 }
 0x935   : > { %v1890_v6 = vpop.f32.mrb[30].mxu1 }
 0x936   : > { %v2045_v7 = vpack.c.bf16 %v1888_v1, %v1888_v1  ;;  %v3510_v0 = vpop.f32.mrb[31].mxu1 }
 0x938   : > { %2049 = vrot.lane.b32.xlu0 %v2045_v7, %s4836_s2  ;;  %2047 = vrot.lane.b32.xlu1 %v2045_v7, %s4835_s7 }
 0x939   : > { %3514 = vmatmul.mubr.msk.bf16.vlgmr.msra.gmra.mrb[32].mxu1 %vm1193_vm2, %v2045_v7 }
 0x93a   : > { %3518 = vmatpush3.bf16.xpose.msra.mxu1 %v2122_v8  ;;  %3519 = vmatprep.mubr.msk.bf16.mxu1 %vm3889_vm0, %v3887_v3 }
 0x93b   : > { %3523 = vmatprep.subr.bf16.mxu1 %v3887_v3 }
 0x93c   : > { %2051 = vrot.lane.b32.xlu0 %v2045_v7, %s4837_s26  ;;  %2057 = vrot.lane.b32.xlu1 %v2053_v59, %s4836_s2 }
 0x940   : > { %2059 = vrot.lane.b32.xlu1 %v2053_v59, %s4837_s26 }
 0x9aa   : > { %v2048_v9 = vpop.permute.xlu1 %2047  ;;  %v2050_v13 = vpop.permute.xlu0 %2049 }
 0x9ab   : > { %3520 = vmatmul.mubr.msk.bf16.vlgmr.msra.gmra.mrb[36].mxu1 %vm1193_vm2, %v2048_v9 }
 0x9ac   : > { %3525 = vmatprep.mubr.msk.bf16.mxu1 %vm3889_vm0, %v3887_v3 }
 0x9ae   : > { %v2058_v10 = vpop.permute.xlu1 %2057  ;;  %v2052_v15 = vpop.permute.xlu0 %2051 }
 0x9af   : > { %v2168_v11 = vsel %vm1193_vm2, %v2058_v10, 0 }
 0x9b0   : > { %3524 = vmatpush3.bf16.xpose.msra.mxu1 %v2168_v11 }
 0x9b1   : > { %3529 = vmatprep.subr.bf16.mxu1 %v3887_v3 }
 0x9b2   : > { %v2060_v12 = vpop.permute.xlu1 %2059 }
 0x9b3   : > { %v2214_v14 = vsel %vm1193_vm2, %v2060_v12, 0 }
 0x9b7   : > { %3526 = vmatmul.mubr.msk.bf16.vlgmr.msra.gmra.mrb[40].mxu1 %vm1193_vm2, %v2050_v13 }
 0x9b8   : > { %3530 = vmatpush3.bf16.xpose.msra.mxu1 %v2214_v14  ;;  %3531 = vmatprep.mubr.msk.bf16.mxu1 %vm3889_vm0, %v3887_v3 }
 0x9b9   : > { %3541 = vmatprep.subr.bf16.mxu1 %v3887_v3 }
 0x9bf   : > { %3532 = vmatmul.mubr.msk.bf16.vlgmr.msra.gmra.mrb[44].mxu1 %vm1193_vm2, %v2052_v15 }
 0x9c0   : > { %3543 = vmatprep.mubr.msk.bf16.mxu1 %vm3889_vm0, %v3887_v3 }
 0xa0c   : > { %v2112_v18 = vpop.f32.mrb[32].mxu1 }
 0xa0d   : > { %v2256_v20 = vmul.f32 0.17677669, %v2112_v18  ;;  %v3515_v21 = vpop.f32.mrb[33].mxu1 }
 0xa0e   : > { %v2115_v22 = vpop.f32.mrb[34].mxu1 }
 0xa0f   : > { %v3516_v23 = vpop.f32.mrb[35].mxu1  ;;  %v2267_v24 = vsel %vm4460_vm8, %v2256_v20, -1e+09 }
 0xa10   : > { %v2272_v26 = vsel %vm2271_vm9, %v2267_v24, -inf }
 0xa11   : > { %2273 = vmax.xlane.f32.xlu1 %v2272_v26 }
 0xa7e   : > { %v2158_v27 = vpop.f32.mrb[36].mxu1 }
 0xa7f   : > { %v2257_v28 = vmul.f32 0.17677669, %v2158_v27  ;;  %v3521_v29 = vpop.f32.mrb[37].mxu1 }
 0xa80   : > { %v2161_v30 = vpop.f32.mrb[38].mxu1 }
 0xa81   : > { %v3522_v31 = vpop.f32.mrb[39].mxu1  ;;  %v2268_v32 = vsel %vm4460_vm8, %v2257_v28, -1e+09 }
 0xa82   : > { %v2275_v33 = vsel %vm2271_vm9, %v2268_v32, -inf }
 0xa83   : > { %2276 = vmax.xlane.f32.xlu0 %v2275_v33  ;;  %v3704_v33 = vld [vmem:[%s4772_s16 + $0x8] sm:$0xff]  }
 0xa8a   : > { %v2204_v34 = vpop.f32.mrb[40].mxu1 }
 0xa8b   : > { %v2258_v35 = vmul.f32 0.17677669, %v2204_v34  ;;  %v3527_v36 = vpop.f32.mrb[41].mxu1 }
 0xa8c   : > { %v2207_v37 = vpop.f32.mrb[42].mxu1  ;;  %v3705_v36 = vld [vmem:[%s4772_s16 + $0x10] sm:$0xff]  }
 0xa8d   : > { %v3528_v38 = vpop.f32.mrb[43].mxu1  ;;  %v2269_v39 = vsel %vm4460_vm8, %v2258_v35, -1e+09 }
 0xa8e   : > { %v2278_v40 = vsel %vm2271_vm9, %v2269_v39, -inf  ;;  %v3706_v38 = vld [vmem:[%s4772_s16 + $0x18] sm:$0xff]  }
 0xa8f   : > { %2279 = vmax.xlane.f32.xlu0 %v2278_v40 }
 0xa92   : > { %v2250_v41 = vpop.f32.mrb[44].mxu1 }
 0xa93   : > { %v2259_v42 = vmul.f32 0.17677669, %v2250_v41  ;;  %v3533_v43 = vpop.f32.mrb[45].mxu1 }
 0xa94   : > { %v2253_v44 = vpop.f32.mrb[46].mxu1 }
 0xa95   : > { %v3534_v47 = vpop.f32.mrb[47].mxu1  ;;  %v2270_v48 = vsel %vm4460_vm8, %v2259_v42, -1e+09  ;;  %v3707_v42 = vld [vmem:[%s4772_s16 + $0x20] sm:$0xff]   ;;  %v3708_v44 = vld [vmem:[%s4772_s16 + $0x28] sm:$0xff]  }
 0xa96   : > { %v2281_v49 = vsel %vm2271_vm9, %v2270_v48, -inf  ;;  %v3709_v47 = vld [vmem:[%s4772_s16 + $0x30] sm:$0xff]  }
 0xa97   : > { %2282 = vmax.xlane.f32.xlu1 %v2281_v49 }
 0xa9e   : > { %v2274_v50 = vpop.xlane.xlu1 %2273 }
 0xa9f   : > { %v2284_v51 = vsub.f32 %v2267_v24, %v2274_v50 }
 0xaa1   : > { %v2288_v52 = vmul.f32 1.442695, %v2284_v51 }
 0xaa3   : > { %3771 = vpow2.f32 %v2288_v52 }
 0xaad   : > { %v3772_v53 = vpop.eup %3771 }
 0xaae   : > { %v2296_v54 = vsel %vm2271_vm9, %v3772_v53, 0.0 }
 0xaaf   : > { %2297 = vadd.xlane.f32.xlu0 %v2296_v54 }
 0xb10   : > { %v2277_v55 = vpop.xlane.xlu0 %2276 }
 0xb11   : > { %v2285_v56 = vsub.f32 %v2268_v32, %v2277_v55  ;;  %v3703_v32 = vld [vmem:[%s4772_s16] sm:$0xff]  }
 0xb13   : > { %v2290_v57 = vmul.f32 1.442695, %v2285_v56 }
 0xb15   : > { %3773 = vpow2.f32 %v2290_v57 }
 0xb1c   : > { %v2280_v59 = vpop.xlane.xlu0 %2279 }
 0xb1d   : > { %v2286_v61 = vsub.f32 %v2269_v39, %v2280_v59 }
 0xb1f   : > { %v3774_v62 = vpop.eup %3773  ;;  %v2292_v63 = vmul.f32 1.442695, %v2286_v61 }
 0xb20   : > { %v2299_v1 = vsel %vm2271_vm9, %v3774_v62, 0.0 }
 0xb21   : > { %3775 = vpow2.f32 %v2292_v63  ;;  %2300 = vadd.xlane.f32.xlu1 %v2299_v1 }
 0xb24   : > { %v2283_v7 = vpop.xlane.xlu1 %2282 }
 0xb25   : > { %v2287_v0 = vsub.f32 %v2270_v48, %v2283_v7  ;;  %v3710_v48 = vld [vmem:[%s4772_s16 + $0x38] sm:$0xff]   ;;  %v3711_v7 = vld [vmem:[%s4776_s20] ss:$8 sps:$4 sm:$0xff]  }
 0xb27   : > { %v2294_v8 = vmul.f32 1.442695, %v2287_v0  ;;  %v3713_v0 = vld [vmem:[%s4776_s20 + $0x4] ss:$8 sps:$4 sm:$0xff]  }
 0xb2b   : > { %v3776_v4 = vpop.eup %3775 }
 0xb2c   : > { %v2302_v5 = vsel %vm2271_vm9, %v3776_v4, 0.0 }
 0xb2d   : > { %2303 = vadd.xlane.f32.xlu0 %v2302_v5 }
 0xb32   : > { %2066 = vrot.lane.b32.xlu1 %v4421_v60, %s4836_s2 }
 0xb3c   : > { %v2298_v6 = vpop.xlane.xlu0 %2297 }
 0xb3d   : > { %3777 = vrcp.f32 %v2298_v6 }
 0xb3e   : > { %3779 = vpow2.f32 %v2294_v8  ;;  %v3716_v8 = vld [vmem:[%s4776_s20 + $0x14] ss:$8 sps:$4 sm:$0xff]  }
 0xb43   : > { %2063 = vrot.lane.b32.xlu0 %v4421_v60, %s4835_s7 }
 0xb47   : > { %v3778_v9 = vpop.eup %3777 }
 0xb48   : > { %v2309_v10 = vmul.f32 %v3778_v9, %v3772_v53  ;;  %v3780_v12 = vpop.eup %3779  ;;  %v3719_v9 = vld [vmem:[%s4776_s20 + $0x24] ss:$8 sps:$4 sm:$0xff]  }
 0xb49   : > { %v2305_v13 = vsel %vm2271_vm9, %v3780_v12, 0.0 }
 0xb4a   : > { %v2316_v11 = vpack.c.bf16 %v2309_v10, %v2309_v10  ;;  %2507 = vst.msk [vmem:[%s4487_s29] sm:$0xff] %vm2271_vm9, %v2309_v10  ;;  %v3717_v10 = vld [vmem:[%s4776_s20 + $0x20] ss:$8 sps:$4 sm:$0xff]  }
 0xb4c   : > { %3538 = vmatmul.mubr.msk.bf16.vlgmr.msra.gmra.mrb[20].mxu0 %vm2271_vm9, %v2316_v11 }
 0xb4d   : > { %3549 = vmatprep.mubr.msk.bf16.mxu0 %vm3889_vm0, %v3887_v3 }
 0xb56   : > { %2306 = vadd.xlane.f32.xlu1 %v2305_v13 }
 0xb67   : > { %2069 = vrot.lane.b32.xlu1 %v4421_v60, %s4837_s26 }
 0xbae   : > { %v2301_v14 = vpop.xlane.xlu1 %2300 }
 0xbaf   : > { %3781 = vrcp.f32 %v2301_v14 }
 0xbb2   : > { %v2067_v15 = vpop.permute.xlu1 %2066 }
 0xbb3   : > { %3548 = vmatpush3.bf16.msra.mxu0 %v2067_v15  ;;  %v3722_v15 = vld [vmem:[%s4776_s20 + $0x34] ss:$8 sps:$4 sm:$0xff]  }
 0xbb4   : > { %3559 = vmatprep.subr.bf16.mxu0 %v3887_v3 }
 0xbb9   : > { %v3782_v16 = vpop.eup %3781 }
 0xbba   : > { %v2311_v58 = vmul.f32 %v3782_v16, %v3774_v62  ;;  %v2304_v17 = vpop.xlane.xlu0 %2303  ;;  %v3266_v62 = vld [vmem:[%s4773_s17] ss:$0 sm:$0xff]  ;;  %v3720_v16 = vld [vmem:[%s4776_s20 + $0x30] ss:$8 sps:$4 sm:$0xff]  }
 0xbbb   : > { %3783 = vrcp.f32 %v2304_v17  ;;  %v3723_v17 = vld [vmem:[%s4776_s20 + $0x40] ss:$8 sps:$4 sm:$0xff]  }
 0xbbc   : > { %2508 = vst.msk [vmem:[%s4487_s29 + $0x8] sm:$0xff] %vm2271_vm9, %v2311_v58  ;;  %v2317_v19 = vpack.c.bf16 %v2311_v58, %v2311_v58  ;;  %v3725_v58 = vld [vmem:[%s4776_s20 + $0x44] ss:$8 sps:$4 sm:$0xff]  }
 0xbbe   : > { %v2064_v18 = vpop.permute.xlu0 %2063 }
 0xbbf   : > { %3542 = vmatpush3.bf16.msra.mxu1 %v2064_v18  ;;  %v3728_v18 = vld [vmem:[%s4776_s20 + $0x54] ss:$8 sps:$4 sm:$0xff]  }
 0xbc0   : > { %3553 = vmatprep.subr.bf16.mxu1 %v3887_v3 }
 0xbc2   : > { %3544 = vmatmul.mubr.msk.bf16.vlgmr.msra.gmra.mrb[48].mxu1 %vm2271_vm9, %v2317_v19  ;;  %v3726_v19 = vld [vmem:[%s4776_s20 + $0x50] ss:$8 sps:$4 sm:$0xff]  }
 0xbc3   : > { %3555 = vmatprep.mubr.msk.bf16.mxu1 %vm3889_vm0, %v3887_v3 }
 0xbc5   : > { %v3784_v60 = vpop.eup %3783 }
 0xbc6   : > { %v2313_v20 = vmul.f32 %v3784_v60, %v3776_v4  ;;  %v3731_v60 = vld [vmem:[%s4776_s20 + $0x64] ss:$8 sps:$4 sm:$0xff]  }
 0xbc8   : > { %v2318_v21 = vpack.c.bf16 %v2313_v20, %v2313_v20  ;;  %2509 = vst.msk [vmem:[%s4487_s29 + $0x10] sm:$0xff] %vm2271_vm9, %v2313_v20  ;;  %v3729_v20 = vld [vmem:[%s4776_s20 + $0x60] ss:$8 sps:$4 sm:$0xff]  }
 0xbca   : > { %3550 = vmatmul.mubr.msk.bf16.vlgmr.msra.gmra.mrb[24].mxu0 %vm2271_vm9, %v2318_v21  ;;  %v3734_v21 = vld [vmem:[%s4776_s20 + $0x74] ss:$8 sps:$4 sm:$0xff]  }
 0xbcb   : > { %3575 = vmatprep.mubr.msk.bf16.mxu0 %vm3889_vm0, %v3887_v3  ;;  %3560 = vmatpush3.bf16.msra.mxu0 %v3703_v32  ;;  %v3743_v32 = vld [vmem:[%s4778_s22 + $0x60] sm:$0xff]  }
 0xbcc   : > { %3561 = vmatprep.subr.bf16.mxu0 %v3887_v3 }
 0xbcf   : > { %3562 = vmatpush3.bf16.msra.mxu0 %v3704_v33  ;;  %v3744_v33 = vld [vmem:[%s4778_s22 + $0x20] sm:$0xff]  }
 0xbd0   : > { %3563 = vmatprep.subr.bf16.mxu0 %v3887_v3 }
 0xbd3   : > { %3564 = vmatpush3.bf16.msra.mxu0 %v3705_v36 }
 0xbd4   : > { %3565 = vmatprep.subr.bf16.mxu0 %v3887_v3 }
 0xbd7   : > { %3566 = vmatpush3.bf16.msra.mxu0 %v3706_v38 }
 0xbd8   : > { %3567 = vmatprep.subr.bf16.mxu0 %v3887_v3 }
 0xbdb   : > { %3568 = vmatpush3.bf16.msra.mxu0 %v3707_v42 }
 0xbdc   : > { %3569 = vmatprep.subr.bf16.mxu0 %v3887_v3 }
 0xbdf   : > { %3570 = vmatpush3.bf16.msra.mxu0 %v3708_v44 }
 0xbe0   : > { %3571 = vmatprep.subr.bf16.mxu0 %v3887_v3 }
 0xbe3   : > { %v2307_v22 = vpop.xlane.xlu1 %2306  ;;  %3572 = vmatpush3.bf16.msra.mxu0 %v3709_v47  ;;  %v3747_v47 = vld [vmem:[%s4778_s22 + $0x70] sm:$0xff]  }
 0xbe4   : > { %3785 = vrcp.f32 %v2307_v22  ;;  %3573 = vmatprep.subr.bf16.mxu0 %v3887_v3  ;;  %v3732_v22 = vld [vmem:[%s4776_s20 + $0x70] ss:$8 sps:$4 sm:$0xff]  }
 0xbe7   : > { %v2070_v23 = vpop.permute.xlu1 %2069  ;;  %3574 = vmatpush3.bf16.msra.mxu0 %v3710_v48  ;;  %v3748_v48 = vld [vmem:[%s4778_s22 + $0x30] sm:$0xff]  }
 0xbe8   : > { %3554 = vmatpush3.bf16.msra.mxu1 %v2070_v23  ;;  %v3735_v23 = vld [vmem:[%s4778_s22 + $0x40] sm:$0xff]  }
 0xbe9   : > { %2761 = vmatprep.subr.bf16.mxu1 %v3713_v0  ;;  %3381 = vmatprep.subr.bf16.mxu0 %v3735_v23  ;;  %v3301_v0 = vld [vmem:[%s4779_s23] ss:$0 sm:$0xff] }
 0xbee   : > { %v3786_v24 = vpop.eup %3785 }
 0xbef   : > { %v2315_v26 = vmul.f32 %v3786_v24, %v3780_v12  ;;  %v3736_v24 = vld [vmem:[%s4778_s22] sm:$0xff]  }
 0xbf1   : > { %v2319_v27 = vpack.c.bf16 %v2315_v26, %v2315_v26  ;;  %2510 = vst.msk [vmem:[%s4487_s29 + $0x18] sm:$0xff] %vm2271_vm9, %v2315_v26  ;;  %v3737_v26 = vld [vmem:[%s4778_s22 + $0x48] sm:$0xff]  }
 0xbf3   : > { %3556 = vmatmul.mubr.msk.bf16.vlgmr.msra.gmra.mrb[52].mxu1 %vm2271_vm9, %v2319_v27  ;;  %v3738_v27 = vld [vmem:[%s4778_s22 + $0x8] sm:$0xff]  }
 0xbf4   : > { %2793 = vmatprep.mubr.bf16.mxu1 %v3888_v25  ;;  %2762 = vmatpush1.bf16.msra.mxu1 %v3711_v7 }
 0xbf5   : > { %2763 = vmatprep.subr.bf16.mxu1 %v3716_v8 }
 0xc1f   : > { %v2357_v28 = vpop.f32.mrb[20].mxu0 }
 0xc20   : > { %v3539_v29 = vpop.f32.mrb[21].mxu0 }
 0xc21   : > { %v2360_v30 = vpop.f32.mrb[22].mxu0  ;;  %v3740_v29 = vld [vmem:[%s4778_s22 + $0x10] sm:$0xff]  }
 0xc22   : > { %v3540_v31 = vpop.f32.mrb[23].mxu0  ;;  %v3741_v30 = vld [vmem:[%s4778_s22 + $0x58] sm:$0xff]  }
 0xc23   : > { %v3742_v31 = vld [vmem:[%s4778_s22 + $0x18] sm:$0xff]  }
 0xc95   : > { %v2400_v34 = vpop.f32.mrb[48].mxu1 }
 0xc96   : > { %2493 = vrot.lane.b32.xlu0 %v2400_v34, %s4837_s26  ;;  %v3545_v35 = vpop.f32.mrb[49].mxu1  ;;  %v3745_v34 = vld [vmem:[%s4778_s22 + $0x68] sm:$0xff]   ;;  %s3893_s26 = smov [#allocation4]  }
 0xc97   : > { %v2403_v25 = vpop.f32.mrb[50].mxu1  ;;  %v3746_v35 = vld [vmem:[%s4778_s22 + $0x28] sm:$0xff]  }
 0xc98   : > { %v3546_v37 = vpop.f32.mrb[51].mxu1 }
 0xc9d   : > { %v2443_v39 = vpop.f32.mrb[24].mxu0 }
 0xc9e   : > { %2497 = vrot.lane.b32.xlu1 %v2443_v39, %s4836_s2  ;;  %v3551_v40 = vpop.f32.mrb[25].mxu0  ;;  %v3267_v39 = vld [vmem:[%s4774_s18] ss:$0 sm:$0xff] }
 0xc9f   : > { %v2446_v41 = vpop.f32.mrb[26].mxu0 }
 0xca0   : > { %v3552_v43 = vpop.f32.mrb[27].mxu0  ;;  %v3268_v41 = vld [vmem:[%s4775_s19] ss:$0 sm:$0xff] }
 0xcc6   : > { %v2486_v49 = vpop.f32.mrb[52].mxu1 }
 0xcc7   : > { %2501 = vrot.lane.b32.xlu0 %v2486_v49, %s4835_s7  ;;  %v3557_v50 = vpop.f32.mrb[53].mxu1  ;;  %v3749_v49 = vld [vmem:[%s4778_s22 + $0x78] sm:$0xff]   ;;  %s3795_s7 = sshll.u32 %s3893_s26, 4  ;;  %s3796_s7 = int_to_ptr.vmem [resolvable:$false] %s3795_s7 }
 0xcc8   : > { %v2489_v51 = vpop.f32.mrb[54].mxu1  ;;  %v3750_v50 = vld [vmem:[%s4778_s22 + $0x38] sm:$0xff]   ;;  %s3797_s29 = scalar_lea.vmem %s3796_s7, 1024  ;;  %p3798_p0 = scmp.lt.s32.totalorder %s4671_s30, %s3796_s7 }
 0xcc9   : > { %v3558_v52 = vpop.f32.mrb[55].mxu1  ;;  %v2669_v51 = vld [vmem:[%s4777_s21] sm:$0x3]  ;;  %p3799_p1 = scmp.lt.s32.totalorder %s3797_s29, %s3791_s3 }
 0xcca   : > { %v2674_v52 = vrot.slane %v2669_v51, %v4199_v46 }
 0xccb   : > { %p3800_p2 = por %p3799_p1, %p3798_p0 }
 0xccd   : > { %p3801_p3 = pnand %p3800_p2, %p3794_p13 }
 0xd08   : > { %v2494_v53 = vpop.permute.xlu0 %2493 }
 0xd09   : > { %v2504_v55 = vsel %vm1193_vm2, %v2357_v28, %v2494_v53  ;;  %v3739_v28 = vld [vmem:[%s4778_s22 + $0x50] sm:$0xff]   ;;  %v2678_v53 = vrot.slane %v2669_v51, %v4197_v45 }
 0xd10   : > { %v2498_v54 = vpop.permute.xlu1 %2497 }
 0xd11   : > { %v2505_v56 = vsel %vm1636_vm5, %v2504_v55, %v2498_v54 }
 0xd39   : > { %v2502_v57 = vpop.permute.xlu0 %2501 }
 0xd3a   : > { %v2506_v3 = vsel %vm1638_vm6, %v2505_v56, %v2502_v57 }
 0xd3b   : > { %v2511_v59 = vpack.c.bf16 %v2506_v3, %v2506_v3 }
 0xd3d   : > { %3576 = vmatmul.mubr.bf16.vlgmr.msra.gmra.mrb[28].mxu0 %v2511_v59 }
 0xd3e   : > { %3382 = vmatpush3.bf16.msra.mxu0 %v3736_v24 }
 0xd3f   : > { %3383 = vmatprep.subr.bf16.mxu0 %v3737_v26 }
 0xd42   : > { %3384 = vmatpush3.bf16.msra.mxu0 %v3738_v27 }
 0xd43   : > { %3385 = vmatprep.subr.bf16.mxu0 %v3739_v28 }
 0xd46   : > { %3386 = vmatpush3.bf16.msra.mxu0 %v3740_v29 }
 0xd47   : > { %3387 = vmatprep.subr.bf16.mxu0 %v3741_v30 }
 0xd4a   : > { %3388 = vmatpush3.bf16.msra.mxu0 %v3742_v31 }
 0xd4b   : > { %3389 = vmatprep.subr.bf16.mxu0 %v3743_v32 }
 0xd4e   : > { %3390 = vmatpush3.bf16.msra.mxu0 %v3744_v33 }
 0xd4f   : > { %3391 = vmatprep.subr.bf16.mxu0 %v3745_v34 }
 0xd52   : > { %3392 = vmatpush3.bf16.msra.mxu0 %v3746_v35 }
 0xd53   : > { %3393 = vmatprep.subr.bf16.mxu0 %v3747_v47 }
 0xd56   : > { %3394 = vmatpush3.bf16.msra.mxu0 %v3748_v48 }
 0xd57   : > { %3395 = vmatprep.subr.bf16.mxu0 %v3749_v49 }
 0xd5a   : > { %3396 = vmatpush3.bf16.msra.mxu0 %v3750_v50 }
 0xe10   : > { %v2610_v61 = vpop.f32.mrb[28].mxu0 }
 0xe11   : > { %v2616_v63 = vadd.f32 %v2610_v61, %v4317_v2  ;;  %v3577_v1 = vpop.f32.mrb[29].mxu0  ;;  %v3714_v2 = vld [vmem:[%s4776_s20 + $0x10] ss:$8 sps:$4 sm:$0xff]  }
 0xe12   : > { %v2613_v4 = vpop.f32.mrb[30].mxu0  ;;  %2764 = vmatpush1.bf16.msra.mxu1 %v3714_v2 }
 0xe13   : > { %v4554_v5 = vadd.f32 %v3266_v62, %v2616_v63  ;;  %v3578_v6 = vpop.f32.mrb[31].mxu0  ;;  %2765 = vmatprep.subr.bf16.mxu1 %v3719_v9 }
 0xe15   : > { %2627 = vadd.xlane.f32.xlu1 %v4554_v5 }
 0xe16   : > { %2766 = vmatpush1.bf16.msra.mxu1 %v3717_v10 }
 0xe17   : > { %2767 = vmatprep.subr.bf16.mxu1 %v3722_v15 }
 0xe1a   : > { %2768 = vmatpush1.bf16.msra.mxu1 %v3720_v16 }
 0xe1b   : > { %2769 = vmatprep.subr.bf16.mxu1 %v3725_v58 }
 0xe1e   : > { %2770 = vmatpush1.bf16.msra.mxu1 %v3723_v17 }
 0xe1f   : > { %2771 = vmatprep.subr.bf16.mxu1 %v3728_v18 }
 0xe22   : > { %2772 = vmatpush1.bf16.msra.mxu1 %v3726_v19 }
 0xe23   : > { %2773 = vmatprep.subr.bf16.mxu1 %v3731_v60 }
 0xe26   : > { %2774 = vmatpush1.bf16.msra.mxu1 %v3729_v20 }
 0xe27   : > { %2775 = vmatprep.subr.bf16.mxu1 %v3734_v21 }
 0xe2a   : > { %2776 = vmatpush1.bf16.msra.mxu1 %v3732_v22 }
 0xea2   : > { %v2628_v11 = vpop.xlane.xlu1 %2627 }
 0xea3   : > { %v2629_v12 = vmul.f32 0.0078125, %v2628_v11 }
 0xea5   : > { %v2630_v13 = vsub.f32 %v4554_v5, %v2629_v12 }
 0xea7   : > { %v2631_v14 = vmul.f32 %v2630_v13, %v2630_v13 }
 0xea9   : > { %2632 = vadd.xlane.f32.xlu0 %v2631_v14 }
 0xf36   : > { %v2633_v25 = vpop.xlane.xlu0 %2632 }
 0xf37   : > { %v2634_v36 = vmul.f32 0.0078125, %v2633_v25 }
 0xf39   : > { %v2635_v37 = vadd.f32 1e-05, %v2634_v36 }
 0xf3b   : > { %3787 = vrsqrt.f32 %v2635_v37 }
 0xf45   : > { %v3788_v38 = vpop.eup %3787 }
 0xf46   : > { %v2637_v40 = vmul.f32 %v3788_v38, %v2630_v13 }
 0xf48   : > { %v2644_v42 = vmul.f32 %v3267_v39, %v2637_v40 }
 0xf4a   : > { %v2651_v43 = vadd.f32 %v3268_v41, %v2644_v42 }
 0xf4c   : > { %v2652_v44 = vpack.c.bf16 %v2651_v43, %v2651_v43 }
 0xf4e   : > { %2794 = vmatmul.mubr.bf16.vlgmr.msra.gmra.mrb[56].mxu1 %v2652_v44 }
0x1021   : > { %v2795_v54 = vpop.f32.mrb[56].mxu1 }
0x1022   : > { %v2796_v55 = vadd.f32 %v2795_v54, %v2674_v52  ;;  %v2797_v56 = vpop.f32.mrb[57].mxu1 }
0x1023   : > { %v2798_v57 = vadd.f32 %v2797_v56, %v2678_v53  ;;  %v2799_v3 = vpop.f32.mrb[58].mxu1 }
0x1024   : > { %v2802_v59 = vmax.f32 %v2796_v55, 0.0  ;;  %v2800_v61 = vpop.f32.mrb[59].mxu1 }
0x1025   : > { %v2803_v62 = vmax.f32 %v2798_v57, 0.0 }
0x1026   : > { %v2804_v1 = vpack.c.bf16 %v2802_v59, %v2802_v59 }
0x1027   : > { %v2805_v63 = vpack.c.bf16 %v2803_v62, %v2803_v62 }
0x1029   : > { %2966 = vmatprep.mubr.bf16.mxu0 %v2805_v63 }
0x102a   : > { %2967 = vmatmul.mubr.bf16.vlgmr.msra.gmra.mrb[32].mxu0 %v2804_v1 }
0x10fd   : > { %v3397_v4 = vpop.f32.mrb[32].mxu0 }
0x10fe   : > { %v3398_v6 = vpop.f32.mrb[33].mxu0 }
0x10ff   : > { %v3399_v7 = vadd.f32 %v3398_v6, %v3397_v4  ;;  %v3400_v46 = vpop.f32.mrb[34].mxu0 }
0x1100   : > { %v3401_v45 = vpop.f32.mrb[35].mxu0 }
0x1101   : > { %v2974_v8 = vadd.f32 %v3399_v7, %v4554_v5 }
0x1103   : > { %v2982_v2 = vadd.f32 %v3301_v0, %v2974_v8 }
0x1105   : > { %2985 = vadd.xlane.f32.xlu0 %v2982_v2 }
0x1192   : > { %v2986_v9 = vpop.xlane.xlu0 %2985 }
0x1193   : > { %v2987_v10 = vmul.f32 0.0078125, %v2986_v9 }
0x1195   : > { %v2988_v11 = vsub.f32 %v2982_v2, %v2987_v10 }
0x1197   : > { %v2989_v12 = vmul.f32 %v2988_v11, %v2988_v11 }
0x1199   : > { %2990 = vadd.xlane.f32.xlu1 %v2989_v12 }
0x119a   : > { %3804 = shalt.err (!%p3801_p3)
}
0x119b   : > { %s3805_s6 = scalar_lea.hbm %s4676_s5, 512  ;;  %s3809_s2 = scalar_lea.hbm %s4783_s27, 1024 }
0x119c   : > { %p3806_p4 = scmp.ne.s32.totalorder %s4676_s5, %s3805_s6  ;;  %p3810_p9 = scmp.lt.u32.totalorder %s4676_s5, %s4783_s27 }
0x119d   : > { %p3811_p10 = scmp.lt.u32.totalorder %s3809_s2, %s3805_s6  ;;  %p3813_p12 = scmp.lt.u32.totalorder %s3805_s6, %s4676_s5 }
0x119e   : > { %p3807_p7 = pnand %p3806_p4, %p4075_p5 }
0x119f   : > { %p3812_p11 = por %p3811_p10, %p3810_p9 }
0x11a0   : > { %p3808_p8 = pneg %p3807_p7 }
0x11a1   : > { %p3814_p13 = por %p3813_p12, %p3812_p11 }
0x11a3   : > { %p3815_p0 = pnand %p3814_p13, %p3808_p8 }
0x11a5   : > { %3818 = shalt.err (!%p3815_p0)
}
0x11a6   : > { %s3894_s3 = smov 128   ;;  %s3895_s29 = smov 8   ;;  %v3302_v16 = vld [vmem:[%s4780_s24] ss:$0 sm:$0xff] }
0x11a7   : > { %3580 = dma.vmem_to_hbm [thread:$0]  (%p4075_p5), %s4671_s30, 512, %s4676_s5, %s3017_s0, %s3894_s3, %s3894_s3, %s3895_s29  }
0x11a8   : > { %s3174_s6 = sshll.u32 %s4482_s11, 3  ;;  %v3303_v17 = vld [vmem:[%s4781_s25] ss:$0 sm:$0xff]  ;;  %s3306_s7 = sshll.u32 %s4058_s9, 7 }
0x11a9   : > { %s852_s12 = scalar_lea.vmem [#allocation2], %s3174_s6  ;;  %s4841_s3 = sld [smem:[#allocation27_spill]] }
0x11aa   : > { %s3030_s30 = sshll.u32 %s852_s12, 4  ;;  %s3012_s10 = scalar_lea.sflag [#allocation3], %s4482_s11  ;;  %s4715_s30 = int_to_ptr.vmem [resolvable:$true] %s3030_s30 }
0x11ab   : > { %s3819_s8 = scalar_lea.vmem %s4715_s30, 128  ;;  %s3896_s9 = smov [#allocation2]  }
0x11ac   : > { %p3820_p1 = scmp.ne.s32.totalorder %s4715_s30, %s3819_s8  ;;  %s3823_s6 = sshll.u32 %s3896_s9, 4  ;;  %s3824_s6 = int_to_ptr.vmem [resolvable:$false] %s3823_s6 }
0x11ad   : > { %s3825_s2 = scalar_lea.vmem %s3824_s6, 256  ;;  %p3826_p4 = scmp.lt.s32.totalorder %s4715_s30, %s3824_s6 }
0x11ae   : > { %p3821_p2 = pnand %p3820_p1, %p4075_p5  ;;  %p3827_p7 = scmp.lt.s32.totalorder %s3825_s2, %s3819_s8 }
0x11af   : > { %s4713_s29 = scalar_lea.hbm %s4841_s3, %s3306_s7 }
0x11b0   : > { %p3822_p3 = pneg %p3821_p2  ;;  %p3828_p8 = por %p3827_p7, %p3826_p4 }
0x11b2   : > { %p3829_p9 = pnand %p3828_p8, %p3822_p3 }
0x1226   : > { %v2991_v5 = vpop.xlane.xlu1 %2990 }
0x1227   : > { %v2992_v13 = vmul.f32 0.0078125, %v2991_v5 }
0x1229   : > { %v2993_v14 = vadd.f32 1e-05, %v2992_v13 }
0x122b   : > { %3789 = vrsqrt.f32 %v2993_v14 }
0x1235   : > { %v3790_v15 = vpop.eup %3789 }
0x1236   : > { %v2995_v58 = vmul.f32 %v3790_v15, %v2988_v11 }
0x1238   : > { %v3002_v18 = vmul.f32 %v3302_v16, %v2995_v58 }
0x123a   : > { %v3009_v19 = vadd.f32 %v3303_v17, %v3002_v18 }
0x123c   : > { %3010 = vst [vmem:[%s852_s12] sm:$0xff] %v3009_v19 }
0x123d   : > { %3832 = shalt.err (!%p3829_p9)
}
0x123e   : > { %s3833_s12 = scalar_lea.hbm %s4713_s29, 128  ;;  %s3837_s7 = scalar_lea.hbm %s4841_s3, 256 }
0x123f   : > { %p3834_p10 = scmp.ne.s32.totalorder %s4713_s29, %s3833_s12  ;;  %p3838_p13 = scmp.lt.u32.totalorder %s4713_s29, %s4841_s3 }
0x1240   : > { %p3839_p0 = scmp.lt.u32.totalorder %s3837_s7, %s3833_s12  ;;  %p3841_p2 = scmp.lt.u32.totalorder %s3833_s12, %s4713_s29 }
0x1241   : > { %p3835_p11 = pnand %p3834_p10, %p4075_p5 }
0x1242   : > { %p3840_p1 = por %p3839_p0, %p3838_p13 }
0x1243   : > { %p3836_p12 = pneg %p3835_p11 }
0x1244   : > { %p3842_p3 = por %p3841_p2, %p3840_p1 }
0x1246   : > { %p3843_p4 = pnand %p3842_p3, %p3836_p12 }
0x1248   : > { %3846 = shalt.err (!%p3843_p4)
}
0x1249   : > { %3579 = dma.vmem_to_hbm [thread:$0]  (%p4075_p5), %s4715_s30, 128, %s4713_s29, %s3012_s10  }
0x124a PF: > { %s4842_s8 = sld [smem:[#allocation10_spill]]  ;;  %s4843_s9 = sld [smem:[#allocation8_spill]] }
0x1250   : > { %p3590_p7 = scmp.ge.s32.totalorder %s4842_s8, 2  ;;  %s3058_s2 = sand.u32 1, %s4843_s9  }
0x1251   : > { %s3059_s11 = scalar_lea.sflag [#allocation3], %s3058_s2 }
0x1252   : > { %p3584_p8 = pnand %p3590_p7, %p4079_p6 }
0x1254   : > { %3864 = dma.done.wait (!%p3584_p8), %s3059_s11, 128  }
0x1255   : > { %3866 = vsyncadd (!%p3584_p8), %s3059_s11, 4294967168  ;;  %s3068_s12 = scalar_lea.sflag [#allocation5], %s3058_s2 }
0x1256   : > { %3868 = dma.done.wait (!%p3584_p8), %s3068_s12, 512  }
0x1257   : > { %3870 = vsyncadd (!%p3584_p8), %s3068_s12, 4294966784  ;;  %s4845_s30 = sld [smem:[#allocation11_spill]]  ;;  %s4846_s1 = sld [smem:[#allocation9_spill]] }
0x1258   : > { %s4847_s8 = sld [smem:[#allocation12_spill]]  ;;  %s4848_s7 = smov %s3877_s4 }
0x125d   : > { %p41_p5 = scmp.ge.s32.totalorder %s4845_s30, 4   ;;  %s4849_s4 = smov %s4846_s1 }
0x125f   :  { %43 = sbr.rel (!%p41_p5) target bundleno = 20 (0x14), region = 185 }
0x1266   :  { %3073 = vsyncpa [#allocation3], 1 }
0x1267   :  { %3075 = vsyncpa [#allocation3 + $0x1], 1 }
0x1268   :  { %3076 = vsyncpa [#allocation5], 1 }
0x1269   :  { %3078 = vsyncpa [#allocation5 + $0x1], 1 }

</bundles_post_ra>
